<compile_context>
chip_gen: v6e
topology: v6e:2x2x1
jax: 0.10.0
libtpu: 0.0.40
codegen_flags: <defaults>
</compile_context>

<pallas_src>
import functools

import numpy as np
import jax
import jax.numpy as jnp
from jax.experimental import pallas as pl
from jax.experimental.pallas import tpu as pltpu


# ----------------------------------------------------------------------------
# Parameter setup (plain numpy glue): dense operator of nn.ConvTranspose2d.
# out[:, :, s*ih+kh-p, s*iw+kw-p] += x[:, cin, ih, iw] * w[cin, cout, kh, kw]
# ----------------------------------------------------------------------------
def _convT_dense(w, h_in, w_in, stride, pad):
    """w: (Cin, Cout, KH, KW) -> (Cin*Hin*Win, Cout*Hout*Wout) dense matrix."""
    cin, cout, kh_n, kw_n = w.shape
    h_out = (h_in - 1) * stride - 2 * pad + kh_n
    w_out = (w_in - 1) * stride - 2 * pad + kw_n
    m = np.zeros((cin, h_in, w_in, cout, h_out, w_out), np.float32)
    for kh in range(kh_n):
        for kw in range(kw_n):
            for ih in range(h_in):
                oh = stride * ih + kh - pad
                if not (0 <= oh < h_out):
                    continue
                for iw in range(w_in):
                    ow = stride * iw + kw - pad
                    if not (0 <= ow < w_out):
                        continue
                    m[:, ih, iw, :, oh, ow] += w[:, :, kh, kw]
    return m.reshape(cin * h_in * w_in, cout * h_out * w_out), (cout, h_out, w_out)


def _expand_bias(b, chw):
    b = np.asarray(b, np.float32)
    return np.broadcast_to(b[:, None, None], chw).reshape(1, -1).copy()


def _round_up(x, m):
    return ((x + m - 1) // m) * m


def _hw_row_tile():
    """128 saturates v5e's 4x128x128 MXU; 512 for v6e/v7x (d2 chunking keeps
    the larger activation tiles inside v7x's 64 MiB/TC VMEM)."""
    try:
        kind = jax.devices()[0].device_kind.lower()
    except Exception:
        kind = ""
    return 128 if any(t in kind for t in ("v2", "v3", "v4", "v5")) else 512


# ----------------------------------------------------------------------------
# Kernel 1 — resident-weight path (many row tiles).
# Whole weight set lives in VMEM once; d2 stage chunked so the TNxd2 f32
# intermediate never materializes in full.
# ----------------------------------------------------------------------------
def _resident_kernel(x_ref, w1_ref, b1_ref, w2_ref, b2_ref, w3_ref, b3_ref,
                     o_ref, *, n_chunks, chunk):
    # Stage 1: (TN, G) @ (G, d1) + bias, ReLU.
    h1 = jnp.dot(x_ref[...], w1_ref[...], preferred_element_type=jnp.float32)
    h1 = jnp.maximum(h1 + b1_ref[...], 0.0).astype(jnp.bfloat16)

    # Stages 2 + 3 chunked over the d2 axis (static unroll, small chunk count).
    # Bias is sliced per chunk (no full-width in-loop broadcast).
    acc = jnp.zeros(o_ref.shape, jnp.float32)
    for c in range(n_chunks):
        lo = c * chunk
        h2 = jnp.dot(h1, w2_ref[:, lo:lo + chunk],
                     preferred_element_type=jnp.float32)
        h2 = jnp.maximum(h2 + b2_ref[:, lo:lo + chunk], 0.0).astype(jnp.bfloat16)
        acc = acc + jnp.dot(h2, w3_ref[lo:lo + chunk, :],
                            preferred_element_type=jnp.float32)
    o_ref[...] = acc + b3_ref[...]


# ----------------------------------------------------------------------------
# Kernel 2 — streaming path (1-2 row tiles): grid = (row_tiles, d2_chunks).
# w2/w3 chunks are auto-pipelined over the reduction axis so weight DMA
# overlaps compute; h1 and the output accumulator live in persistent scratch.
# ----------------------------------------------------------------------------
def _streaming_kernel(x_ref, w1_ref, b1_ref, w2_ref, b2_ref, w3_ref, b3_ref,
                      o_ref, h1_scr, acc_scr):
    c = pl.program_id(1)

    @pl.when(c == 0)
    def _():
        h1 = jnp.dot(x_ref[...], w1_ref[...], preferred_element_type=jnp.float32)
        h1_scr[...] = jnp.maximum(h1 + b1_ref[...], 0.0).astype(jnp.bfloat16)
        acc_scr[...] = jnp.zeros_like(acc_scr)

    h2 = jnp.dot(h1_scr[...], w2_ref[...], preferred_element_type=jnp.float32)
    h2 = jnp.maximum(h2 + b2_ref[...], 0.0).astype(jnp.bfloat16)
    acc_scr[...] += jnp.dot(h2, w3_ref[...], preferred_element_type=jnp.float32)

    @pl.when(c == pl.num_programs(1) - 1)
    def _():
        o_ref[...] = acc_scr[...] + b3_ref[...]


class ConvBinHeadPallas:
    """JAX/Pallas equivalent of ConvBinHead(in_n, out_n, G) with G.wh_ratio given."""

    def __init__(self, in_n, wh_ratio, key):
        self.in_n = in_n
        self.row_tile = _hw_row_tile()
        first_kernel = int(wh_ratio * 4)

        # Deterministic synthetic parameters (PyTorch ConvTranspose2d weight
        # layout is (in_channels, out_channels, kH, kW)).
        k = jax.random.split(key, 6)
        w1 = np.asarray(jax.random.normal(k[0], (in_n, 64, 4, first_kernel),
                                          jnp.float32)) / np.sqrt(in_n * 4 * first_kernel)
        b1 = np.asarray(jax.random.normal(k[1], (64,), jnp.float32)) * 0.01
        w2 = np.asarray(jax.random.normal(k[2], (64, 64, 4, 4), jnp.float32)) / np.sqrt(64 * 16)
        b2 = np.asarray(jax.random.normal(k[3], (64,), jnp.float32)) * 0.01
        w3 = np.asarray(jax.random.normal(k[4], (64, 1, 4, 4), jnp.float32)) / np.sqrt(64 * 16)
        b3 = np.asarray(jax.random.normal(k[5], (1,), jnp.float32)) * 0.01
        self.raw_weights = (w1, b1, w2, b2, w3, b3)

        # Lower each ConvTranspose2d to its dense operator (spatial sizes are
        # 1x1 -> 4xfk -> 8x2fk -> 16x4fk, tiny, so dense GEMM is exact & fast).
        m1, s1 = _convT_dense(w1, 1, 1, stride=2, pad=0)            # -> (64, 4, fk)
        m2, s2 = _convT_dense(w2, s1[1], s1[2], stride=2, pad=1)    # -> (64, 8, 2fk)
        m3, s3 = _convT_dense(w3, s2[1], s2[2], stride=2, pad=1)    # -> (1, 16, 4fk)
        d3 = s3[0] * s3[1] * s3[2]
        self.out_dim = d3

        # Pad final output columns to a lane-dense multiple of 128 (only needed
        # for odd first_kernel); the wrapper slices the padding off.
        d3_pad = _round_up(d3, 128)
        b3e = _expand_bias(b3, s3)
        if d3_pad != d3:
            m3 = np.pad(m3, ((0, 0), (0, d3_pad - d3)))
            b3e = np.pad(b3e, ((0, 0), (0, d3_pad - d3)))
        assert m1.shape[1] % 128 == 0 and m2.shape[1] % 128 == 0, (m1.shape, m2.shape)

        # bf16 weights (MXU-native, half the VMEM), f32 biases (VPU epilogue).
        # TODO(synk): activations are rounded to bf16 between stages (f32
        # accumulation); tighten to f32 weights if downstream needs exact logits.
        self.params = (
            jnp.asarray(m1, jnp.bfloat16), jnp.asarray(_expand_bias(b1, s1)),
            jnp.asarray(m2, jnp.bfloat16), jnp.asarray(_expand_bias(b2, s2)),
            jnp.asarray(m3, jnp.bfloat16), jnp.asarray(b3e),
        )

        # d2-chunking: largest 128-multiple divisor of d2 up to 1024.
        d2 = self.params[2].shape[1]
        self.chunk = next((c for c in (1024, 512, 256, 128) if d2 % c == 0), d2)
        self.n_chunks = d2 // self.chunk

        # jit caches per input shape -> no per-call retracing / spec rebuilding.
        self._forward = jax.jit(self._forward_impl)

    # ----------------------------------------------------------------- paths
    def _pallas_resident(self, x2, n_pad, TN, params):
        w1, b1, w2, b2, w3, b3 = params
        G, d1, d2, d3p = self.in_n, w1.shape[1], w2.shape[1], w3.shape[1]
        vmem_full = pl.BlockSpec(memory_space=pltpu.VMEM)  # whole-array resident
        kernel = functools.partial(_resident_kernel,
                                   n_chunks=self.n_chunks, chunk=self.chunk)
        flops = 2 * n_pad * (G * d1 + d1 * d2 + d2 * d3p)
        bytes_accessed = (2 * (w1.size + w2.size + w3.size)
                          + 4 * (b1.size + b2.size + b3.size)
                          + 2 * n_pad * G + 4 * n_pad * d3p)
        return pl.pallas_call(
            kernel,
            out_shape=jax.ShapeDtypeStruct((n_pad, d3p), jnp.float32),
            grid=(n_pad // TN,),
            in_specs=[pl.BlockSpec((TN, G), lambda i: (i, 0)),
                      vmem_full, vmem_full, vmem_full,
                      vmem_full, vmem_full, vmem_full],
            out_specs=pl.BlockSpec((TN, d3p), lambda i: (i, 0)),
            compiler_params=pltpu.CompilerParams(
                dimension_semantics=("parallel",),
                vmem_limit_bytes=48 * 1024 * 1024),
            cost_estimate=pl.CostEstimate(
                flops=flops, transcendentals=0, bytes_accessed=bytes_accessed),
        )(x2, w1, b1, w2, b2, w3, b3)

    def _pallas_streaming(self, x2, n_pad, TN, params):
        w1, b1, w2, b2, w3, b3 = params
        G, d1, d2, d3p = self.in_n, w1.shape[1], w2.shape[1], w3.shape[1]
        CK, NC = self.chunk, self.n_chunks
        n_tiles = n_pad // TN
        flops = 2 * n_pad * (G * d1 + d1 * d2 + d2 * d3p)
        bytes_accessed = (n_tiles * 2 * (w1.size + w2.size + w3.size)
                          + 4 * (b1.size + b2.size + b3.size)
                          + 2 * n_pad * G + 4 * n_pad * d3p)
        return pl.pallas_call(
            _streaming_kernel,
            out_shape=jax.ShapeDtypeStruct((n_pad, d3p), jnp.float32),
            grid=(n_tiles, NC),
            in_specs=[
                pl.BlockSpec((TN, G), lambda i, c: (i, 0)),
                pl.BlockSpec((G, d1), lambda i, c: (0, 0)),
                pl.BlockSpec((1, d1), lambda i, c: (0, 0)),
                pl.BlockSpec((d1, CK), lambda i, c: (0, c)),
                pl.BlockSpec((1, CK), lambda i, c: (0, c)),
                pl.BlockSpec((CK, d3p), lambda i, c: (c, 0)),
                pl.BlockSpec((1, d3p), lambda i, c: (0, 0)),
            ],
            out_specs=pl.BlockSpec((TN, d3p), lambda i, c: (i, 0)),
            scratch_shapes=[pltpu.VMEM((TN, d1), jnp.bfloat16),
                            pltpu.VMEM((TN, d3p), jnp.float32)],
            compiler_params=pltpu.CompilerParams(
                dimension_semantics=("parallel", "arbitrary"),
                vmem_limit_bytes=48 * 1024 * 1024),
            cost_estimate=pl.CostEstimate(
                flops=flops, transcendentals=0, bytes_accessed=bytes_accessed),
        )(x2, w1, b1, w2, b2, w3, b3)

    # --------------------------------------------------------------- forward
    def _forward_impl(self, x, *params):
        BS, LEN, G = x.shape
        assert G == self.in_n
        N = BS * LEN
        x2 = x.reshape(N, G).astype(jnp.bfloat16)

        tn_hw = self.row_tile
        if pl.cdiv(N, tn_hw) <= 2:
            # Small-N: weight-DMA-bound -> stream w2/w3 over the chunk axis.
            TN = min(tn_hw, _round_up(N, 8))
            n_pad = _round_up(N, TN)
            if n_pad != N:
                x2 = jnp.pad(x2, ((0, n_pad - N), (0, 0)))
            out = self._pallas_streaming(x2, n_pad, TN, params)
        else:
            # Large-N: keep the single resident weight copy, iterate row tiles.
            TN = tn_hw
            n_pad = _round_up(N, TN)
            if n_pad != N:
                x2 = jnp.pad(x2, ((0, n_pad - N), (0, 0)))
            out = self._pallas_resident(x2, n_pad, TN, params)

        return out[:N, :self.out_dim].reshape(BS, LEN, self.out_dim)

    def __call__(self, x):
        """x: (BS, LEN, in_n) -> Bernoulli logits (BS, LEN, out_dim)."""
        # TODO(synk): torch.distributions.Bernoulli has no Pallas equivalent;
        # the distribution is returned via its logits (probs = sigmoid(logits)).
        return self._forward(x, *self.params)


# ----------------------------------------------------------------------------
# Pure-numpy reference of PyTorch ConvTranspose2d for validation.
# ----------------------------------------------------------------------------
def _convT_ref(x, w, b, stride, pad):
    n, cin, h_in, w_in = x.shape
    _, cout, kh_n, kw_n = w.shape
    h_out = (h_in - 1) * stride - 2 * pad + kh_n
    w_out = (w_in - 1) * stride - 2 * pad + kw_n
    out = np.zeros((n, cout, h_out, w_out), np.float32)
    for kh in range(kh_n):
        for kw in range(kw_n):
            c = np.einsum("nchw,cd->ndhw", x, w[:, :, kh, kw])
            for ih in range(h_in):
                oh = stride * ih + kh - pad
                if not (0 <= oh < h_out):
                    continue
                for iw in range(w_in):
                    ow = stride * iw + kw - pad
                    if not (0 <= ow < w_out):
                        continue
                    out[:, :, oh, ow] += c[:, :, ih, iw]
    return out + b[None, :, None, None]


if __name__ == "__main__":
    IN_N = 32
    WH_RATIO = 1.0  # G.wh_ratio -> first_kernel = 4, final map is 1 x 16 x 16

    key = jax.random.PRNGKey(0)
    k_param, k_x1, k_x2 = jax.random.split(key, 3)

    head = ConvBinHeadPallas(IN_N, WH_RATIO, k_param)

    def check(x):
        logits = jax.block_until_ready(head(x))
        probs = jax.nn.sigmoid(logits)  # Bernoulli(logits=...) parameterization
        del probs
        w1, b1, w2, b2, w3, b3 = head.raw_weights
        BS, LEN, _ = x.shape
        xn = np.asarray(x, np.float32).reshape(BS * LEN, IN_N, 1, 1)
        h = np.maximum(_convT_ref(xn, w1, b1, stride=2, pad=0), 0.0)
        h = np.maximum(_convT_ref(h, w2, b2, stride=2, pad=1), 0.0)
        h = _convT_ref(h, w3, b3, stride=2, pad=1)
        ref = h.reshape(BS, LEN, -1)
        got = np.asarray(logits, np.float32)
        assert logits.shape == (BS, LEN, head.out_dim), logits.shape
        assert np.all(np.isfinite(got))
        # Tolerance accounts for bf16 MXU operands / f32 accumulation.
        assert np.allclose(got, ref, rtol=2e-2, atol=2e-2), \
            float(np.max(np.abs(got - ref)))

    # Small-N case (the shape this head is actually called with): exercises the
    # weight-streaming path (grid over d2 chunks, DMA/compute overlap).
    check(jax.random.normal(k_x1, (2, 8, IN_N), jnp.float32))
    # Larger-N case: exercises the resident-weight, d2-chunked path.
    check(jax.random.normal(k_x2, (2, 600, IN_N), jnp.float32))

    print("KERNEL_OK")
</pallas_src>

<mosaic_0001>
module attributes {stable_mosaic.version = 11 : i64} {
  func.func @_streaming_kernel(%arg0: i32, %arg1: i32, %arg2: memref<16x32xbf16, #tpu.memory_space<vmem>>, %arg3: memref<32x1024xbf16, #tpu.memory_space<vmem>>, %arg4: memref<1x1024xf32, #tpu.memory_space<vmem>>, %arg5: memref<1024x1024xbf16, #tpu.memory_space<vmem>>, %arg6: memref<1x1024xf32, #tpu.memory_space<vmem>>, %arg7: memref<1024x256xbf16, #tpu.memory_space<vmem>>, %arg8: memref<1x256xf32, #tpu.memory_space<vmem>>, %arg9: memref<16x256xf32, #tpu.memory_space<vmem>>, %arg10: memref<16x1024xbf16, #tpu.memory_space<vmem>>, %arg11: memref<16x256xf32, #tpu.memory_space<vmem>>) attributes {dimension_semantics = [#tpu.dimension_semantics<parallel>, #tpu.dimension_semantics<arbitrary>], iteration_bounds = array<i64: 1, 4>, scalar_prefetch = 0 : i64, scratch_operands = 2 : i64, tpu.core_type = #tpu.core_type<tc>, window_params = [{transform_indices = @transform_0, window_bounds = array<i64: 16, 32>}, {pipeline_mode = #tpu.pipeline_mode<synchronous>, transform_indices = @transform_1, window_bounds = array<i64: 32, 1024>}, {pipeline_mode = #tpu.pipeline_mode<synchronous>, transform_indices = @transform_2, window_bounds = array<i64: 1, 1024>}, {transform_indices = @transform_3, window_bounds = array<i64: 1024, 1024>}, {transform_indices = @transform_4, window_bounds = array<i64: 1, 1024>}, {transform_indices = @transform_5, window_bounds = array<i64: 1024, 256>}, {pipeline_mode = #tpu.pipeline_mode<synchronous>, transform_indices = @transform_6, window_bounds = array<i64: 1, 256>}, {transform_indices = @transform_7, window_bounds = array<i64: 16, 256>}]} {
    %c0_i32 = arith.constant 0 : i32
    %0 = arith.cmpi eq, %arg1, %c0_i32 : i32
    %1 = arith.extui %0 : i1 to i32
    %c0_i32_0 = arith.constant 0 : i32
    %2 = arith.cmpi ne, %1, %c0_i32_0 : i32
    scf.if %2 {
      %c0_15 = arith.constant 0 : index
      %c0_16 = arith.constant 0 : index
      %20 = vector.load %arg2[%c0_15, %c0_16] : memref<16x32xbf16, #tpu.memory_space<vmem>>, vector<16x32xbf16>
      %c0_17 = arith.constant 0 : index
      %c0_18 = arith.constant 0 : index
      %21 = vector.load %arg3[%c0_17, %c0_18] : memref<32x1024xbf16, #tpu.memory_space<vmem>>, vector<32x1024xbf16>
      %cst_19 = arith.constant dense<0.000000e+00> : vector<16x1024xf32>
      %22 = tpu.matmul %20, %21, %cst_19 {dimension_numbers = #tpu.dot_dimension_numbers<[1], [0], [0], [1], [0, 0, 1, 1], [], []>} : vector<16x32xbf16>, vector<32x1024xbf16>, vector<16x1024xf32> -> vector<16x1024xf32>
      %c0_20 = arith.constant 0 : index
      %c0_21 = arith.constant 0 : index
      %23 = vector.load %arg4[%c0_20, %c0_21] : memref<1x1024xf32, #tpu.memory_space<vmem>>, vector<1x1024xf32>
      %24 = vector.broadcast %23 : vector<1x1024xf32> to vector<16x1024xf32>
      %25 = arith.addf %22, %24 : vector<16x1024xf32>
      %cst_22 = arith.constant 0.000000e+00 : f32
      %26 = vector.broadcast %cst_22 : f32 to vector<16x1024xf32>
      %27 = arith.maximumf %25, %26 : vector<16x1024xf32>
      %28 = arith.truncf %27 : vector<16x1024xf32> to vector<16x1024xbf16>
      %c0_23 = arith.constant 0 : index
      %c0_24 = arith.constant 0 : index
      %29 = vector.load %arg10[%c0_23, %c0_24] : memref<16x1024xbf16, #tpu.memory_space<vmem>>, vector<16x1024xbf16>
      tpu.vector_store %arg10[%c0_23, %c0_24], %28 {strides = array<i32>} : memref<16x1024xbf16, #tpu.memory_space<vmem>>, vector<16x1024xbf16>,
      %cst_25 = arith.constant 0.000000e+00 : f32
      %30 = vector.broadcast %cst_25 : f32 to vector<16x256xf32>
      %c0_26 = arith.constant 0 : index
      %c0_27 = arith.constant 0 : index
      %31 = vector.load %arg11[%c0_26, %c0_27] : memref<16x256xf32, #tpu.memory_space<vmem>>, vector<16x256xf32>
      tpu.vector_store %arg11[%c0_26, %c0_27], %30 {strides = array<i32>} : memref<16x256xf32, #tpu.memory_space<vmem>>, vector<16x256xf32>,
    } else {
    }
    %c0 = arith.constant 0 : index
    %c0_1 = arith.constant 0 : index
    %3 = vector.load %arg10[%c0, %c0_1] : memref<16x1024xbf16, #tpu.memory_space<vmem>>, vector<16x1024xbf16>
    %c0_2 = arith.constant 0 : index
    %c0_3 = arith.constant 0 : index
    %4 = vector.load %arg5[%c0_2, %c0_3] : memref<1024x1024xbf16, #tpu.memory_space<vmem>>, vector<1024x1024xbf16>
    %cst = arith.constant dense<0.000000e+00> : vector<16x1024xf32>
    %5 = tpu.matmul %3, %4, %cst {dimension_numbers = #tpu.dot_dimension_numbers<[1], [0], [0], [1], [0, 0, 1, 1], [], []>} : vector<16x1024xbf16>, vector<1024x1024xbf16>, vector<16x1024xf32> -> vector<16x1024xf32>
    %c0_4 = arith.constant 0 : index
    %c0_5 = arith.constant 0 : index
    %6 = vector.load %arg6[%c0_4, %c0_5] : memref<1x1024xf32, #tpu.memory_space<vmem>>, vector<1x1024xf32>
    %7 = vector.broadcast %6 : vector<1x1024xf32> to vector<16x1024xf32>
    %8 = arith.addf %5, %7 : vector<16x1024xf32>
    %cst_6 = arith.constant 0.000000e+00 : f32
    %9 = vector.broadcast %cst_6 : f32 to vector<16x1024xf32>
    %10 = arith.maximumf %8, %9 : vector<16x1024xf32>
    %11 = arith.truncf %10 : vector<16x1024xf32> to vector<16x1024xbf16>
    %c0_7 = arith.constant 0 : index
    %c0_8 = arith.constant 0 : index
    %12 = vector.load %arg11[%c0_7, %c0_8] : memref<16x256xf32, #tpu.memory_space<vmem>>, vector<16x256xf32>
    %c0_9 = arith.constant 0 : index
    %c0_10 = arith.constant 0 : index
    %13 = vector.load %arg7[%c0_9, %c0_10] : memref<1024x256xbf16, #tpu.memory_space<vmem>>, vector<1024x256xbf16>
    %cst_11 = arith.constant dense<0.000000e+00> : vector<16x256xf32>
    %14 = tpu.matmul %11, %13, %cst_11 {dimension_numbers = #tpu.dot_dimension_numbers<[1], [0], [0], [1], [0, 0, 1, 1], [], []>} : vector<16x1024xbf16>, vector<1024x256xbf16>, vector<16x256xf32> -> vector<16x256xf32>
    %15 = arith.addf %12, %14 : vector<16x256xf32>
    %c0_12 = arith.constant 0 : index
    %c0_13 = arith.constant 0 : index
    %16 = vector.load %arg11[%c0_12, %c0_13] : memref<16x256xf32, #tpu.memory_space<vmem>>, vector<16x256xf32>
    tpu.vector_store %arg11[%c0_12, %c0_13], %15 {strides = array<i32>} : memref<16x256xf32, #tpu.memory_space<vmem>>, vector<16x256xf32>,
    %c3_i32 = arith.constant 3 : i32
    %17 = arith.cmpi eq, %arg1, %c3_i32 : i32
    %18 = arith.extui %17 : i1 to i32
    %c0_i32_14 = arith.constant 0 : i32
    %19 = arith.cmpi ne, %18, %c0_i32_14 : i32
    scf.if %19 {
      %c0_15 = arith.constant 0 : index
      %c0_16 = arith.constant 0 : index
      %20 = vector.load %arg11[%c0_15, %c0_16] : memref<16x256xf32, #tpu.memory_space<vmem>>, vector<16x256xf32>
      %c0_17 = arith.constant 0 : index
      %c0_18 = arith.constant 0 : index
      %21 = vector.load %arg8[%c0_17, %c0_18] : memref<1x256xf32, #tpu.memory_space<vmem>>, vector<1x256xf32>
      %22 = vector.broadcast %21 : vector<1x256xf32> to vector<16x256xf32>
      %23 = arith.addf %20, %22 : vector<16x256xf32>
      %c0_19 = arith.constant 0 : index
      %c0_20 = arith.constant 0 : index
      %24 = vector.load %arg9[%c0_19, %c0_20] : memref<16x256xf32, #tpu.memory_space<vmem>>, vector<16x256xf32>
      tpu.vector_store %arg9[%c0_19, %c0_20], %23 {strides = array<i32>} : memref<16x256xf32, #tpu.memory_space<vmem>>, vector<16x256xf32>,
    } else {
    }
    return
  }
  func.func @transform_0(%arg0: i32, %arg1: i32) -> (i32, i32) {
    %c0_i32 = arith.constant 0 : i32
    %c0_i32_0 = arith.constant 0 : i32
    return %arg0, %c0_i32 : i32, i32
  }
  func.func @transform_1(%arg0: i32, %arg1: i32) -> (i32, i32) {
    %c0_i32 = arith.constant 0 : i32
    %c0_i32_0 = arith.constant 0 : i32
    %c0_i32_1 = arith.constant 0 : i32
    return %c0_i32, %c0_i32_0 : i32, i32
  }
  func.func @transform_2(%arg0: i32, %arg1: i32) -> (i32, i32) {
    %c0_i32 = arith.constant 0 : i32
    %c0_i32_0 = arith.constant 0 : i32
    %c0_i32_1 = arith.constant 0 : i32
    return %c0_i32, %c0_i32_0 : i32, i32
  }
  func.func @transform_3(%arg0: i32, %arg1: i32) -> (i32, i32) {
    %c0_i32 = arith.constant 0 : i32
    %c0_i32_0 = arith.constant 0 : i32
    return %c0_i32, %arg1 : i32, i32
  }
  func.func @transform_4(%arg0: i32, %arg1: i32) -> (i32, i32) {
    %c0_i32 = arith.constant 0 : i32
    %c0_i32_0 = arith.constant 0 : i32
    return %c0_i32, %arg1 : i32, i32
  }
  func.func @transform_5(%arg0: i32, %arg1: i32) -> (i32, i32) {
    %c0_i32 = arith.constant 0 : i32
    %c0_i32_0 = arith.constant 0 : i32
    return %arg1, %c0_i32 : i32, i32
  }
  func.func @transform_6(%arg0: i32, %arg1: i32) -> (i32, i32) {
    %c0_i32 = arith.constant 0 : i32
    %c0_i32_0 = arith.constant 0 : i32
    %c0_i32_1 = arith.constant 0 : i32
    return %c0_i32, %c0_i32_0 : i32, i32
  }
  func.func @transform_7(%arg0: i32, %arg1: i32) -> (i32, i32) {
    %c0_i32 = arith.constant 0 : i32
    %c0_i32_0 = arith.constant 0 : i32
    return %arg0, %c0_i32 : i32, i32
  }
}

</mosaic_0001>

<bundles_post_ra>
// kernel: _forward_impl.1
= control target key start
LH: loop header
LB: loop body
LE: loop exit
PB: predicated region body
PF: predicated region fallthrough
CT: control target
= control target key end

     0   :  { %s8225_s0 = inlined_call_operand.vmem [shape: bf16[16,32], index: 0, kind: input, shape index: {}]   ;;  %s8226_s1 = inlined_call_operand.hbm [shape: bf16[32,1024], index: 1, kind: input, shape index: {}]   ;;  %s8227_s2 = inlined_call_operand.hbm [shape: f32[1,1024], index: 2, kind: input, shape index: {}]   ;;  %s8228_s3 = inlined_call_operand.hbm [shape: bf16[1024,4096], index: 3, kind: input, shape index: {}]   ;;  %s8229_s4 = inlined_call_operand.hbm [shape: f32[1,4096], index: 4, kind: input, shape index: {}]   ;;  %s8230_s5 = inlined_call_operand.hbm [shape: bf16[4096,256], index: 5, kind: input, shape index: {}]   ;;  %s8231_s6 = inlined_call_operand.hbm [shape: f32[1,256], index: 6, kind: input, shape index: {}]   ;;  %s8232_s7 = inlined_call_operand.hbm [shape: f32[16,256], index: 7, kind: output, shape index: {}]  }
   0x1   :  { %8238 = sst [smem:[#allocation21_spill]] %s8226_s1 }
   0x2   :  { %8239 = sst [smem:[#allocation22_spill]] %s8228_s3 }
   0x3   :  { %8240 = sst [smem:[#allocation23_spill]] %s8232_s7 }
   0x4   :  { %12 = vsyncpa [#allocation5], 0 }
   0x5   :  { %13 = vsyncpa [#allocation8], 0 }
   0x6   :  { %14 = vsyncpa [#allocation6], 0  ;;  %s7204_s24 = smov 0   ;;  %s7206_s25 = smov 0  }
   0x7   :  { %s7208_s26 = smov 0   ;;  %s7210_s27 = smov 0  }
   0x8   :  { %s7212_s28 = smov 0   ;;  %s7214_s29 = smov 0  }
   0x9 LB: > { %s7233_s30 = sadd.s32 4294967295, %s7146_s29   ;;  %p114_p0 = scmp.ne.s32.totalorder %s7134_s26, %s7130_s25  ;;  %s7146_s29 = sphi %s7214_s29, %s20_s29   ;;  %s7142_s28 = sphi %s7212_s28, %s8266_s28   ;;  %s7138_s27 = sphi %s7210_s27, %s8265_s27   ;;  %s7134_s26 = sphi %s7208_s26, %s8264_s26   ;;  %s7130_s25 = sphi %s7206_s25, %s8263_s25   ;;  %s7126_s24 = sphi %s7204_s24, %s8262_s24  }
   0xa   : > { %p115_p1 = scmp.eq.s32.totalorder %s7146_s29, 0  ;;  %p120_p2 = scmp.ne.s32.totalorder %s7130_s25, %s7126_s24 }
   0xb   : > { %p8233_p3 = scmp.eq.s32.totalorder %s7233_s30, 0  ;;  %p5852_p5 = scmp.ge.s32.totalorder %s7146_s29, 1 }
   0xc   : > { %p116_p4 = por %p115_p1, %p114_p0  ;;  %p230_p7 = scmp.lt.s32.totalorder %s7146_s29, 5 }
   0xd   : > { %p7244_p6 = por %p8233_p3, %p120_p2  ;;  %s7148_s11 = smov [#allocation4]  }
   0xe   : > { %p7249_p8 = pnand %p5852_p5, %p230_p7  ;;  %s251_s12 = sshll.u32 %s7148_s11, 4  ;;  %s252_s12 = int_to_ptr.vmem [resolvable:$true] %s251_s12 }
   0xf   : > { %p6615_p10 = scmp.lt.s32.totalorder %s7146_s29, 4  ;;  %s29_s15 = sadd.s32 1, %s7142_s28 }
  0x10   : > { %p6592_p9 = pneg %p7249_p8  ;;  %s6905_s16 = scalar_lea.vmem %s252_s12, 2048 }
  0x11   : > { %p7262_p12 = pnand %p6615_p10, %p116_p4  ;;  %p6906_p0 = scmp.ne.s32.totalorder %s252_s12, %s6905_s16 }
  0x12   : > { %p7258_p11 = pnand %p6592_p9, %p8233_p3  ;;  %p6913_p5 = scmp.lt.s32.totalorder %s252_s12, %s252_s12 }
  0x13   : > { %p6914_p7 = scmp.lt.s32.totalorder %s6905_s16, %s6905_s16 }
  0x14   : > { %p6896_p13 = pneg %p7258_p11 }
  0x15   : > { %p6915_p9 = por %p6914_p7, %p6913_p5 }
  0x16   : > { %p6908_p1 = pnand %p6906_p0, %p6896_p13 }
  0x18   : > { %p6909_p2 = pneg %p6908_p1 }
  0x1a   : > { %p6916_p3 = pnand %p6915_p9, %p6909_p2 }
  0x1c   : > { %6919 = shalt.err (!%p6916_p3)
}
  0x1d   : > { %s8234_s17 = smov 512   ;;  %s8235_s18 = smov 32  }
  0x1e   : > { %s8245_s1 = sld [smem:[#allocation21_spill]]  ;;  %p30_p4 = scmp.ge.s32.totalorder %s29_s15, 4 }
  0x1f   : > { %s287_s21 = sand.u32 1, %s7146_s29   ;;  %s7282_s22 = sand.u32 1, %s7134_s26  }
  0x20   : > { %s8268_s15 = smov (%p30_p4, %s29_s15), 0  ;;  %s5858_s23 = sshll.u32 %s7282_s22, 12 }
  0x21   : > { %8246 = sst [smem:[#allocation19_spill]] %s8268_s15  ;;  %s104_s24 = ssub.s32 %s7142_s28, %s8268_s15 }
  0x22   : > { %p105_p3 = scmp.eq.s32.totalorder %s104_s24, 0  ;;  %s6558_s11 = sshll.u32 %s7142_s28, 9 }
  0x23   : > { %s8247_s3 = sld [smem:[#allocation22_spill]]  ;;  %s291_s19 = scalar_lea.vmem [#allocation9], %s5858_s23 }
  0x24   : > { %6595 = dma.hbm_to_vmem [thread:$0]  (!%p7258_p11), %s8245_s1, 2048, %s252_s12, [#allocation5], %s8234_s17, %s8234_s17, %s8235_s18  }
  0x25   : > { %s298_s20 = sshll.u32 %s291_s19, 4  ;;  %s8248_s12 = sadd.s32 1, %s7134_s26  ;;  %s299_s20 = int_to_ptr.vmem [resolvable:$true] %s298_s20 }
  0x26   : > { %s7296_s17 = scalar_select %p105_p3, %s7134_s26, %s8248_s12  }
  0x27   : > { %s7298_s18 = scalar_lea.sflag [#allocation5], %s287_s21  ;;  %p8237_p10 = pneg %p7262_p12 }
  0x28   : > { %8249 = sst [smem:[#allocation20_spill]] %s7296_s17  ;;  %s6933_s1 = scalar_lea.vmem %s299_s20, 65536 }
  0x29   : > { %s297_s7 = scalar_lea.hbm %s8247_s3, %s6558_s11  ;;  %p6934_p0 = scmp.ne.s32.totalorder %s299_s20, %s6933_s1 }
  0x2a   : > { %s7151_s24 = smov [#allocation9]  }
  0x2b   : > { %p6936_p1 = pnand %p6934_p0, %p8237_p10  ;;  %s6938_s15 = sshll.u32 %s7151_s24, 4  ;;  %s6939_s15 = int_to_ptr.vmem [resolvable:$false] %s6938_s15 }
  0x2c   : > { %s6940_s8 = scalar_lea.vmem %s6939_s15, 131072  ;;  %p6941_p5 = scmp.lt.s32.totalorder %s299_s20, %s6939_s15 }
  0x2d   : > { %p6937_p2 = pneg %p6936_p1  ;;  %p6942_p7 = scmp.lt.s32.totalorder %s6940_s8, %s6933_s1 }
  0x2f   : > { %p6943_p9 = por %p6942_p7, %p6941_p5 }
  0x31   : > { %p6944_p4 = pnand %p6943_p9, %p6937_p2 }
  0x33   : > { %6947 = shalt.err (!%p6944_p4)
}
  0x34   : > { %s7152_s23 = smov 2048   ;;  %s8250_s21 = smov 32  }
  0x35   : > { %s8251_s11 = smov 512   ;;  %s5861_s16 = sshll.u32 %s7282_s22, 3 }
  0x36   : > { %6605 = dma.hbm_to_vmem [thread:$0]  (!%p7262_p12), %s297_s7, 65536, %s299_s20, %s7298_s18, %s7152_s23, %s8251_s11, %s8250_s21  }
  0x37   : > { %s7153_s19 = smov [#allocation7]   ;;  %s6559_s24 = sshll.u32 %s7142_s28, 7 }
  0x38   : > { %s265_s12 = sshll.u32 %s7153_s19, 4  ;;  %s266_s12 = int_to_ptr.vmem [resolvable:$true] %s265_s12 }
  0x39   : > { %s6959_s15 = scalar_lea.vmem %s266_s12, 128  ;;  %p6967_p2 = scmp.lt.s32.totalorder %s266_s12, %s266_s12 }
  0x3a   : > { %p6960_p3 = scmp.ne.s32.totalorder %s266_s12, %s6959_s15  ;;  %p6968_p5 = scmp.lt.s32.totalorder %s6959_s15, %s6959_s15 }
  0x3c   : > { %p6962_p0 = pnand %p6960_p3, %p6896_p13  ;;  %p6969_p7 = por %p6968_p5, %p6967_p2 }
  0x3e   : > { %p6963_p1 = pneg %p6962_p0 }
  0x40   : > { %p6970_p9 = pnand %p6969_p7, %p6963_p1 }
  0x42   : > { %6973 = shalt.err (!%p6970_p9)
}
  0x43   : > { %6598 = dma.hbm_to_vmem [thread:$0]  (!%p7258_p11), %s8227_s2, 128, %s266_s12, [#allocation8]  }
  0x44   : > { %s318_s23 = scalar_lea.hbm %s8229_s4, %s6559_s24  ;;  %s312_s21 = scalar_lea.vmem [#allocation10], %s5861_s16 }
  0x45   : > { %s320_s11 = sshll.u32 %s312_s21, 4  ;;  %s7154_s15 = smov [#allocation10]   ;;  %s321_s11 = int_to_ptr.vmem [resolvable:$true] %s320_s11 }
  0x46   : > { %s6987_s19 = scalar_lea.vmem %s321_s11, 128  ;;  %s6992_s3 = sshll.u32 %s7154_s15, 4  ;;  %s6993_s3 = int_to_ptr.vmem [resolvable:$false] %s6992_s3 }
  0x47   : > { %p6988_p4 = scmp.ne.s32.totalorder %s321_s11, %s6987_s19  ;;  %s6994_s17 = scalar_lea.vmem %s6993_s3, 256 }
  0x48   : > { %p6995_p1 = scmp.lt.s32.totalorder %s321_s11, %s6993_s3  ;;  %p6996_p2 = scmp.lt.s32.totalorder %s6994_s17, %s6987_s19 }
  0x49   : > { %p6990_p3 = pnand %p6988_p4, %p8237_p10 }
  0x4a   : > { %p6997_p5 = por %p6996_p2, %p6995_p1 }
  0x4b   : > { %p6991_p0 = pneg %p6990_p3 }
  0x4d   : > { %p6998_p7 = pnand %p6997_p5, %p6991_p0 }
  0x4f   : > { %7001 = shalt.err (!%p6998_p7)
}
  0x50   : > { %6608 = dma.hbm_to_vmem [thread:$0]  (!%p7262_p12), %s318_s23, 128, %s321_s11, %s7298_s18  }
  0x51   : > { %s7155_s16 = smov [#allocation12]   ;;  %s5864_s24 = sshll.u32 %s7282_s22, 10 }
  0x52   : > { %s276_s12 = sshll.u32 %s7155_s16, 4  ;;  %s277_s12 = int_to_ptr.vmem [resolvable:$true] %s276_s12 }
  0x53   : > { %s7013_s1 = scalar_lea.vmem %s277_s12, 32  ;;  %p7021_p10 = scmp.lt.s32.totalorder %s277_s12, %s277_s12 }
  0x54   : > { %p7014_p9 = scmp.ne.s32.totalorder %s277_s12, %s7013_s1  ;;  %p7022_p1 = scmp.lt.s32.totalorder %s7013_s1, %s7013_s1 }
  0x56   : > { %p7016_p4 = pnand %p7014_p9, %p6896_p13  ;;  %p7023_p0 = por %p7022_p1, %p7021_p10 }
  0x58   : > { %p7017_p3 = pneg %p7016_p4 }
  0x5a   : > { %p7024_p2 = pnand %p7023_p0, %p7017_p3 }
  0x5c   : > { %7027 = shalt.err (!%p7024_p2)
}
  0x5d   : > { %6601 = dma.hbm_to_vmem [thread:$0]  (!%p7258_p11), %s8231_s6, 32, %s277_s12, [#allocation8]  }
  0x5e   : > { %s6561_s22 = sshll.u32 %s7142_s28, 14  ;;  %s331_s7 = scalar_lea.vmem [#allocation11], %s5864_s24 }
  0x5f   : > { %s339_s20 = sshll.u32 %s331_s7, 4  ;;  %s338_s21 = scalar_lea.hbm %s8230_s5, %s6561_s22  ;;  %s340_s20 = int_to_ptr.vmem [resolvable:$true] %s339_s20 }
  0x60   : > { %s7041_s11 = scalar_lea.vmem %s340_s20, 16384  ;;  %p8252_p10 = pneg %p7262_p12 }
  0x61   : > { %p7042_p13 = scmp.ne.s32.totalorder %s340_s20, %s7041_s11  ;;  %s7156_s13 = smov [#allocation11]  }
  0x62   : > { %s7046_s19 = sshll.u32 %s7156_s13, 4  ;;  %s7047_s19 = int_to_ptr.vmem [resolvable:$false] %s7046_s19 }
  0x63   : > { %p7044_p5 = pnand %p7042_p13, %p8252_p10  ;;  %s7048_s15 = scalar_lea.vmem %s7047_s19, 32768 }
  0x64   : > { %p7049_p9 = scmp.lt.s32.totalorder %s340_s20, %s7047_s19  ;;  %p7050_p11 = scmp.lt.s32.totalorder %s7048_s15, %s7041_s11 }
  0x65   : > { %p7045_p7 = pneg %p7044_p5 }
  0x66   : > { %p7051_p4 = por %p7050_p11, %p7049_p9 }
  0x68   : > { %p7052_p3 = pnand %p7051_p4, %p7045_p7 }
  0x6a   : > { %7055 = shalt.err (!%p7052_p3)
}
  0x6b   : > { %s7157_s16 = smov 128   ;;  %s7158_s12 = smov 8  }
  0x6c   : > { %6611 = dma.hbm_to_vmem [thread:$0]  (!%p7262_p12), %s338_s21, 16384, %s340_s20, %s7298_s18, %s7157_s16, %s7157_s16, %s7158_s12  }
  0x6d   : > { %351 = sbr.rel (%p7249_p8) target bundleno = 1325 (0x52d), region = 48  ;;  %p8253_p1 = scmp.eq.s32.totalorder (!%p7249_p8), %s7233_s30, 0 }
  0x72   : > { %7105 = dma.done.wait (%p8253_p1), [#allocation5], 2048   ;;  %p8254_p0 = pmov %p8253_p1 }
  0x74   : > { %7107 = vsyncadd (%p8254_p0), [#allocation5], 4294965248  ;;  %p8255_p2 = pmov %p8254_p0 }
  0x75   : > { %p8256_p13 = pmov %p8254_p0 }
  0x76   : > { %7109 = dma.done.wait (%p8255_p2), [#allocation8], 128  }
  0x77   : > { %7111 = vsyncadd (%p8256_p13), [#allocation8], 4294967168  ;;  %s361_s14 = sand.u32 1, %s7233_s30   ;;  %s363_s18 = sand.u32 1, %s7130_s25  }
  0x78   : > { %s5871_s24 = sshll.u32 %s363_s18, 12  ;;  %s362_s10 = scalar_lea.sflag [#allocation5], %s361_s14 }
  0x79   : > { %s7360_s1 = scalar_lea.vmem [#allocation9], %s5871_s24 }
  0x7a   : > { %7113 = dma.done.wait (%p7244_p6), %s362_s10, 82048  }
  0x7b   : > { %7115 = vsyncadd (%p7244_p6), %s362_s10, 4294885248  ;;  %s5872_s3 = sshll.u32 %s363_s18, 3  ;;  %s5873_s17 = sshll.u32 %s363_s18, 10 }
  0x7c   : > { %s7366_s22 = scalar_lea.vmem [#allocation10], %s5872_s3  ;;  %s7368_s7 = scalar_lea.vmem [#allocation11], %s5873_s17 }
  0x7d   : > { %p8257_p8 = pmov %p8254_p0 }
  0x7e   : > { %p8258_p12 = pmov %p8254_p0 }
  0x7f   : > { %7117 = dma.done.wait (%p8257_p8), [#allocation8], 32  }
  0x80   : > { %7119 = vsyncadd (%p8258_p12), [#allocation8], 4294967264  ;;  %p5875_p10 = scmp.ne.s32.totalorder %s7138_s27, 0 }
  0x82   : > { %442 = sbr.rel (%p5875_p10) target bundleno = 361 (0x169), region = 76 }
  0x87   : > { %v453_v0 = vld [vmem:[#allocation4 + $0x40] sm:$0xff]  ;;  %v454_v2 = vld [vmem:[#allocation4 + $0x48] sm:$0xff]  ;;  %v7159_v8 = vmov 0   ;;  %v455_v15 = vld [vmem:[#allocation4 + $0x50] sm:$0xff]  ;;  %vm588_vm0 = vcmask 261120   ;;  %v7160_v34 = vmov 0.0   ;;  %v463_v35 = vlaneseq }
  0x88   : > { %v457_v1 = vld [vmem:[#allocation4 + $0x60] sm:$0xff]  ;;  %v458_v4 = vld [vmem:[#allocation4 + $0x68] sm:$0xff]  ;;  %624 = vmatprep.mubr.bf16.mxu0 %v7159_v8  ;;  %667 = vmatprep.mubr.bf16.mxu1 %v7159_v8  ;;  %v459_v17 = vld [vmem:[#allocation4 + $0x70] sm:$0xff]  ;;  %836 = vst [vmem:[#allocation3] sm:$0xff] %v7160_v34 }
  0x89   : > { %v5886_v3 = vcombine.high %v453_v0, %v457_v1  ;;  %v5885_v5 = vcombine.low %v453_v0, %v457_v1  ;;  %v445_v6 = vld [vmem:[#allocation4] sm:$0xff]  ;;  %v5888_v9 = vcombine.high %v454_v2, %v458_v4  ;;  %v5887_v10 = vcombine.low %v454_v2, %v458_v4  ;;  %v446_v12 = vld [vmem:[#allocation4 + $0x8] sm:$0xff]  ;;  %v456_v18 = vld [vmem:[#allocation4 + $0x58] sm:$0xff]  ;;  %837 = vst [vmem:[#allocation3 + $0x18] sm:$0xff] %v7160_v34 }
  0x8a   : > { %v449_v7 = vld [vmem:[#allocation4 + $0x20] sm:$0xff]  ;;  %v450_v13 = vld [vmem:[#allocation4 + $0x28] sm:$0xff]  ;;  %v460_v19 = vld [vmem:[#allocation4 + $0x78] sm:$0xff]  ;;  %v5890_v21 = vcombine.high %v455_v15, %v459_v17  ;;  %v5889_v28 = vcombine.low %v455_v15, %v459_v17  ;;  %838 = vst [vmem:[#allocation3 + $0x10] sm:$0xff] %v7160_v34  ;;  %v464_v36 = vshrl.u32 %v463_v35, 7 }
  0x8b   : > { %v5878_v11 = vcombine.high %v445_v6, %v449_v7  ;;  %604 = vmatprep.subr.bf16.mxu0 %v5886_v3  ;;  %v5880_v14 = vcombine.high %v446_v12, %v450_v13  ;;  %647 = vmatprep.subr.bf16.mxu1 %v5888_v9  ;;  %v5877_v16 = vcombine.low %v445_v6, %v449_v7  ;;  %v447_v23 = vld [vmem:[#allocation4 + $0x10] sm:$0xff]  ;;  %v6682_v25 = vld [vmem:[%s8225_s0] sm:$0xff]   ;;  %v448_v26 = vld [vmem:[#allocation4 + $0x18] sm:$0xff] }
  0x8c   : > { %605 = vmatpush1.bf16.msra.mxu0 %v5885_v5  ;;  %648 = vmatpush1.bf16.msra.mxu1 %v5887_v10  ;;  %v5879_v20 = vcombine.low %v446_v12, %v450_v13  ;;  %v5892_v22 = vcombine.high %v456_v18, %v460_v19  ;;  %v451_v24 = vld [vmem:[#allocation4 + $0x30] sm:$0xff]  ;;  %v452_v27 = vld [vmem:[#allocation4 + $0x38] sm:$0xff]  ;;  %v5891_v29 = vcombine.low %v456_v18, %v460_v19  ;;  %v465_v37 = vsub.s32 0, %v464_v36  ;;  %v461_v38 = vld [vmem:[#allocation7] sm:$0xff] }
  0x8d   : > { %606 = vmatprep.subr.bf16.mxu0 %v5878_v11  ;;  %649 = vmatprep.subr.bf16.mxu1 %v5880_v14  ;;  %v5882_v30 = vcombine.high %v447_v23, %v451_v24  ;;  %v5884_v31 = vcombine.high %v448_v26, %v452_v27  ;;  %v5881_v32 = vcombine.low %v447_v23, %v451_v24  ;;  %v473_v39 = vsub.s32 2, %v464_v36 }
  0x8e   : > { %v5883_v33 = vcombine.low %v448_v26, %v452_v27  ;;  %839 = vst [vmem:[#allocation3 + $0x8] sm:$0xff] %v7160_v34  ;;  %v469_v40 = vsub.s32 1, %v464_v36  ;;  %v477_v41 = vsub.s32 3, %v464_v36  ;;  %v466_v42 = vrot.slane %v461_v38, %v465_v37 }
  0x8f   : > { %v474_v43 = vrot.slane %v461_v38, %v473_v39  ;;  %v481_v49 = vsub.s32 4, %v464_v36  ;;  %v489_v52 = vsub.s32 6, %v464_v36  ;;  %v485_v55 = vsub.s32 5, %v464_v36 }
  0x90   : > { %607 = vmatpush1.bf16.msra.mxu0 %v5877_v16  ;;  %650 = vmatpush1.bf16.msra.mxu1 %v5879_v20  ;;  %v470_v44 = vrot.slane %v461_v38, %v469_v40  ;;  %v478_v46 = vrot.slane %v461_v38, %v477_v41  ;;  %v493_v58 = vsub.s32 7, %v464_v36 }
  0x91   : > { %690 = vmatprep.subr.bf16.mxu0 %v5890_v21  ;;  %733 = vmatprep.subr.bf16.mxu1 %v5892_v22  ;;  %v482_v63 = vrot.slane %v461_v38, %v481_v49  ;;  %v490_v4 = vrot.slane %v461_v38, %v489_v52 }
  0x92   : > { %v494_v12 = vrot.slane %v461_v38, %v493_v58 }
  0x93   : > { %5893 = vmatmul.mubr.msk.bf16.vlgmr.msra.gmra.mxu0 %vm588_vm0, %v6682_v25  ;;  %5894 = vmatmul.mubr.msk.bf16.vlgmr.msra.gmra.mxu1 %vm588_vm0, %v6682_v25 }
  0x94   : > { %691 = vmatpush1.bf16.msra.mxu0 %v5889_v28  ;;  %734 = vmatpush1.bf16.msra.mxu1 %v5891_v29 }
  0x95   : > { %692 = vmatprep.subr.bf16.mxu0 %v5882_v30  ;;  %735 = vmatprep.subr.bf16.mxu1 %v5884_v31 }
  0x96   : > { %710 = vmatprep.mubr.bf16.mxu0 %v7159_v8  ;;  %753 = vmatprep.mubr.bf16.mxu1 %v7159_v8  ;;  %v486_v8 = vrot.slane %v461_v38, %v485_v55 }
  0x98   : > { %693 = vmatpush1.bf16.msra.mxu0 %v5881_v32  ;;  %736 = vmatpush1.bf16.msra.mxu1 %v5883_v33 }
  0x9b   : > { %5895 = vmatmul.mubr.msk.bf16.vlgmr.msra.gmra.mxu0 %vm588_vm0, %v6682_v25  ;;  %5896 = vmatmul.mubr.msk.bf16.vlgmr.msra.gmra.mxu1 %vm588_vm0, %v6682_v25 }
 0x153   : > { %v626_v45 = vpop.f32.mrf.mxu0  ;;  %v669_v48 = vpop.f32.mrf.mxu1 }
 0x154   : > { %v627_v47 = vadd.f32 %v626_v45, %v466_v42  ;;  %v670_v50 = vadd.f32 %v669_v48, %v474_v43 }
 0x155   : > { %v628_v51 = vpop.f32.mrf.mxu0  ;;  %v671_v54 = vpop.f32.mrf.mxu1 }
 0x156   : > { %v629_v53 = vadd.f32 %v628_v51, %v470_v44  ;;  %v672_v56 = vadd.f32 %v671_v54, %v478_v46  ;;  %v764_v59 = vmax.f32 %v627_v47, 0.0  ;;  %v766_v0 = vmax.f32 %v670_v50, 0.0 }
 0x157   : > { %v630_v57 = vpop.f32.mrf.mxu0  ;;  %v673_v62 = vpop.f32.mrf.mxu1 }
 0x158   : > { %v765_v60 = vmax.f32 %v629_v53, 0.0  ;;  %v631_v61 = vadd.f32 %v630_v57, %v466_v42  ;;  %v767_v1 = vmax.f32 %v672_v56, 0.0  ;;  %v674_v2 = vadd.f32 %v673_v62, %v474_v43 }
 0x159   : > { %v632_v3 = vpop.f32.mrf.mxu0  ;;  %v675_v7 = vpop.f32.mrf.mxu1 }
 0x15a   : > { %v6562_v5 = vpack.c.bf16 %v765_v60, %v764_v59  ;;  %v633_v6 = vadd.f32 %v632_v3, %v470_v44  ;;  %v6563_v9 = vpack.c.bf16 %v767_v1, %v766_v0  ;;  %v676_v10 = vadd.f32 %v675_v7, %v478_v46 }
 0x15b   : > { %v712_v11 = vpop.f32.mrf.mxu0  ;;  %v772_v13 = vmax.f32 %v631_v61, 0.0  ;;  %v755_v16 = vpop.f32.mrf.mxu1  ;;  %v774_v17 = vmax.f32 %v674_v2, 0.0 }
 0x15c   : > { %828 = vst [vmem:[#allocation2 + $0x30] sm:$0xff] %v6562_v5  ;;  %v773_v14 = vmax.f32 %v633_v6, 0.0  ;;  %v713_v15 = vadd.f32 %v712_v11, %v482_v63  ;;  %829 = vst [vmem:[#allocation2] sm:$0xff] %v6563_v9  ;;  %v775_v18 = vmax.f32 %v676_v10, 0.0  ;;  %v756_v19 = vadd.f32 %v755_v16, %v490_v4 }
 0x15d   : > { %v714_v20 = vpop.f32.mrf.mxu0  ;;  %v757_v23 = vpop.f32.mrf.mxu1 }
 0x15e   : > { %v6566_v21 = vpack.c.bf16 %v773_v14, %v772_v13  ;;  %v715_v22 = vadd.f32 %v714_v20, %v486_v8  ;;  %v6567_v24 = vpack.c.bf16 %v775_v18, %v774_v17  ;;  %v758_v25 = vadd.f32 %v757_v23, %v494_v12 }
 0x15f   : > { %v716_v26 = vpop.f32.mrf.mxu0  ;;  %v768_v27 = vmax.f32 %v713_v15, 0.0  ;;  %v759_v30 = vpop.f32.mrf.mxu1  ;;  %v770_v31 = vmax.f32 %v756_v19, 0.0 }
 0x160   : > { %832 = vst [vmem:[#allocation2 + $0x8] sm:$0xff] %v6566_v21  ;;  %v769_v28 = vmax.f32 %v715_v22, 0.0  ;;  %v717_v29 = vadd.f32 %v716_v26, %v482_v63  ;;  %833 = vst [vmem:[#allocation2 + $0x20] sm:$0xff] %v6567_v24  ;;  %v771_v32 = vmax.f32 %v758_v25, 0.0  ;;  %v760_v33 = vadd.f32 %v759_v30, %v490_v4 }
 0x161   : > { %v718_v34 = vpop.f32.mrf.mxu0  ;;  %v761_v37 = vpop.f32.mrf.mxu1 }
 0x162   : > { %v6564_v35 = vpack.c.bf16 %v769_v28, %v768_v27  ;;  %v719_v36 = vadd.f32 %v718_v34, %v486_v8  ;;  %v6565_v38 = vpack.c.bf16 %v771_v32, %v770_v31  ;;  %v762_v39 = vadd.f32 %v761_v37, %v494_v12 }
 0x163   : > { %v776_v40 = vmax.f32 %v717_v29, 0.0  ;;  %v778_v42 = vmax.f32 %v760_v33, 0.0 }
 0x164   : > { %830 = vst [vmem:[#allocation2 + $0x18] sm:$0xff] %v6564_v35  ;;  %v777_v41 = vmax.f32 %v719_v36, 0.0  ;;  %831 = vst [vmem:[#allocation2 + $0x10] sm:$0xff] %v6565_v38  ;;  %v779_v43 = vmax.f32 %v762_v39, 0.0 }
 0x166   : > { %v6568_v44 = vpack.c.bf16 %v777_v41, %v776_v40  ;;  %v6569_v45 = vpack.c.bf16 %v779_v43, %v778_v42 }
 0x168   : > { %834 = vst [vmem:[#allocation2 + $0x28] sm:$0xff] %v6568_v44  ;;  %835 = vst [vmem:[#allocation2 + $0x38] sm:$0xff] %v6569_v45 }
 0x169 PF: > { %v904_v46 = vld [vmem:[%s7360_s1 + $0x1c0] sm:$0xff]  ;;  %v7414_v39 = vld [vmem:[#allocation2] sm:$0xff]  ;;  %p6553_p6 = scmp.ne.s32.totalorder %s7138_s27, 3 }
 0x16a   : > { %v908_v47 = vld [vmem:[%s7360_s1 + $0x1e0] sm:$0xff]  ;;  %v7416_v40 = vld [vmem:[#allocation2 + $0x20] sm:$0xff] }
 0x16b   : > { %v1032_v48 = vld [vmem:[%s7360_s1 + $0x5c0] sm:$0xff]  ;;  %v5970_v49 = vcombine.high %v904_v46, %v908_v47  ;;  %v5969_v51 = vcombine.low %v904_v46, %v908_v47  ;;  %v7422_v43 = vcombine.high %v7414_v39, %v7416_v40 }
 0x16c   : > { %v1036_v50 = vld [vmem:[%s7360_s1 + $0x5e0] sm:$0xff] }
 0x16d   : > { %v896_v52 = vld [vmem:[%s7360_s1 + $0x180] sm:$0xff]  ;;  %v6098_v54 = vcombine.high %v1032_v48, %v1036_v50  ;;  %v6097_v55 = vcombine.low %v1032_v48, %v1036_v50  ;;  %4002 = vmatprep.subr.bf16.mxu0 %v5970_v49  ;;  %4077 = vmatprep.mubr.bf16.mxu1 %v7422_v43 }
 0x16e   : > { %v900_v53 = vld [vmem:[%s7360_s1 + $0x1a0] sm:$0xff]  ;;  %4003 = vmatpush1.bf16.msra.mxu0 %v5969_v51 }
 0x16f   : > { %v5962_v56 = vcombine.high %v896_v52, %v900_v53  ;;  %v1024_v57 = vld [vmem:[%s7360_s1 + $0x580] sm:$0xff]  ;;  %4045 = vmatprep.subr.bf16.mxu1 %v6098_v54  ;;  %v5961_v0 = vcombine.low %v896_v52, %v900_v53 }
 0x170   : > { %v1028_v58 = vld [vmem:[%s7360_s1 + $0x5a0] sm:$0xff]  ;;  %4046 = vmatpush1.bf16.msra.mxu1 %v6097_v55 }
 0x171   : > { %v888_v59 = vld [vmem:[%s7360_s1 + $0x140] sm:$0xff]  ;;  %v6090_v60 = vcombine.high %v1024_v57, %v1028_v58  ;;  %4004 = vmatprep.subr.bf16.mxu0 %v5962_v56  ;;  %v6089_v1 = vcombine.low %v1024_v57, %v1028_v58 }
 0x172   : > { %v892_v61 = vld [vmem:[%s7360_s1 + $0x160] sm:$0xff]  ;;  %4005 = vmatpush1.bf16.msra.mxu0 %v5961_v0 }
 0x173   : > { %v1016_v62 = vld [vmem:[%s7360_s1 + $0x540] sm:$0xff]  ;;  %v5954_v2 = vcombine.high %v888_v59, %v892_v61  ;;  %4047 = vmatprep.subr.bf16.mxu1 %v6090_v60  ;;  %v5953_v8 = vcombine.low %v888_v59, %v892_v61 }
 0x174   : > { %v1020_v63 = vld [vmem:[%s7360_s1 + $0x560] sm:$0xff]  ;;  %4048 = vmatpush1.bf16.msra.mxu1 %v6089_v1 }
 0x175   : > { %v6082_v3 = vcombine.high %v1016_v62, %v1020_v63  ;;  %v880_v4 = vld [vmem:[%s7360_s1 + $0x100] sm:$0xff]  ;;  %4006 = vmatprep.subr.bf16.mxu0 %v5954_v2  ;;  %v6081_v9 = vcombine.low %v1016_v62, %v1020_v63 }
 0x176   : > { %v884_v5 = vld [vmem:[%s7360_s1 + $0x120] sm:$0xff]  ;;  %4007 = vmatpush1.bf16.msra.mxu0 %v5953_v8 }
 0x177   : > { %v1008_v6 = vld [vmem:[%s7360_s1 + $0x500] sm:$0xff]  ;;  %v5946_v10 = vcombine.high %v880_v4, %v884_v5  ;;  %4049 = vmatprep.subr.bf16.mxu1 %v6082_v3  ;;  %v5945_v16 = vcombine.low %v880_v4, %v884_v5 }
 0x178   : > { %v1012_v7 = vld [vmem:[%s7360_s1 + $0x520] sm:$0xff]  ;;  %4050 = vmatpush1.bf16.msra.mxu1 %v6081_v9 }
 0x179   : > { %v6074_v11 = vcombine.high %v1008_v6, %v1012_v7  ;;  %v872_v12 = vld [vmem:[%s7360_s1 + $0xc0] sm:$0xff]  ;;  %4008 = vmatprep.subr.bf16.mxu0 %v5946_v10  ;;  %v6073_v17 = vcombine.low %v1008_v6, %v1012_v7 }
 0x17a   : > { %v876_v13 = vld [vmem:[%s7360_s1 + $0xe0] sm:$0xff]  ;;  %4009 = vmatpush1.bf16.msra.mxu0 %v5945_v16 }
 0x17b   : > { %v1000_v14 = vld [vmem:[%s7360_s1 + $0x4c0] sm:$0xff]  ;;  %v5938_v18 = vcombine.high %v872_v12, %v876_v13  ;;  %4051 = vmatprep.subr.bf16.mxu1 %v6074_v11  ;;  %v5937_v24 = vcombine.low %v872_v12, %v876_v13 }
 0x17c   : > { %v1004_v15 = vld [vmem:[%s7360_s1 + $0x4e0] sm:$0xff]  ;;  %4052 = vmatpush1.bf16.msra.mxu1 %v6073_v17 }
 0x17d   : > { %v6066_v19 = vcombine.high %v1000_v14, %v1004_v15  ;;  %v864_v20 = vld [vmem:[%s7360_s1 + $0x80] sm:$0xff]  ;;  %4010 = vmatprep.subr.bf16.mxu0 %v5938_v18  ;;  %v6065_v25 = vcombine.low %v1000_v14, %v1004_v15 }
 0x17e   : > { %v868_v21 = vld [vmem:[%s7360_s1 + $0xa0] sm:$0xff]  ;;  %4011 = vmatpush1.bf16.msra.mxu0 %v5937_v24 }
 0x17f   : > { %v992_v22 = vld [vmem:[%s7360_s1 + $0x480] sm:$0xff]  ;;  %v5930_v26 = vcombine.high %v864_v20, %v868_v21  ;;  %4053 = vmatprep.subr.bf16.mxu1 %v6066_v19  ;;  %v5929_v32 = vcombine.low %v864_v20, %v868_v21 }
 0x180   : > { %v996_v23 = vld [vmem:[%s7360_s1 + $0x4a0] sm:$0xff]  ;;  %4054 = vmatpush1.bf16.msra.mxu1 %v6065_v25 }
 0x181   : > { %v6058_v27 = vcombine.high %v992_v22, %v996_v23  ;;  %v856_v28 = vld [vmem:[%s7360_s1 + $0x40] sm:$0xff]  ;;  %4012 = vmatprep.subr.bf16.mxu0 %v5930_v26  ;;  %v6057_v34 = vcombine.low %v992_v22, %v996_v23 }
 0x182   : > { %v860_v29 = vld [vmem:[%s7360_s1 + $0x60] sm:$0xff]  ;;  %4013 = vmatpush1.bf16.msra.mxu0 %v5929_v32 }
 0x183   : > { %v984_v30 = vld [vmem:[%s7360_s1 + $0x440] sm:$0xff]  ;;  %v5922_v35 = vcombine.high %v856_v28, %v860_v29  ;;  %4055 = vmatprep.subr.bf16.mxu1 %v6058_v27  ;;  %v5921_v44 = vcombine.low %v856_v28, %v860_v29 }
 0x184   : > { %v988_v31 = vld [vmem:[%s7360_s1 + $0x460] sm:$0xff]  ;;  %4056 = vmatpush1.bf16.msra.mxu1 %v6057_v34 }
 0x185   : > { %v848_v33 = vld [vmem:[%s7360_s1] sm:$0xff]  ;;  %v6050_v37 = vcombine.high %v984_v30, %v988_v31  ;;  %4014 = vmatprep.subr.bf16.mxu0 %v5922_v35  ;;  %v6049_v45 = vcombine.low %v984_v30, %v988_v31 }
 0x186   : > { %v852_v36 = vld [vmem:[%s7360_s1 + $0x20] sm:$0xff]  ;;  %4015 = vmatpush1.bf16.msra.mxu0 %v5921_v44 }
 0x187   : > { %v7412_v38 = vld [vmem:[#allocation2 + $0x34] ss:$-40 sps:$4 sm:$0xff]   ;;  %v5914_v46 = vcombine.high %v848_v33, %v852_v36  ;;  %4057 = vmatprep.subr.bf16.mxu1 %v6050_v37  ;;  %v5913_v52 = vcombine.low %v848_v33, %v852_v36 }
 0x188   : > { %v976_v41 = vld [vmem:[%s7360_s1 + $0x400] sm:$0xff]  ;;  %4034 = vmatprep.mubr.bf16.mxu0 %v7412_v38  ;;  %4058 = vmatpush1.bf16.msra.mxu1 %v6049_v45 }
 0x189   : > { %v980_v42 = vld [vmem:[%s7360_s1 + $0x420] sm:$0xff]  ;;  %4016 = vmatprep.subr.bf16.mxu0 %v5914_v46 }
 0x18a   : > { %v6042_v47 = vcombine.high %v976_v41, %v980_v42  ;;  %v968_v48 = vld [vmem:[%s7360_s1 + $0x3c0] sm:$0xff]  ;;  %v6041_v53 = vcombine.low %v976_v41, %v980_v42  ;;  %4017 = vmatpush1.bf16.msra.mxu0 %v5913_v52 }
 0x18b   : > { %v972_v49 = vld [vmem:[%s7360_s1 + $0x3e0] sm:$0xff] }
 0x18c   : > { %v1096_v50 = vld [vmem:[%s7360_s1 + $0x7c0] sm:$0xff]  ;;  %v6034_v54 = vcombine.high %v968_v48, %v972_v49  ;;  %4059 = vmatprep.subr.bf16.mxu1 %v6042_v47  ;;  %v6033_v60 = vcombine.low %v968_v48, %v972_v49 }
 0x18d   : > { %v1100_v51 = vld [vmem:[%s7360_s1 + $0x7e0] sm:$0xff]  ;;  %4060 = vmatpush1.bf16.msra.mxu1 %v6041_v53 }
 0x18e   : > { %v6162_v55 = vcombine.high %v1096_v50, %v1100_v51  ;;  %v960_v56 = vld [vmem:[%s7360_s1 + $0x380] sm:$0xff]  ;;  %4018 = vmatprep.subr.bf16.mxu0 %v6034_v54  ;;  %v6161_v61 = vcombine.low %v1096_v50, %v1100_v51 }
 0x18f   : > { %v964_v57 = vld [vmem:[%s7360_s1 + $0x3a0] sm:$0xff]  ;;  %4019 = vmatpush2.bf16.msra.mxu0 %v6033_v60 }
 0x190   : > { %v1088_v58 = vld [vmem:[%s7360_s1 + $0x780] sm:$0xff]  ;;  %v6026_v62 = vcombine.high %v960_v56, %v964_v57  ;;  %4061 = vmatprep.subr.bf16.mxu1 %v6162_v55  ;;  %v6025_v4 = vcombine.low %v960_v56, %v964_v57 }
 0x191   : > { %v1092_v59 = vld [vmem:[%s7360_s1 + $0x7a0] sm:$0xff]  ;;  %4062 = vmatpush2.bf16.msra.mxu1 %v6161_v61 }
 0x192   : > { %v6154_v63 = vcombine.high %v1088_v58, %v1092_v59  ;;  %v952_v0 = vld [vmem:[%s7360_s1 + $0x340] sm:$0xff]  ;;  %4020 = vmatprep.subr.bf16.mxu0 %v6026_v62  ;;  %v6153_v5 = vcombine.low %v1088_v58, %v1092_v59 }
 0x193   : > { %v956_v1 = vld [vmem:[%s7360_s1 + $0x360] sm:$0xff]  ;;  %4021 = vmatpush2.bf16.msra.mxu0 %v6025_v4 }
 0x194   : > { %v1080_v2 = vld [vmem:[%s7360_s1 + $0x740] sm:$0xff]  ;;  %v6018_v6 = vcombine.high %v952_v0, %v956_v1  ;;  %4063 = vmatprep.subr.bf16.mxu1 %v6154_v63  ;;  %v6017_v12 = vcombine.low %v952_v0, %v956_v1  ;;  %v7468_v1 = vcombine.low %v7414_v39, %v7416_v40 }
 0x195   : > { %v1084_v3 = vld [vmem:[%s7360_s1 + $0x760] sm:$0xff]  ;;  %4064 = vmatpush2.bf16.msra.mxu1 %v6153_v5 }
 0x196   : > { %v6146_v7 = vcombine.high %v1080_v2, %v1084_v3  ;;  %v944_v8 = vld [vmem:[%s7360_s1 + $0x300] sm:$0xff]  ;;  %4022 = vmatprep.subr.bf16.mxu0 %v6018_v6  ;;  %v6145_v13 = vcombine.low %v1080_v2, %v1084_v3 }
 0x197   : > { %v948_v9 = vld [vmem:[%s7360_s1 + $0x320] sm:$0xff]  ;;  %4023 = vmatpush2.bf16.msra.mxu0 %v6017_v12 }
 0x198   : > { %v1072_v10 = vld [vmem:[%s7360_s1 + $0x700] sm:$0xff]  ;;  %v6010_v14 = vcombine.high %v944_v8, %v948_v9  ;;  %4065 = vmatprep.subr.bf16.mxu1 %v6146_v7  ;;  %v6009_v20 = vcombine.low %v944_v8, %v948_v9 }
 0x199   : > { %v1076_v11 = vld [vmem:[%s7360_s1 + $0x720] sm:$0xff]  ;;  %4066 = vmatpush2.bf16.msra.mxu1 %v6145_v13 }
 0x19a   : > { %v6138_v15 = vcombine.high %v1072_v10, %v1076_v11  ;;  %v936_v16 = vld [vmem:[%s7360_s1 + $0x2c0] sm:$0xff]  ;;  %4024 = vmatprep.subr.bf16.mxu0 %v6010_v14  ;;  %v6137_v21 = vcombine.low %v1072_v10, %v1076_v11  ;;  %v6688_v11 = vld [vmem:[#allocation2 + $0x14] ss:$40 sps:$4 sm:$0xff]  }
 0x19b   : > { %v940_v17 = vld [vmem:[%s7360_s1 + $0x2e0] sm:$0xff]  ;;  %4025 = vmatpush2.bf16.msra.mxu0 %v6009_v20 }
 0x19c   : > { %v1064_v18 = vld [vmem:[%s7360_s1 + $0x6c0] sm:$0xff]  ;;  %v6002_v22 = vcombine.high %v936_v16, %v940_v17  ;;  %4067 = vmatprep.subr.bf16.mxu1 %v6138_v15  ;;  %v6001_v28 = vcombine.low %v936_v16, %v940_v17 }
 0x19d   : > { %v1068_v19 = vld [vmem:[%s7360_s1 + $0x6e0] sm:$0xff]  ;;  %4068 = vmatpush2.bf16.msra.mxu1 %v6137_v21 }
 0x19e   : > { %v6130_v23 = vcombine.high %v1064_v18, %v1068_v19  ;;  %v928_v24 = vld [vmem:[%s7360_s1 + $0x280] sm:$0xff]  ;;  %4026 = vmatprep.subr.bf16.mxu0 %v6002_v22  ;;  %v6129_v29 = vcombine.low %v1064_v18, %v1068_v19 }
 0x19f   : > { %v932_v25 = vld [vmem:[%s7360_s1 + $0x2a0] sm:$0xff]  ;;  %4027 = vmatpush2.bf16.msra.mxu0 %v6001_v28 }
 0x1a0   : > { %v1056_v26 = vld [vmem:[%s7360_s1 + $0x680] sm:$0xff]  ;;  %v5994_v30 = vcombine.high %v928_v24, %v932_v25  ;;  %4069 = vmatprep.subr.bf16.mxu1 %v6130_v23  ;;  %v5993_v36 = vcombine.low %v928_v24, %v932_v25 }
 0x1a1   : > { %v1060_v27 = vld [vmem:[%s7360_s1 + $0x6a0] sm:$0xff]  ;;  %4070 = vmatpush2.bf16.msra.mxu1 %v6129_v29 }
 0x1a2   : > { %v6122_v31 = vcombine.high %v1056_v26, %v1060_v27  ;;  %v920_v32 = vld [vmem:[%s7360_s1 + $0x240] sm:$0xff]  ;;  %4028 = vmatprep.subr.bf16.mxu0 %v5994_v30  ;;  %v6121_v37 = vcombine.low %v1056_v26, %v1060_v27 }
 0x1a3   : > { %v924_v33 = vld [vmem:[%s7360_s1 + $0x260] sm:$0xff]  ;;  %4029 = vmatpush2.bf16.msra.mxu0 %v5993_v36 }
 0x1a4   : > { %v1048_v34 = vld [vmem:[%s7360_s1 + $0x640] sm:$0xff]  ;;  %v5986_v41 = vcombine.high %v920_v32, %v924_v33  ;;  %4071 = vmatprep.subr.bf16.mxu1 %v6122_v31  ;;  %v5985_v48 = vcombine.low %v920_v32, %v924_v33 }
 0x1a5   : > { %v1052_v35 = vld [vmem:[%s7360_s1 + $0x660] sm:$0xff]  ;;  %4072 = vmatpush2.bf16.msra.mxu1 %v6121_v37 }
 0x1a6   : > { %v6114_v42 = vcombine.high %v1048_v34, %v1052_v35  ;;  %v912_v44 = vld [vmem:[%s7360_s1 + $0x200] sm:$0xff]  ;;  %4030 = vmatprep.subr.bf16.mxu0 %v5986_v41  ;;  %v6113_v49 = vcombine.low %v1048_v34, %v1052_v35 }
 0x1a7   : > { %v916_v45 = vld [vmem:[%s7360_s1 + $0x220] sm:$0xff]  ;;  %4031 = vmatpush2.bf16.msra.mxu0 %v5985_v48 }
 0x1a8   : > { %v1040_v46 = vld [vmem:[%s7360_s1 + $0x600] sm:$0xff]  ;;  %v5978_v50 = vcombine.high %v912_v44, %v916_v45  ;;  %4073 = vmatprep.subr.bf16.mxu1 %v6114_v42  ;;  %v5977_v56 = vcombine.low %v912_v44, %v916_v45 }
 0x1a9   : > { %v1044_v47 = vld [vmem:[%s7360_s1 + $0x620] sm:$0xff]  ;;  %4074 = vmatpush2.bf16.msra.mxu1 %v6113_v49 }
 0x1aa   : > { %v6106_v51 = vcombine.high %v1040_v46, %v1044_v47  ;;  %v1160_v52 = vld [vmem:[%s7360_s1 + $0x9c0] sm:$0xff]  ;;  %4032 = vmatprep.subr.bf16.mxu0 %v5978_v50  ;;  %v6105_v57 = vcombine.low %v1040_v46, %v1044_v47 }
 0x1ab   : > { %v1164_v53 = vld [vmem:[%s7360_s1 + $0x9e0] sm:$0xff]  ;;  %4033 = vmatpush2.bf16.msra.mxu0 %v5977_v56 }
 0x1ac   : > { %v1288_v54 = vld [vmem:[%s7360_s1 + $0xdc0] sm:$0xff]  ;;  %v6226_v58 = vcombine.high %v1160_v52, %v1164_v53  ;;  %4075 = vmatprep.subr.bf16.mxu1 %v6106_v51  ;;  %v6225_v2 = vcombine.low %v1160_v52, %v1164_v53 }
 0x1ad   : > { %v1292_v55 = vld [vmem:[%s7360_s1 + $0xde0] sm:$0xff]  ;;  %4076 = vmatpush2.bf16.msra.mxu1 %v6105_v57 }
 0x1ae   : > { %v6354_v59 = vcombine.high %v1288_v54, %v1292_v55  ;;  %v1152_v60 = vld [vmem:[%s7360_s1 + $0x980] sm:$0xff]  ;;  %4088 = vmatprep.subr.bf16.mxu0 %v6226_v58  ;;  %v6353_v3 = vcombine.low %v1288_v54, %v1292_v55 }
 0x1af   : > { %v1156_v61 = vld [vmem:[%s7360_s1 + $0x9a0] sm:$0xff] }
 0x1b0   : > { %v6685_v62 = vld [vmem:[#allocation2 + $0x30] ss:$-40 sps:$4 sm:$0xff]   ;;  %v6218_v4 = vcombine.high %v1152_v60, %v1156_v61  ;;  %4131 = vmatprep.subr.bf16.mxu1 %v6354_v59  ;;  %v6686_v8 = vld [vmem:[#allocation2 + $0x1c] ss:$16 sps:$4 sm:$0xff]   ;;  %4078 = vmatmul.mubr.bf16.vlgmr.msra.gmra.mxu1 %v7468_v1  ;;  %v6217_v39 = vcombine.low %v1152_v60, %v1156_v61 }
 0x1b1   : > { %v1280_v63 = vld [vmem:[%s7360_s1 + $0xd80] sm:$0xff]  ;;  %4035 = vmatmul.mubr.bf16.vlgmr.msra.gmra.mxu0 %v6685_v62  ;;  %4132 = vmatpush1.bf16.msra.mxu1 %v6353_v3 }
 0x1b2   : > { %v1284_v0 = vld [vmem:[%s7360_s1 + $0xda0] sm:$0xff]  ;;  %4089 = vmatpush1.bf16.msra.mxu0 %v6225_v2  ;;  %4120 = vmatprep.mubr.bf16.mxu0 %v6686_v8 }
 0x1b3   : > { %v6346_v5 = vcombine.high %v1280_v63, %v1284_v0  ;;  %v1144_v6 = vld [vmem:[%s7360_s1 + $0x940] sm:$0xff]  ;;  %4090 = vmatprep.subr.bf16.mxu0 %v6218_v4  ;;  %v6345_v40 = vcombine.low %v1280_v63, %v1284_v0  ;;  %4163 = vmatprep.mubr.bf16.mxu1 %v6688_v11 }
 0x1b4   : > { %v1148_v7 = vld [vmem:[%s7360_s1 + $0x960] sm:$0xff] }
 0x1b5   : > { %v1272_v9 = vld [vmem:[%s7360_s1 + $0xd40] sm:$0xff]  ;;  %v6210_v12 = vcombine.high %v1144_v6, %v1148_v7  ;;  %4133 = vmatprep.subr.bf16.mxu1 %v6346_v5  ;;  %v6209_v18 = vcombine.low %v1144_v6, %v1148_v7 }
 0x1b6   : > { %v1276_v10 = vld [vmem:[%s7360_s1 + $0xd60] sm:$0xff]  ;;  %4091 = vmatpush1.bf16.msra.mxu0 %v6217_v39  ;;  %4134 = vmatpush1.bf16.msra.mxu1 %v6345_v40 }
 0x1b7   : > { %v6338_v13 = vcombine.high %v1272_v9, %v1276_v10  ;;  %v1136_v14 = vld [vmem:[%s7360_s1 + $0x900] sm:$0xff]  ;;  %4092 = vmatprep.subr.bf16.mxu0 %v6210_v12  ;;  %v6337_v19 = vcombine.low %v1272_v9, %v1276_v10 }
 0x1b8   : > { %v1140_v15 = vld [vmem:[%s7360_s1 + $0x920] sm:$0xff] }
 0x1b9   : > { %v1264_v16 = vld [vmem:[%s7360_s1 + $0xd00] sm:$0xff]  ;;  %v6202_v20 = vcombine.high %v1136_v14, %v1140_v15  ;;  %4135 = vmatprep.subr.bf16.mxu1 %v6338_v13  ;;  %v6201_v26 = vcombine.low %v1136_v14, %v1140_v15 }
 0x1ba   : > { %v1268_v17 = vld [vmem:[%s7360_s1 + $0xd20] sm:$0xff]  ;;  %4093 = vmatpush1.bf16.msra.mxu0 %v6209_v18  ;;  %4136 = vmatpush1.bf16.msra.mxu1 %v6337_v19 }
 0x1bb   : > { %v1128_v21 = vld [vmem:[%s7360_s1 + $0x8c0] sm:$0xff]  ;;  %v6330_v24 = vcombine.high %v1264_v16, %v1268_v17  ;;  %4094 = vmatprep.subr.bf16.mxu0 %v6202_v20  ;;  %v6329_v27 = vcombine.low %v1264_v16, %v1268_v17 }
 0x1bc   : > { %v1132_v22 = vld [vmem:[%s7360_s1 + $0x8e0] sm:$0xff] }
 0x1bd   : > { %v1256_v23 = vld [vmem:[%s7360_s1 + $0xcc0] sm:$0xff]  ;;  %v6194_v28 = vcombine.high %v1128_v21, %v1132_v22  ;;  %4137 = vmatprep.subr.bf16.mxu1 %v6330_v24  ;;  %v6193_v34 = vcombine.low %v1128_v21, %v1132_v22 }
 0x1be   : > { %v1260_v25 = vld [vmem:[%s7360_s1 + $0xce0] sm:$0xff]  ;;  %4095 = vmatpush1.bf16.msra.mxu0 %v6201_v26  ;;  %4138 = vmatpush1.bf16.msra.mxu1 %v6329_v27 }
 0x1bf   : > { %v1120_v29 = vld [vmem:[%s7360_s1 + $0x880] sm:$0xff]  ;;  %v6322_v32 = vcombine.high %v1256_v23, %v1260_v25  ;;  %4096 = vmatprep.subr.bf16.mxu0 %v6194_v28  ;;  %v6321_v35 = vcombine.low %v1256_v23, %v1260_v25 }
 0x1c0   : > { %v1124_v30 = vld [vmem:[%s7360_s1 + $0x8a0] sm:$0xff] }
 0x1c1   : > { %v1248_v31 = vld [vmem:[%s7360_s1 + $0xc80] sm:$0xff]  ;;  %v6186_v36 = vcombine.high %v1120_v29, %v1124_v30  ;;  %4139 = vmatprep.subr.bf16.mxu1 %v6322_v32  ;;  %v6185_v46 = vcombine.low %v1120_v29, %v1124_v30 }
 0x1c2   : > { %v1252_v33 = vld [vmem:[%s7360_s1 + $0xca0] sm:$0xff]  ;;  %4097 = vmatpush1.bf16.msra.mxu0 %v6193_v34  ;;  %4140 = vmatpush1.bf16.msra.mxu1 %v6321_v35 }
 0x1c3   : > { %v1112_v37 = vld [vmem:[%s7360_s1 + $0x840] sm:$0xff]  ;;  %v6314_v44 = vcombine.high %v1248_v31, %v1252_v33  ;;  %4098 = vmatprep.subr.bf16.mxu0 %v6186_v36  ;;  %v6313_v47 = vcombine.low %v1248_v31, %v1252_v33 }
 0x1c4   : > { %v1116_v41 = vld [vmem:[%s7360_s1 + $0x860] sm:$0xff] }
 0x1c5   : > { %v1240_v42 = vld [vmem:[%s7360_s1 + $0xc40] sm:$0xff]  ;;  %v6178_v48 = vcombine.high %v1112_v37, %v1116_v41  ;;  %4141 = vmatprep.subr.bf16.mxu1 %v6314_v44  ;;  %v6177_v54 = vcombine.low %v1112_v37, %v1116_v41 }
 0x1c6   : > { %v1244_v45 = vld [vmem:[%s7360_s1 + $0xc60] sm:$0xff]  ;;  %4099 = vmatpush1.bf16.msra.mxu0 %v6185_v46  ;;  %4142 = vmatpush1.bf16.msra.mxu1 %v6313_v47 }
 0x1c7   : > { %v1104_v49 = vld [vmem:[%s7360_s1 + $0x800] sm:$0xff]  ;;  %v6306_v52 = vcombine.high %v1240_v42, %v1244_v45  ;;  %4100 = vmatprep.subr.bf16.mxu0 %v6178_v48  ;;  %v6305_v55 = vcombine.low %v1240_v42, %v1244_v45 }
 0x1c8   : > { %v1108_v50 = vld [vmem:[%s7360_s1 + $0x820] sm:$0xff] }
 0x1c9   : > { %v1232_v51 = vld [vmem:[%s7360_s1 + $0xc00] sm:$0xff]  ;;  %v6170_v56 = vcombine.high %v1104_v49, %v1108_v50  ;;  %4143 = vmatprep.subr.bf16.mxu1 %v6306_v52  ;;  %v6169_v62 = vcombine.low %v1104_v49, %v1108_v50 }
 0x1ca   : > { %v1236_v53 = vld [vmem:[%s7360_s1 + $0xc20] sm:$0xff]  ;;  %4101 = vmatpush1.bf16.msra.mxu0 %v6177_v54  ;;  %4144 = vmatpush1.bf16.msra.mxu1 %v6305_v55 }
 0x1cb   : > { %v1224_v57 = vld [vmem:[%s7360_s1 + $0xbc0] sm:$0xff]  ;;  %v6298_v60 = vcombine.high %v1232_v51, %v1236_v53  ;;  %4102 = vmatprep.subr.bf16.mxu0 %v6170_v56  ;;  %v6297_v63 = vcombine.low %v1232_v51, %v1236_v53 }
 0x1cc   : > { %v1228_v58 = vld [vmem:[%s7360_s1 + $0xbe0] sm:$0xff] }
 0x1cd   : > { %v1352_v59 = vld [vmem:[%s7360_s1 + $0xfc0] sm:$0xff]  ;;  %v6290_v0 = vcombine.high %v1224_v57, %v1228_v58  ;;  %4145 = vmatprep.subr.bf16.mxu1 %v6298_v60  ;;  %v6289_v7 = vcombine.low %v1224_v57, %v1228_v58  ;;  %v905_v60 = vld [vmem:[%s7360_s1 + $0x1c8] sm:$0xff] }
 0x1ce   : > { %v1356_v61 = vld [vmem:[%s7360_s1 + $0xfe0] sm:$0xff]  ;;  %4103 = vmatpush1.bf16.msra.mxu0 %v6169_v62  ;;  %4146 = vmatpush1.bf16.msra.mxu1 %v6297_v63  ;;  %v1033_v62 = vld [vmem:[%s7360_s1 + $0x5c8] sm:$0xff] }
 0x1cf   : > { %v1216_v2 = vld [vmem:[%s7360_s1 + $0xb80] sm:$0xff]  ;;  %v6418_v5 = vcombine.high %v1352_v59, %v1356_v61  ;;  %4104 = vmatprep.subr.bf16.mxu0 %v6290_v0  ;;  %v6417_v8 = vcombine.low %v1352_v59, %v1356_v61  ;;  %v909_v61 = vld [vmem:[%s7360_s1 + $0x1e8] sm:$0xff] }
 0x1d0   : > { %v1220_v3 = vld [vmem:[%s7360_s1 + $0xba0] sm:$0xff]  ;;  %v1037_v0 = vld [vmem:[%s7360_s1 + $0x5e8] sm:$0xff] }
 0x1d1   : > { %v1344_v4 = vld [vmem:[%s7360_s1 + $0xf80] sm:$0xff]  ;;  %v6282_v9 = vcombine.high %v1216_v2, %v1220_v3  ;;  %4147 = vmatprep.subr.bf16.mxu1 %v6418_v5  ;;  %v6281_v13 = vcombine.low %v1216_v2, %v1220_v3  ;;  %v5972_v5 = vcombine.high %v905_v60, %v909_v61 }
 0x1d2   : > { %v1348_v6 = vld [vmem:[%s7360_s1 + $0xfa0] sm:$0xff]  ;;  %4105 = vmatpush2.bf16.msra.mxu0 %v6289_v7  ;;  %4148 = vmatpush2.bf16.msra.mxu1 %v6417_v8  ;;  %v901_v7 = vld [vmem:[%s7360_s1 + $0x1a8] sm:$0xff] }
 0x1d3   : > { %v1208_v10 = vld [vmem:[%s7360_s1 + $0xb40] sm:$0xff]  ;;  %v6410_v40 = vcombine.high %v1344_v4, %v1348_v6  ;;  %4106 = vmatprep.subr.bf16.mxu0 %v6282_v9  ;;  %v6409_v14 = vcombine.low %v1344_v4, %v1348_v6  ;;  %v897_v6 = vld [vmem:[%s7360_s1 + $0x188] sm:$0xff] }
 0x1d4   : > { %v1212_v11 = vld [vmem:[%s7360_s1 + $0xb60] sm:$0xff]  ;;  %v1025_v8 = vld [vmem:[%s7360_s1 + $0x588] sm:$0xff] }
 0x1d5   : > { %v1336_v39 = vld [vmem:[%s7360_s1 + $0xf40] sm:$0xff]  ;;  %v6274_v15 = vcombine.high %v1208_v10, %v1212_v11  ;;  %4149 = vmatprep.subr.bf16.mxu1 %v6410_v40  ;;  %v6273_v21 = vcombine.low %v1208_v10, %v1212_v11  ;;  %v7536_v9 = vld [vmem:[#allocation2 + $0x10] ss:$40 sps:$4 sm:$0xff]   ;;  %v6100_v10 = vcombine.high %v1033_v62, %v1037_v0  ;;  %v6099_v40 = vcombine.low %v1033_v62, %v1037_v0 }
 0x1d6   : > { %v1340_v12 = vld [vmem:[%s7360_s1 + $0xf60] sm:$0xff]  ;;  %4107 = vmatpush2.bf16.msra.mxu0 %v6281_v13  ;;  %4150 = vmatpush2.bf16.msra.mxu1 %v6409_v14  ;;  %v1029_v11 = vld [vmem:[%s7360_s1 + $0x5a8] sm:$0xff] }
 0x1d7   : > { %v1200_v16 = vld [vmem:[%s7360_s1 + $0xb00] sm:$0xff]  ;;  %v6402_v19 = vcombine.high %v1336_v39, %v1340_v12  ;;  %4108 = vmatprep.subr.bf16.mxu0 %v6274_v15  ;;  %v6401_v22 = vcombine.low %v1336_v39, %v1340_v12  ;;  %v5971_v39 = vcombine.low %v905_v60, %v909_v61  ;;  %v5964_v12 = vcombine.high %v897_v6, %v901_v7  ;;  %v889_v13 = vld [vmem:[%s7360_s1 + $0x148] sm:$0xff] }
 0x1d8   : > { %v1204_v17 = vld [vmem:[%s7360_s1 + $0xb20] sm:$0xff]  ;;  %v893_v14 = vld [vmem:[%s7360_s1 + $0x168] sm:$0xff]  ;;  %v6092_v15 = vcombine.high %v1025_v8, %v1029_v11 }
 0x1d9   : > { %v1328_v18 = vld [vmem:[%s7360_s1 + $0xf00] sm:$0xff]  ;;  %v6266_v23 = vcombine.high %v1200_v16, %v1204_v17  ;;  %4151 = vmatprep.subr.bf16.mxu1 %v6402_v19  ;;  %v6265_v29 = vcombine.low %v1200_v16, %v1204_v17  ;;  %v1017_v16 = vld [vmem:[%s7360_s1 + $0x548] sm:$0xff]  ;;  %v6091_v19 = vcombine.low %v1025_v8, %v1029_v11 }
 0x1da   : > { %v1332_v20 = vld [vmem:[%s7360_s1 + $0xf20] sm:$0xff]  ;;  %4109 = vmatpush2.bf16.msra.mxu0 %v6273_v21  ;;  %4152 = vmatpush2.bf16.msra.mxu1 %v6401_v22  ;;  %v1021_v17 = vld [vmem:[%s7360_s1 + $0x568] sm:$0xff] }
 0x1db   : > { %v1192_v24 = vld [vmem:[%s7360_s1 + $0xac0] sm:$0xff]  ;;  %v6394_v27 = vcombine.high %v1328_v18, %v1332_v20  ;;  %4110 = vmatprep.subr.bf16.mxu0 %v6266_v23  ;;  %v6393_v30 = vcombine.low %v1328_v18, %v1332_v20  ;;  %v5963_v18 = vcombine.low %v897_v6, %v901_v7  ;;  %v5956_v20 = vcombine.high %v889_v13, %v893_v14  ;;  %v881_v21 = vld [vmem:[%s7360_s1 + $0x108] sm:$0xff] }
 0x1dc   : > { %v1196_v25 = vld [vmem:[%s7360_s1 + $0xae0] sm:$0xff]  ;;  %v885_v22 = vld [vmem:[%s7360_s1 + $0x128] sm:$0xff]  ;;  %v6084_v23 = vcombine.high %v1017_v16, %v1021_v17 }
 0x1dd   : > { %v1320_v26 = vld [vmem:[%s7360_s1 + $0xec0] sm:$0xff]  ;;  %v6258_v31 = vcombine.high %v1192_v24, %v1196_v25  ;;  %4153 = vmatprep.subr.bf16.mxu1 %v6394_v27  ;;  %v6257_v37 = vcombine.low %v1192_v24, %v1196_v25  ;;  %v1009_v24 = vld [vmem:[%s7360_s1 + $0x508] sm:$0xff]  ;;  %v6083_v27 = vcombine.low %v1017_v16, %v1021_v17 }
 0x1de   : > { %v1324_v28 = vld [vmem:[%s7360_s1 + $0xee0] sm:$0xff]  ;;  %4111 = vmatpush2.bf16.msra.mxu0 %v6265_v29  ;;  %4154 = vmatpush2.bf16.msra.mxu1 %v6393_v30  ;;  %v1013_v25 = vld [vmem:[%s7360_s1 + $0x528] sm:$0xff] }
 0x1df   : > { %v1184_v32 = vld [vmem:[%s7360_s1 + $0xa80] sm:$0xff]  ;;  %v6386_v35 = vcombine.high %v1320_v26, %v1324_v28  ;;  %4112 = vmatprep.subr.bf16.mxu0 %v6258_v31  ;;  %v6385_v41 = vcombine.low %v1320_v26, %v1324_v28  ;;  %v5955_v26 = vcombine.low %v889_v13, %v893_v14  ;;  %v5948_v28 = vcombine.high %v881_v21, %v885_v22  ;;  %v873_v30 = vld [vmem:[%s7360_s1 + $0xc8] sm:$0xff] }
 0x1e0   : > { %v1188_v33 = vld [vmem:[%s7360_s1 + $0xaa0] sm:$0xff]  ;;  %v6076_v29 = vcombine.high %v1009_v24, %v1013_v25  ;;  %v877_v31 = vld [vmem:[%s7360_s1 + $0xe8] sm:$0xff] }
 0x1e1   : > { %v1312_v34 = vld [vmem:[%s7360_s1 + $0xe80] sm:$0xff]  ;;  %v6250_v42 = vcombine.high %v1184_v32, %v1188_v33  ;;  %4155 = vmatprep.subr.bf16.mxu1 %v6386_v35  ;;  %v6249_v49 = vcombine.low %v1184_v32, %v1188_v33  ;;  %v1001_v32 = vld [vmem:[%s7360_s1 + $0x4c8] sm:$0xff]  ;;  %v5940_v35 = vcombine.high %v873_v30, %v877_v31 }
 0x1e2   : > { %v1316_v36 = vld [vmem:[%s7360_s1 + $0xea0] sm:$0xff]  ;;  %4113 = vmatpush2.bf16.msra.mxu0 %v6257_v37  ;;  %4156 = vmatpush2.bf16.msra.mxu1 %v6385_v41  ;;  %v1005_v33 = vld [vmem:[%s7360_s1 + $0x4e8] sm:$0xff] }
 0x1e3   : > { %v1176_v44 = vld [vmem:[%s7360_s1 + $0xa40] sm:$0xff]  ;;  %v6378_v47 = vcombine.high %v1312_v34, %v1316_v36  ;;  %4114 = vmatprep.subr.bf16.mxu0 %v6250_v42  ;;  %v6377_v50 = vcombine.low %v1312_v34, %v1316_v36  ;;  %v6075_v34 = vcombine.low %v1009_v24, %v1013_v25  ;;  %v6068_v36 = vcombine.high %v1001_v32, %v1005_v33  ;;  %v865_v37 = vld [vmem:[%s7360_s1 + $0x88] sm:$0xff] }
 0x1e4   : > { %v1180_v45 = vld [vmem:[%s7360_s1 + $0xa60] sm:$0xff]  ;;  %v869_v41 = vld [vmem:[%s7360_s1 + $0xa8] sm:$0xff] }
 0x1e5   : > { %v1304_v46 = vld [vmem:[%s7360_s1 + $0xe40] sm:$0xff]  ;;  %v6242_v51 = vcombine.high %v1176_v44, %v1180_v45  ;;  %4157 = vmatprep.subr.bf16.mxu1 %v6378_v47  ;;  %v6241_v57 = vcombine.low %v1176_v44, %v1180_v45  ;;  %v993_v42 = vld [vmem:[%s7360_s1 + $0x488] sm:$0xff]  ;;  %v5939_v45 = vcombine.low %v873_v30, %v877_v31  ;;  %v5932_v47 = vcombine.high %v865_v37, %v869_v41 }
 0x1e6   : > { %v1308_v48 = vld [vmem:[%s7360_s1 + $0xe60] sm:$0xff]  ;;  %4115 = vmatpush2.bf16.msra.mxu0 %v6249_v49  ;;  %4158 = vmatpush2.bf16.msra.mxu1 %v6377_v50  ;;  %v997_v44 = vld [vmem:[%s7360_s1 + $0x4a8] sm:$0xff] }
 0x1e7   : > { %v1168_v52 = vld [vmem:[%s7360_s1 + $0xa00] sm:$0xff]  ;;  %v6370_v55 = vcombine.high %v1304_v46, %v1308_v48  ;;  %4116 = vmatprep.subr.bf16.mxu0 %v6242_v51  ;;  %v6369_v58 = vcombine.low %v1304_v46, %v1308_v48  ;;  %v6067_v46 = vcombine.low %v1001_v32, %v1005_v33  ;;  %v6060_v48 = vcombine.high %v993_v42, %v997_v44  ;;  %v857_v49 = vld [vmem:[%s7360_s1 + $0x48] sm:$0xff] }
 0x1e8   : > { %v1172_v53 = vld [vmem:[%s7360_s1 + $0xa20] sm:$0xff]  ;;  %v861_v50 = vld [vmem:[%s7360_s1 + $0x68] sm:$0xff] }
 0x1e9   : > { %v1296_v54 = vld [vmem:[%s7360_s1 + $0xe00] sm:$0xff]  ;;  %v6234_v59 = vcombine.high %v1168_v52, %v1172_v53  ;;  %4159 = vmatprep.subr.bf16.mxu1 %v6370_v55  ;;  %v6233_v2 = vcombine.low %v1168_v52, %v1172_v53  ;;  %v985_v51 = vld [vmem:[%s7360_s1 + $0x448] sm:$0xff]  ;;  %v5931_v53 = vcombine.low %v865_v37, %v869_v41  ;;  %v5924_v55 = vcombine.high %v857_v49, %v861_v50 }
 0x1ea   : > { %v1300_v56 = vld [vmem:[%s7360_s1 + $0xe20] sm:$0xff]  ;;  %4117 = vmatpush2.bf16.msra.mxu0 %v6241_v57  ;;  %4160 = vmatpush2.bf16.msra.mxu1 %v6369_v58  ;;  %v989_v52 = vld [vmem:[%s7360_s1 + $0x468] sm:$0xff]  ;;  %v5923_v61 = vcombine.low %v857_v49, %v861_v50 }
 0x1eb   : > { %v6362_v63 = vcombine.high %v1296_v54, %v1300_v56  ;;  %4118 = vmatprep.subr.bf16.mxu0 %v6234_v59  ;;  %v6361_v3 = vcombine.low %v1296_v54, %v1300_v56  ;;  %v7531_v4 = vld [vmem:[#allocation2 + $0x18] ss:$16 sps:$4 sm:$0xff]   ;;  %v6059_v54 = vcombine.low %v993_v42, %v997_v44  ;;  %v6052_v56 = vcombine.high %v985_v51, %v989_v52  ;;  %v849_v57 = vld [vmem:[%s7360_s1 + $0x8] sm:$0xff] }
 0x1ec   : > { %v853_v58 = vld [vmem:[%s7360_s1 + $0x28] sm:$0xff]  ;;  %v6051_v62 = vcombine.low %v985_v51, %v989_v52 }
 0x1ed   : > { %4161 = vmatprep.subr.bf16.mxu1 %v6362_v63  ;;  %v977_v59 = vld [vmem:[%s7360_s1 + $0x408] sm:$0xff]  ;;  %v5916_v63 = vcombine.high %v849_v57, %v853_v58  ;;  %v5915_v7 = vcombine.low %v849_v57, %v853_v58 }
 0x1ee   : > { %4119 = vmatpush2.bf16.msra.mxu0 %v6233_v2  ;;  %4162 = vmatpush2.bf16.msra.mxu1 %v6361_v3  ;;  %v981_v60 = vld [vmem:[%s7360_s1 + $0x428] sm:$0xff] }
 0x1ef   : > { %4174 = vmatprep.subr.bf16.mxu0 %v5972_v5  ;;  %4217 = vmatprep.subr.bf16.mxu1 %v6100_v10  ;;  %v6044_v0 = vcombine.high %v977_v59, %v981_v60  ;;  %v969_v2 = vld [vmem:[%s7360_s1 + $0x3c8] sm:$0xff]  ;;  %v6043_v8 = vcombine.low %v977_v59, %v981_v60 }
 0x1f0   : > { %v973_v3 = vld [vmem:[%s7360_s1 + $0x3e8] sm:$0xff] }
 0x1f1   : > { %4121 = vmatmul.mubr.bf16.vlgmr.msra.gmra.mxu0 %v7531_v4  ;;  %4164 = vmatmul.mubr.bf16.vlgmr.msra.gmra.mxu1 %v7536_v9  ;;  %v1097_v5 = vld [vmem:[%s7360_s1 + $0x7c8] sm:$0xff]  ;;  %v6036_v10 = vcombine.high %v969_v2, %v973_v3  ;;  %v6035_v14 = vcombine.low %v969_v2, %v973_v3 }
 0x1f2   : > { %4175 = vmatpush1.bf16.msra.mxu0 %v5971_v39  ;;  %4218 = vmatpush1.bf16.msra.mxu1 %v6099_v40  ;;  %v1101_v6 = vld [vmem:[%s7360_s1 + $0x7e8] sm:$0xff] }
 0x1f3   : > { %4176 = vmatprep.subr.bf16.mxu0 %v5964_v12  ;;  %4219 = vmatprep.subr.bf16.mxu1 %v6092_v15  ;;  %v6164_v11 = vcombine.high %v1097_v5, %v1101_v6  ;;  %v961_v39 = vld [vmem:[%s7360_s1 + $0x388] sm:$0xff]  ;;  %v6163_v15 = vcombine.low %v1097_v5, %v1101_v6 }
 0x1f4   : > { %4206 = vmatprep.mubr.bf16.mxu0 %v7412_v38  ;;  %4249 = vmatprep.mubr.bf16.mxu1 %v7422_v43  ;;  %v5947_v38 = vcombine.low %v881_v21, %v885_v22  ;;  %v965_v40 = vld [vmem:[%s7360_s1 + $0x3a8] sm:$0xff] }
 0x1f5   : > { %v1089_v12 = vld [vmem:[%s7360_s1 + $0x788] sm:$0xff]  ;;  %v6028_v16 = vcombine.high %v961_v39, %v965_v40  ;;  %v6027_v22 = vcombine.low %v961_v39, %v965_v40 }
 0x1f6   : > { %4177 = vmatpush1.bf16.msra.mxu0 %v5963_v18  ;;  %4220 = vmatpush1.bf16.msra.mxu1 %v6091_v19  ;;  %v1093_v13 = vld [vmem:[%s7360_s1 + $0x7a8] sm:$0xff] }
 0x1f7   : > { %4178 = vmatprep.subr.bf16.mxu0 %v5956_v20  ;;  %4221 = vmatprep.subr.bf16.mxu1 %v6084_v23  ;;  %v6156_v17 = vcombine.high %v1089_v12, %v1093_v13  ;;  %v953_v18 = vld [vmem:[%s7360_s1 + $0x348] sm:$0xff]  ;;  %v6155_v23 = vcombine.low %v1089_v12, %v1093_v13 }
 0x1f8   : > { %v957_v19 = vld [vmem:[%s7360_s1 + $0x368] sm:$0xff] }
 0x1f9   : > { %v1081_v20 = vld [vmem:[%s7360_s1 + $0x748] sm:$0xff]  ;;  %v6020_v24 = vcombine.high %v953_v18, %v957_v19  ;;  %v6019_v30 = vcombine.low %v953_v18, %v957_v19 }
 0x1fa   : > { %4179 = vmatpush1.bf16.msra.mxu0 %v5955_v26  ;;  %4222 = vmatpush1.bf16.msra.mxu1 %v6083_v27  ;;  %v1085_v21 = vld [vmem:[%s7360_s1 + $0x768] sm:$0xff] }
 0x1fb   : > { %4180 = vmatprep.subr.bf16.mxu0 %v5948_v28  ;;  %4223 = vmatprep.subr.bf16.mxu1 %v6076_v29  ;;  %v6148_v25 = vcombine.high %v1081_v20, %v1085_v21  ;;  %v945_v26 = vld [vmem:[%s7360_s1 + $0x308] sm:$0xff]  ;;  %v6147_v31 = vcombine.low %v1081_v20, %v1085_v21 }
 0x1fc   : > { %v949_v27 = vld [vmem:[%s7360_s1 + $0x328] sm:$0xff] }
 0x1fd   : > { %v1073_v28 = vld [vmem:[%s7360_s1 + $0x708] sm:$0xff]  ;;  %v6012_v32 = vcombine.high %v945_v26, %v949_v27  ;;  %v6011_v37 = vcombine.low %v945_v26, %v949_v27 }
 0x1fe   : > { %4181 = vmatpush1.bf16.msra.mxu0 %v5947_v38  ;;  %4224 = vmatpush1.bf16.msra.mxu1 %v6075_v34  ;;  %v1077_v29 = vld [vmem:[%s7360_s1 + $0x728] sm:$0xff] }
 0x1ff   : > { %4182 = vmatprep.subr.bf16.mxu0 %v5940_v35  ;;  %4225 = vmatprep.subr.bf16.mxu1 %v6068_v36  ;;  %v6140_v33 = vcombine.high %v1073_v28, %v1077_v29  ;;  %v937_v38 = vld [vmem:[%s7360_s1 + $0x2c8] sm:$0xff]  ;;  %v6139_v41 = vcombine.low %v1073_v28, %v1077_v29 }
 0x200   : > { %v941_v34 = vld [vmem:[%s7360_s1 + $0x2e8] sm:$0xff] }
 0x201   : > { %v1065_v35 = vld [vmem:[%s7360_s1 + $0x6c8] sm:$0xff]  ;;  %v6004_v42 = vcombine.high %v937_v38, %v941_v34  ;;  %v6003_v49 = vcombine.low %v937_v38, %v941_v34 }
 0x202   : > { %4183 = vmatpush1.bf16.msra.mxu0 %v5939_v45  ;;  %4226 = vmatpush1.bf16.msra.mxu1 %v6067_v46  ;;  %v1069_v36 = vld [vmem:[%s7360_s1 + $0x6e8] sm:$0xff] }
 0x203   : > { %4184 = vmatprep.subr.bf16.mxu0 %v5932_v47  ;;  %4227 = vmatprep.subr.bf16.mxu1 %v6060_v48  ;;  %v6132_v44 = vcombine.high %v1065_v35, %v1069_v36  ;;  %v929_v45 = vld [vmem:[%s7360_s1 + $0x288] sm:$0xff]  ;;  %v6131_v50 = vcombine.low %v1065_v35, %v1069_v36 }
 0x204   : > { %v933_v46 = vld [vmem:[%s7360_s1 + $0x2a8] sm:$0xff] }
 0x205   : > { %v1057_v47 = vld [vmem:[%s7360_s1 + $0x688] sm:$0xff]  ;;  %v5996_v51 = vcombine.high %v929_v45, %v933_v46  ;;  %v5995_v57 = vcombine.low %v929_v45, %v933_v46 }
 0x206   : > { %4185 = vmatpush1.bf16.msra.mxu0 %v5931_v53  ;;  %4228 = vmatpush1.bf16.msra.mxu1 %v6059_v54  ;;  %v1061_v48 = vld [vmem:[%s7360_s1 + $0x6a8] sm:$0xff] }
 0x207   : > { %4186 = vmatprep.subr.bf16.mxu0 %v5924_v55  ;;  %4229 = vmatprep.subr.bf16.mxu1 %v6052_v56  ;;  %v6124_v52 = vcombine.high %v1057_v47, %v1061_v48  ;;  %v921_v53 = vld [vmem:[%s7360_s1 + $0x248] sm:$0xff]  ;;  %v6123_v58 = vcombine.low %v1057_v47, %v1061_v48 }
 0x208   : > { %v925_v54 = vld [vmem:[%s7360_s1 + $0x268] sm:$0xff] }
 0x209   : > { %v1049_v55 = vld [vmem:[%s7360_s1 + $0x648] sm:$0xff]  ;;  %v5988_v59 = vcombine.high %v921_v53, %v925_v54  ;;  %v5987_v2 = vcombine.low %v921_v53, %v925_v54 }
 0x20a   : > { %4187 = vmatpush1.bf16.msra.mxu0 %v5923_v61  ;;  %4230 = vmatpush1.bf16.msra.mxu1 %v6051_v62  ;;  %v1053_v56 = vld [vmem:[%s7360_s1 + $0x668] sm:$0xff] }
 0x20b   : > { %4188 = vmatprep.subr.bf16.mxu0 %v5916_v63  ;;  %4231 = vmatprep.subr.bf16.mxu1 %v6044_v0  ;;  %v6116_v60 = vcombine.high %v1049_v55, %v1053_v56  ;;  %v913_v61 = vld [vmem:[%s7360_s1 + $0x208] sm:$0xff]  ;;  %v6115_v3 = vcombine.low %v1049_v55, %v1053_v56 }
 0x20c   : > { %v917_v62 = vld [vmem:[%s7360_s1 + $0x228] sm:$0xff] }
 0x20d   : > { %v1041_v63 = vld [vmem:[%s7360_s1 + $0x608] sm:$0xff]  ;;  %v5980_v5 = vcombine.high %v913_v61, %v917_v62  ;;  %v5979_v39 = vcombine.low %v913_v61, %v917_v62 }
 0x20e   : > { %4189 = vmatpush1.bf16.msra.mxu0 %v5915_v7  ;;  %4232 = vmatpush1.bf16.msra.mxu1 %v6043_v8  ;;  %v1045_v0 = vld [vmem:[%s7360_s1 + $0x628] sm:$0xff] }
 0x20f   : > { %4190 = vmatprep.subr.bf16.mxu0 %v6036_v10  ;;  %4233 = vmatprep.subr.bf16.mxu1 %v6164_v11  ;;  %v6108_v6 = vcombine.high %v1041_v63, %v1045_v0  ;;  %v1161_v7 = vld [vmem:[%s7360_s1 + $0x9c8] sm:$0xff]  ;;  %v6107_v40 = vcombine.low %v1041_v63, %v1045_v0 }
 0x210   : > { %v1165_v8 = vld [vmem:[%s7360_s1 + $0x9e8] sm:$0xff] }
 0x211   : > { %v1289_v10 = vld [vmem:[%s7360_s1 + $0xdc8] sm:$0xff]  ;;  %v6228_v12 = vcombine.high %v1161_v7, %v1165_v8  ;;  %v6227_v18 = vcombine.low %v1161_v7, %v1165_v8 }
 0x212   : > { %4191 = vmatpush2.bf16.msra.mxu0 %v6035_v14  ;;  %4234 = vmatpush2.bf16.msra.mxu1 %v6163_v15  ;;  %v1293_v11 = vld [vmem:[%s7360_s1 + $0xde8] sm:$0xff] }
 0x213   : > { %4192 = vmatprep.subr.bf16.mxu0 %v6028_v16  ;;  %4235 = vmatprep.subr.bf16.mxu1 %v6156_v17  ;;  %v6356_v13 = vcombine.high %v1289_v10, %v1293_v11  ;;  %v1153_v14 = vld [vmem:[%s7360_s1 + $0x988] sm:$0xff]  ;;  %v6355_v19 = vcombine.low %v1289_v10, %v1293_v11 }
 0x214   : > { %v1157_v15 = vld [vmem:[%s7360_s1 + $0x9a8] sm:$0xff] }
 0x215   : > { %v1281_v16 = vld [vmem:[%s7360_s1 + $0xd88] sm:$0xff]  ;;  %v6220_v20 = vcombine.high %v1153_v14, %v1157_v15  ;;  %v6219_v27 = vcombine.low %v1153_v14, %v1157_v15 }
 0x216   : > { %4193 = vmatpush2.bf16.msra.mxu0 %v6027_v22  ;;  %4236 = vmatpush2.bf16.msra.mxu1 %v6155_v23  ;;  %v1285_v17 = vld [vmem:[%s7360_s1 + $0xda8] sm:$0xff] }
 0x217   : > { %4194 = vmatprep.subr.bf16.mxu0 %v6020_v24  ;;  %4237 = vmatprep.subr.bf16.mxu1 %v6148_v25  ;;  %v6348_v21 = vcombine.high %v1281_v16, %v1285_v17  ;;  %v1145_v22 = vld [vmem:[%s7360_s1 + $0x948] sm:$0xff]  ;;  %v6347_v28 = vcombine.low %v1281_v16, %v1285_v17 }
 0x218   : > { %v1149_v23 = vld [vmem:[%s7360_s1 + $0x968] sm:$0xff] }
 0x219   : > { %v7609_v24 = vld [vmem:[#allocation2 + $0x30] ss:$-40 sps:$4 sm:$0xff]   ;;  %v6212_v29 = vcombine.high %v1145_v22, %v1149_v23  ;;  %v7622_v35 = vld [vmem:[#allocation2 + $0x14] ss:$40 sps:$4 sm:$0xff]   ;;  %v6211_v36 = vcombine.low %v1145_v22, %v1149_v23 }
 0x21a   : > { %4195 = vmatpush2.bf16.msra.mxu0 %v6019_v30  ;;  %4238 = vmatpush2.bf16.msra.mxu1 %v6147_v31  ;;  %v1273_v25 = vld [vmem:[%s7360_s1 + $0xd48] sm:$0xff] }
 0x21b   : > { %4196 = vmatprep.subr.bf16.mxu0 %v6012_v32  ;;  %4239 = vmatprep.subr.bf16.mxu1 %v6140_v33  ;;  %v1277_v26 = vld [vmem:[%s7360_s1 + $0xd68] sm:$0xff]  ;;  %v7617_v33 = vld [vmem:[#allocation2 + $0x1c] ss:$16 sps:$4 sm:$0xff]  }
 0x21c   : > { %v6340_v30 = vcombine.high %v1273_v25, %v1277_v26  ;;  %v1137_v31 = vld [vmem:[%s7360_s1 + $0x908] sm:$0xff] }
 0x21d   : > { %v1141_v32 = vld [vmem:[%s7360_s1 + $0x928] sm:$0xff] }
 0x21e   : > { %4197 = vmatpush2.bf16.msra.mxu0 %v6011_v37  ;;  %4240 = vmatpush2.bf16.msra.mxu1 %v6139_v41  ;;  %v1265_v38 = vld [vmem:[%s7360_s1 + $0xd08] sm:$0xff]  ;;  %v6339_v37 = vcombine.low %v1273_v25, %v1277_v26  ;;  %v6204_v41 = vcombine.high %v1137_v31, %v1141_v32  ;;  %v6203_v48 = vcombine.low %v1137_v31, %v1141_v32 }
 0x21f   : > { %4198 = vmatprep.subr.bf16.mxu0 %v6004_v42  ;;  %4241 = vmatprep.subr.bf16.mxu1 %v6132_v44  ;;  %v1269_v34 = vld [vmem:[%s7360_s1 + $0xd28] sm:$0xff] }
 0x220   : > { %v6332_v42 = vcombine.high %v1265_v38, %v1269_v34  ;;  %v1129_v44 = vld [vmem:[%s7360_s1 + $0x8c8] sm:$0xff] }
 0x221   : > { %v1133_v45 = vld [vmem:[%s7360_s1 + $0x8e8] sm:$0xff] }
 0x222   : > { %4199 = vmatpush2.bf16.msra.mxu0 %v6003_v49  ;;  %4242 = vmatpush2.bf16.msra.mxu1 %v6131_v50  ;;  %v1257_v46 = vld [vmem:[%s7360_s1 + $0xcc8] sm:$0xff]  ;;  %v6331_v49 = vcombine.low %v1265_v38, %v1269_v34  ;;  %v6196_v50 = vcombine.high %v1129_v44, %v1133_v45  ;;  %v6195_v56 = vcombine.low %v1129_v44, %v1133_v45 }
 0x223   : > { %4200 = vmatprep.subr.bf16.mxu0 %v5996_v51  ;;  %4243 = vmatprep.subr.bf16.mxu1 %v6124_v52  ;;  %v1261_v47 = vld [vmem:[%s7360_s1 + $0xce8] sm:$0xff] }
 0x224   : > { %v6324_v51 = vcombine.high %v1257_v46, %v1261_v47  ;;  %v1121_v52 = vld [vmem:[%s7360_s1 + $0x888] sm:$0xff] }
 0x225   : > { %v1125_v53 = vld [vmem:[%s7360_s1 + $0x8a8] sm:$0xff] }
 0x226   : > { %4201 = vmatpush2.bf16.msra.mxu0 %v5995_v57  ;;  %4244 = vmatpush2.bf16.msra.mxu1 %v6123_v58  ;;  %v1249_v54 = vld [vmem:[%s7360_s1 + $0xc88] sm:$0xff]  ;;  %v6323_v57 = vcombine.low %v1257_v46, %v1261_v47  ;;  %v6188_v58 = vcombine.high %v1121_v52, %v1125_v53  ;;  %v6187_v0 = vcombine.low %v1121_v52, %v1125_v53 }
 0x227   : > { %4202 = vmatprep.subr.bf16.mxu0 %v5988_v59  ;;  %4245 = vmatprep.subr.bf16.mxu1 %v6116_v60  ;;  %v1253_v55 = vld [vmem:[%s7360_s1 + $0xca8] sm:$0xff] }
 0x228   : > { %v6316_v59 = vcombine.high %v1249_v54, %v1253_v55  ;;  %v1113_v60 = vld [vmem:[%s7360_s1 + $0x848] sm:$0xff] }
 0x229   : > { %v1117_v61 = vld [vmem:[%s7360_s1 + $0x868] sm:$0xff] }
 0x22a   : > { %4203 = vmatpush2.bf16.msra.mxu0 %v5987_v2  ;;  %4246 = vmatpush2.bf16.msra.mxu1 %v6115_v3  ;;  %v1241_v62 = vld [vmem:[%s7360_s1 + $0xc48] sm:$0xff]  ;;  %v6315_v2 = vcombine.low %v1249_v54, %v1253_v55  ;;  %v6180_v3 = vcombine.high %v1113_v60, %v1117_v61  ;;  %v6179_v11 = vcombine.low %v1113_v60, %v1117_v61 }
 0x22b   : > { %4204 = vmatprep.subr.bf16.mxu0 %v5980_v5  ;;  %4247 = vmatprep.subr.bf16.mxu1 %v6108_v6  ;;  %v1245_v63 = vld [vmem:[%s7360_s1 + $0xc68] sm:$0xff] }
 0x22c   : > { %v6308_v5 = vcombine.high %v1241_v62, %v1245_v63  ;;  %v1105_v6 = vld [vmem:[%s7360_s1 + $0x808] sm:$0xff] }
 0x22d   : > { %v1109_v7 = vld [vmem:[%s7360_s1 + $0x828] sm:$0xff] }
 0x22e   : > { %4205 = vmatpush2.bf16.msra.mxu0 %v5979_v39  ;;  %4248 = vmatpush2.bf16.msra.mxu1 %v6107_v40  ;;  %v1233_v8 = vld [vmem:[%s7360_s1 + $0xc08] sm:$0xff]  ;;  %v6307_v39 = vcombine.low %v1241_v62, %v1245_v63  ;;  %v6172_v40 = vcombine.high %v1105_v6, %v1109_v7  ;;  %v6171_v17 = vcombine.low %v1105_v6, %v1109_v7 }
 0x22f   : > { %4260 = vmatprep.subr.bf16.mxu0 %v6228_v12  ;;  %4303 = vmatprep.subr.bf16.mxu1 %v6356_v13  ;;  %v1237_v10 = vld [vmem:[%s7360_s1 + $0xc28] sm:$0xff] }
 0x230   : > { %v6300_v12 = vcombine.high %v1233_v8, %v1237_v10  ;;  %v1225_v13 = vld [vmem:[%s7360_s1 + $0xbc8] sm:$0xff] }
 0x231   : > { %4207 = vmatmul.mubr.bf16.vlgmr.msra.gmra.mxu0 %v7609_v24  ;;  %4250 = vmatmul.mubr.bf16.vlgmr.msra.gmra.mxu1 %v7468_v1  ;;  %v1229_v14 = vld [vmem:[%s7360_s1 + $0xbe8] sm:$0xff] }
 0x232   : > { %4261 = vmatpush1.bf16.msra.mxu0 %v6227_v18  ;;  %4304 = vmatpush1.bf16.msra.mxu1 %v6355_v19  ;;  %v1353_v15 = vld [vmem:[%s7360_s1 + $0xfc8] sm:$0xff]  ;;  %v6299_v18 = vcombine.low %v1233_v8, %v1237_v10  ;;  %v6292_v19 = vcombine.high %v1225_v13, %v1229_v14  ;;  %v6291_v26 = vcombine.low %v1225_v13, %v1229_v14 }
 0x233   : > { %4262 = vmatprep.subr.bf16.mxu0 %v6220_v20  ;;  %4305 = vmatprep.subr.bf16.mxu1 %v6348_v21  ;;  %v1357_v16 = vld [vmem:[%s7360_s1 + $0xfe8] sm:$0xff] }
 0x234   : > { %4292 = vmatprep.mubr.bf16.mxu0 %v7617_v33  ;;  %4335 = vmatprep.mubr.bf16.mxu1 %v7622_v35  ;;  %v6420_v20 = vcombine.high %v1353_v15, %v1357_v16  ;;  %v1217_v21 = vld [vmem:[%s7360_s1 + $0xb88] sm:$0xff] }
 0x235   : > { %v1221_v22 = vld [vmem:[%s7360_s1 + $0xba8] sm:$0xff] }
 0x236   : > { %4263 = vmatpush1.bf16.msra.mxu0 %v6219_v27  ;;  %4306 = vmatpush1.bf16.msra.mxu1 %v6347_v28  ;;  %v1345_v23 = vld [vmem:[%s7360_s1 + $0xf88] sm:$0xff]  ;;  %v6419_v27 = vcombine.low %v1353_v15, %v1357_v16  ;;  %v6284_v28 = vcombine.high %v1217_v21, %v1221_v22  ;;  %v6283_v34 = vcombine.low %v1217_v21, %v1221_v22  ;;  %v906_v22 = vld [vmem:[%s7360_s1 + $0x1d0] sm:$0xff] }
 0x237   : > { %4264 = vmatprep.subr.bf16.mxu0 %v6212_v29  ;;  %4307 = vmatprep.subr.bf16.mxu1 %v6340_v30  ;;  %v1349_v25 = vld [vmem:[%s7360_s1 + $0xfa8] sm:$0xff] }
 0x238   : > { %v6412_v29 = vcombine.high %v1345_v23, %v1349_v25  ;;  %v1209_v30 = vld [vmem:[%s7360_s1 + $0xb48] sm:$0xff] }
 0x239   : > { %v1213_v31 = vld [vmem:[%s7360_s1 + $0xb68] sm:$0xff] }
 0x23a   : > { %4265 = vmatpush1.bf16.msra.mxu0 %v6211_v36  ;;  %4308 = vmatpush1.bf16.msra.mxu1 %v6339_v37  ;;  %v1337_v32 = vld [vmem:[%s7360_s1 + $0xf48] sm:$0xff]  ;;  %v6411_v36 = vcombine.low %v1345_v23, %v1349_v25  ;;  %v6276_v37 = vcombine.high %v1209_v30, %v1213_v31  ;;  %v6275_v47 = vcombine.low %v1209_v30, %v1213_v31  ;;  %v910_v23 = vld [vmem:[%s7360_s1 + $0x1f0] sm:$0xff] }
 0x23b   : > { %4266 = vmatprep.subr.bf16.mxu0 %v6204_v41  ;;  %4309 = vmatprep.subr.bf16.mxu1 %v6332_v42  ;;  %v1341_v38 = vld [vmem:[%s7360_s1 + $0xf68] sm:$0xff]  ;;  %v1034_v25 = vld [vmem:[%s7360_s1 + $0x5d0] sm:$0xff]  ;;  %v5974_v31 = vcombine.high %v906_v22, %v910_v23 }
 0x23c   : > { %v6404_v41 = vcombine.high %v1337_v32, %v1341_v38  ;;  %v1201_v42 = vld [vmem:[%s7360_s1 + $0xb08] sm:$0xff] }
 0x23d   : > { %v1205_v44 = vld [vmem:[%s7360_s1 + $0xb28] sm:$0xff] }
 0x23e   : > { %4267 = vmatpush1.bf16.msra.mxu0 %v6203_v48  ;;  %4310 = vmatpush1.bf16.msra.mxu1 %v6331_v49  ;;  %v1329_v45 = vld [vmem:[%s7360_s1 + $0xf08] sm:$0xff]  ;;  %v6403_v48 = vcombine.low %v1337_v32, %v1341_v38  ;;  %v6268_v49 = vcombine.high %v1201_v42, %v1205_v44  ;;  %v6267_v55 = vcombine.low %v1201_v42, %v1205_v44  ;;  %v898_v38 = vld [vmem:[%s7360_s1 + $0x190] sm:$0xff] }
 0x23f   : > { %4268 = vmatprep.subr.bf16.mxu0 %v6196_v50  ;;  %4311 = vmatprep.subr.bf16.mxu1 %v6324_v51  ;;  %v1333_v46 = vld [vmem:[%s7360_s1 + $0xf28] sm:$0xff]  ;;  %v5973_v42 = vcombine.low %v906_v22, %v910_v23 }
 0x240   : > { %v6396_v50 = vcombine.high %v1329_v45, %v1333_v46  ;;  %v1193_v51 = vld [vmem:[%s7360_s1 + $0xac8] sm:$0xff] }
 0x241   : > { %v1197_v52 = vld [vmem:[%s7360_s1 + $0xae8] sm:$0xff] }
 0x242   : > { %4269 = vmatpush1.bf16.msra.mxu0 %v6195_v56  ;;  %4312 = vmatpush1.bf16.msra.mxu1 %v6323_v57  ;;  %v1321_v53 = vld [vmem:[%s7360_s1 + $0xec8] sm:$0xff]  ;;  %v6395_v56 = vcombine.low %v1329_v45, %v1333_v46  ;;  %v6260_v57 = vcombine.high %v1193_v51, %v1197_v52  ;;  %v6259_v63 = vcombine.low %v1193_v51, %v1197_v52  ;;  %v1022_v51 = vld [vmem:[%s7360_s1 + $0x570] sm:$0xff] }
 0x243   : > { %4270 = vmatprep.subr.bf16.mxu0 %v6188_v58  ;;  %4313 = vmatprep.subr.bf16.mxu1 %v6316_v59  ;;  %v1325_v54 = vld [vmem:[%s7360_s1 + $0xee8] sm:$0xff] }
 0x244   : > { %v6388_v58 = vcombine.high %v1321_v53, %v1325_v54  ;;  %v1185_v59 = vld [vmem:[%s7360_s1 + $0xa88] sm:$0xff] }
 0x245   : > { %v1189_v60 = vld [vmem:[%s7360_s1 + $0xaa8] sm:$0xff] }
 0x246   : > { %4271 = vmatpush1.bf16.msra.mxu0 %v6187_v0  ;;  %4314 = vmatpush1.bf16.msra.mxu1 %v6315_v2  ;;  %v1313_v61 = vld [vmem:[%s7360_s1 + $0xe88] sm:$0xff]  ;;  %v6387_v0 = vcombine.low %v1321_v53, %v1325_v54  ;;  %v6252_v2 = vcombine.high %v1185_v59, %v1189_v60  ;;  %v6251_v10 = vcombine.low %v1185_v59, %v1189_v60  ;;  %v882_v60 = vld [vmem:[%s7360_s1 + $0x110] sm:$0xff] }
 0x247   : > { %4272 = vmatprep.subr.bf16.mxu0 %v6180_v3  ;;  %4315 = vmatprep.subr.bf16.mxu1 %v6308_v5  ;;  %v1317_v62 = vld [vmem:[%s7360_s1 + $0xea8] sm:$0xff] }
 0x248   : > { %v6380_v3 = vcombine.high %v1313_v61, %v1317_v62  ;;  %v1177_v5 = vld [vmem:[%s7360_s1 + $0xa48] sm:$0xff] }
 0x249   : > { %v1181_v6 = vld [vmem:[%s7360_s1 + $0xa68] sm:$0xff] }
 0x24a   : > { %4273 = vmatpush1.bf16.msra.mxu0 %v6179_v11  ;;  %4316 = vmatpush1.bf16.msra.mxu1 %v6307_v39  ;;  %v1305_v7 = vld [vmem:[%s7360_s1 + $0xe48] sm:$0xff]  ;;  %v1362_v11 = vlaneseq  ;;  %v6379_v39 = vcombine.low %v1313_v61, %v1317_v62  ;;  %v886_v61 = vld [vmem:[%s7360_s1 + $0x130] sm:$0xff] }
 0x24b   : > { %4274 = vmatprep.subr.bf16.mxu0 %v6172_v40  ;;  %4317 = vmatprep.subr.bf16.mxu1 %v6300_v12  ;;  %v1309_v8 = vld [vmem:[%s7360_s1 + $0xe68] sm:$0xff]  ;;  %v6244_v40 = vcombine.high %v1177_v5, %v1181_v6 }
 0x24c   : > { %v6372_v12 = vcombine.high %v1305_v7, %v1309_v8  ;;  %v1169_v13 = vld [vmem:[%s7360_s1 + $0xa08] sm:$0xff] }
 0x24d   : > { %v1173_v14 = vld [vmem:[%s7360_s1 + $0xa28] sm:$0xff] }
 0x24e   : > { %4275 = vmatpush1.bf16.msra.mxu0 %v6171_v17  ;;  %4318 = vmatpush1.bf16.msra.mxu1 %v6299_v18  ;;  %v1297_v15 = vld [vmem:[%s7360_s1 + $0xe08] sm:$0xff]  ;;  %v6243_v17 = vcombine.low %v1177_v5, %v1181_v6  ;;  %v7673_v18 = vshrl.u32 %v1362_v11, 7  ;;  %v874_v11 = vld [vmem:[%s7360_s1 + $0xd0] sm:$0xff] }
 0x24f   : > { %4276 = vmatprep.subr.bf16.mxu0 %v6292_v19  ;;  %4319 = vmatprep.subr.bf16.mxu1 %v6420_v20  ;;  %v1301_v16 = vld [vmem:[%s7360_s1 + $0xe28] sm:$0xff]  ;;  %v6371_v19 = vcombine.low %v1305_v7, %v1309_v8  ;;  %v6236_v20 = vcombine.high %v1169_v13, %v1173_v14  ;;  %v5950_v7 = vcombine.high %v882_v60, %v886_v61 }
 0x250   : > { %v6364_v21 = vcombine.high %v1297_v15, %v1301_v16  ;;  %v7681_v30 = vld [vmem:[%s7366_s22] sm:$0xff] }
 0x251   : > { %v7704_v62 = vld [vmem:[#allocation2 + $0x34] ss:$-40 sps:$4 sm:$0xff]  }
 0x252   : > { %4277 = vmatpush2.bf16.msra.mxu0 %v6291_v26  ;;  %4320 = vmatpush2.bf16.msra.mxu1 %v6419_v27  ;;  %v1038_v26 = vld [vmem:[%s7360_s1 + $0x5f0] sm:$0xff]  ;;  %v6235_v27 = vcombine.low %v1169_v13, %v1173_v14  ;;  %v5949_v13 = vcombine.low %v882_v60, %v886_v61 }
 0x253   : > { %4278 = vmatprep.subr.bf16.mxu0 %v6284_v28  ;;  %4321 = vmatprep.subr.bf16.mxu1 %v6412_v29  ;;  %v1364_v28 = vsub.s32 0, %v7673_v18  ;;  %v6363_v29 = vcombine.low %v1297_v15, %v1301_v16  ;;  %v6102_v32 = vcombine.high %v1034_v25, %v1038_v26  ;;  %v6101_v44 = vcombine.low %v1034_v25, %v1038_v26  ;;  %v962_v60 = vld [vmem:[%s7360_s1 + $0x390] sm:$0xff] }
 0x254   : > { %v966_v61 = vld [vmem:[%s7360_s1 + $0x3b0] sm:$0xff] }
 0x256   : > { %4279 = vmatpush2.bf16.msra.mxu0 %v6283_v34  ;;  %4322 = vmatpush2.bf16.msra.mxu1 %v6411_v36  ;;  %v902_v34 = vld [vmem:[%s7360_s1 + $0x1b0] sm:$0xff] }
 0x257   : > { %4280 = vmatprep.subr.bf16.mxu0 %v6276_v37  ;;  %4323 = vmatprep.subr.bf16.mxu1 %v6404_v41  ;;  %v1026_v36 = vld [vmem:[%s7360_s1 + $0x590] sm:$0xff]  ;;  %v1365_v41 = vrot.slane %v7681_v30, %v1364_v28  ;;  %v5966_v45 = vcombine.high %v898_v38, %v902_v34  ;;  %v5965_v54 = vcombine.low %v898_v38, %v902_v34 }
 0x258   : > { %v1030_v37 = vld [vmem:[%s7360_s1 + $0x5b0] sm:$0xff] }
 0x259   : > { %v6094_v46 = vcombine.high %v1026_v36, %v1030_v37 }
 0x25a   : > { %4281 = vmatpush2.bf16.msra.mxu0 %v6275_v47  ;;  %4324 = vmatpush2.bf16.msra.mxu1 %v6403_v48  ;;  %v890_v47 = vld [vmem:[%s7360_s1 + $0x150] sm:$0xff] }
 0x25b   : > { %4282 = vmatprep.subr.bf16.mxu0 %v6268_v49  ;;  %4325 = vmatprep.subr.bf16.mxu1 %v6396_v50  ;;  %v894_v48 = vld [vmem:[%s7360_s1 + $0x170] sm:$0xff] }
 0x25c   : > { %v1018_v50 = vld [vmem:[%s7360_s1 + $0x550] sm:$0xff] }
 0x25d   : > { %v6086_v59 = vcombine.high %v1018_v50, %v1022_v51  ;;  %v6085_v6 = vcombine.low %v1018_v50, %v1022_v51  ;;  %v970_v50 = vld [vmem:[%s7360_s1 + $0x3d0] sm:$0xff] }
 0x25e   : > { %4283 = vmatpush2.bf16.msra.mxu0 %v6267_v55  ;;  %4326 = vmatpush2.bf16.msra.mxu1 %v6395_v56  ;;  %v6093_v56 = vcombine.low %v1026_v36, %v1030_v37  ;;  %v974_v51 = vld [vmem:[%s7360_s1 + $0x3f0] sm:$0xff] }
 0x25f   : > { %4284 = vmatprep.subr.bf16.mxu0 %v6260_v57  ;;  %4327 = vmatprep.subr.bf16.mxu1 %v6388_v58  ;;  %v5958_v57 = vcombine.high %v890_v47, %v894_v48 }
 0x262   : > { %4285 = vmatpush2.bf16.msra.mxu0 %v6259_v63  ;;  %4328 = vmatpush2.bf16.msra.mxu1 %v6387_v0  ;;  %v1010_v63 = vld [vmem:[%s7360_s1 + $0x510] sm:$0xff] }
 0x263   : > { %4286 = vmatprep.subr.bf16.mxu0 %v6252_v2  ;;  %4329 = vmatprep.subr.bf16.mxu1 %v6380_v3  ;;  %v1014_v0 = vld [vmem:[%s7360_s1 + $0x530] sm:$0xff]  ;;  %v5957_v3 = vcombine.low %v890_v47, %v894_v48 }
 0x264   : > { %v6077_v14 = vcombine.low %v1010_v63, %v1014_v0 }
 0x266   : > { %4287 = vmatpush2.bf16.msra.mxu0 %v6251_v10  ;;  %4330 = vmatpush2.bf16.msra.mxu1 %v6379_v39  ;;  %v6078_v10 = vcombine.high %v1010_v63, %v1014_v0  ;;  %v878_v39 = vld [vmem:[%s7360_s1 + $0xf0] sm:$0xff]  ;;  %v6037_v0 = vcombine.low %v970_v50, %v974_v51 }
 0x267   : > { %4288 = vmatprep.subr.bf16.mxu0 %v6244_v40  ;;  %4331 = vmatprep.subr.bf16.mxu1 %v6372_v12  ;;  %v1002_v40 = vld [vmem:[%s7360_s1 + $0x4d0] sm:$0xff]  ;;  %v5942_v15 = vcombine.high %v874_v11, %v878_v39  ;;  %v5941_v22 = vcombine.low %v874_v11, %v878_v39  ;;  %v6029_v39 = vcombine.low %v962_v60, %v966_v61 }
 0x268   : > { %v1006_v12 = vld [vmem:[%s7360_s1 + $0x4f0] sm:$0xff] }
 0x269   : > { %v6070_v16 = vcombine.high %v1002_v40, %v1006_v12  ;;  %v6069_v23 = vcombine.low %v1002_v40, %v1006_v12  ;;  %v1094_v63 = vld [vmem:[%s7360_s1 + $0x7b0] sm:$0xff] }
 0x26a   : > { %4289 = vmatpush2.bf16.msra.mxu0 %v6243_v17  ;;  %4332 = vmatpush2.bf16.msra.mxu1 %v6371_v19  ;;  %v866_v17 = vld [vmem:[%s7360_s1 + $0x90] sm:$0xff] }
 0x26b   : > { %4290 = vmatprep.subr.bf16.mxu0 %v6236_v20  ;;  %4333 = vmatprep.subr.bf16.mxu1 %v6364_v21  ;;  %v870_v19 = vld [vmem:[%s7360_s1 + $0xb0] sm:$0xff] }
 0x26c   : > { %v994_v20 = vld [vmem:[%s7360_s1 + $0x490] sm:$0xff]  ;;  %v5934_v25 = vcombine.high %v866_v17, %v870_v19  ;;  %v5933_v38 = vcombine.low %v866_v17, %v870_v19 }
 0x26d   : > { %v998_v21 = vld [vmem:[%s7360_s1 + $0x4b0] sm:$0xff] }
 0x26e   : > { %4291 = vmatpush2.bf16.msra.mxu0 %v6235_v27  ;;  %4334 = vmatpush2.bf16.msra.mxu1 %v6363_v29  ;;  %v6062_v26 = vcombine.high %v994_v20, %v998_v21  ;;  %v858_v27 = vld [vmem:[%s7360_s1 + $0x50] sm:$0xff]  ;;  %v6061_v34 = vcombine.low %v994_v20, %v998_v21 }
 0x26f   : > { %4346 = vmatprep.subr.bf16.mxu0 %v5974_v31  ;;  %4389 = vmatprep.subr.bf16.mxu1 %v6102_v32  ;;  %v862_v29 = vld [vmem:[%s7360_s1 + $0x70] sm:$0xff] }
 0x270   : > { %v4079_v53 = vpop.f32.mrf.mxu1  ;;  %v986_v31 = vld [vmem:[%s7360_s1 + $0x450] sm:$0xff]  ;;  %v5926_v36 = vcombine.high %v858_v27, %v862_v29 }
 0x271   : > { %v4036_v49 = vpop.f32.mrf.mxu0  ;;  %4293 = vmatmul.mubr.bf16.vlgmr.msra.gmra.mxu0 %v7531_v4  ;;  %4336 = vmatmul.mubr.bf16.vlgmr.msra.gmra.mxu1 %v7536_v9  ;;  %v990_v32 = vld [vmem:[%s7360_s1 + $0x470] sm:$0xff] }
 0x272   : > { %v4037_v52 = vadd.f32 %v4036_v49, %v1365_v41  ;;  %4347 = vmatpush1.bf16.msra.mxu0 %v5973_v42  ;;  %4390 = vmatpush1.bf16.msra.mxu1 %v6101_v44  ;;  %v7700_v4 = vpop.f32.mrf.mxu1  ;;  %v6054_v37 = vcombine.high %v986_v31, %v990_v32  ;;  %v854_v42 = vld [vmem:[%s7360_s1 + $0x30] sm:$0xff]  ;;  %v6053_v47 = vcombine.low %v986_v31, %v990_v32 }
 0x273   : > { %v7696_v55 = vpop.f32.mrf.mxu0  ;;  %4348 = vmatprep.subr.bf16.mxu0 %v5966_v45  ;;  %4391 = vmatprep.subr.bf16.mxu1 %v6094_v46  ;;  %v978_v44 = vld [vmem:[%s7360_s1 + $0x410] sm:$0xff]  ;;  %v5925_v46 = vcombine.low %v858_v27, %v862_v29 }
 0x274   : > { %v7698_v58 = vadd.f32 %v4079_v53, %v4037_v52  ;;  %4378 = vmatprep.mubr.bf16.mxu0 %v7704_v62  ;;  %4421 = vmatprep.mubr.bf16.mxu1 %v7422_v43  ;;  %v4083_v5 = vpop.f32.mrf.mxu1  ;;  %v982_v45 = vld [vmem:[%s7360_s1 + $0x430] sm:$0xff] }
 0x275   : > { %v4040_v9 = vpop.f32.mrf.mxu0  ;;  %v6046_v49 = vcombine.high %v978_v44, %v982_v45  ;;  %v1098_v52 = vld [vmem:[%s7360_s1 + $0x7d0] sm:$0xff] }
 0x276   : > { %v4041_v2 = vadd.f32 %v4040_v9, %v1365_v41  ;;  %4349 = vmatpush1.bf16.msra.mxu0 %v5965_v54  ;;  %4392 = vmatpush1.bf16.msra.mxu1 %v6093_v56  ;;  %v850_v41 = vld [vmem:[%s7360_s1 + $0x10] sm:$0xff]  ;;  %v6045_v56 = vcombine.low %v978_v44, %v982_v45 }
 0x277   : > { %4350 = vmatprep.subr.bf16.mxu0 %v5958_v57  ;;  %4393 = vmatprep.subr.bf16.mxu1 %v6086_v59  ;;  %v5918_v48 = vcombine.high %v850_v41, %v854_v42  ;;  %v1102_v53 = vld [vmem:[%s7360_s1 + $0x7f0] sm:$0xff]  ;;  %v5917_v54 = vcombine.low %v850_v41, %v854_v42  ;;  %v6038_v57 = vcombine.high %v970_v50, %v974_v51 }
 0x278   : > { %v7710_v8 = vadd.f32 %v4083_v5, %v4041_v2  ;;  %v6166_v59 = vcombine.high %v1098_v52, %v1102_v53  ;;  %v1090_v9 = vld [vmem:[%s7360_s1 + $0x790] sm:$0xff]  ;;  %v6165_v2 = vcombine.low %v1098_v52, %v1102_v53 }
 0x279   : > { %v6158_v5 = vcombine.high %v1090_v9, %v1094_v63  ;;  %v1086_v11 = vld [vmem:[%s7360_s1 + $0x770] sm:$0xff]  ;;  %v6157_v40 = vcombine.low %v1090_v9, %v1094_v63 }
 0x27a   : > { %4351 = vmatpush1.bf16.msra.mxu0 %v5957_v3  ;;  %4394 = vmatpush1.bf16.msra.mxu1 %v6085_v6  ;;  %v6030_v3 = vcombine.high %v962_v60, %v966_v61  ;;  %v954_v6 = vld [vmem:[%s7360_s1 + $0x350] sm:$0xff] }
 0x27b   : > { %4352 = vmatprep.subr.bf16.mxu0 %v5950_v7  ;;  %4395 = vmatprep.subr.bf16.mxu1 %v6078_v10  ;;  %v958_v7 = vld [vmem:[%s7360_s1 + $0x370] sm:$0xff] }
 0x27c   : > { %v1082_v10 = vld [vmem:[%s7360_s1 + $0x750] sm:$0xff]  ;;  %v6022_v12 = vcombine.high %v954_v6, %v958_v7  ;;  %v6021_v19 = vcombine.low %v954_v6, %v958_v7 }
 0x27d   : > { %v1078_v17 = vld [vmem:[%s7360_s1 + $0x730] sm:$0xff]  ;;  %v6149_v20 = vcombine.low %v1082_v10, %v1086_v11 }
 0x27e   : > { %4353 = vmatpush1.bf16.msra.mxu0 %v5949_v13  ;;  %4396 = vmatpush1.bf16.msra.mxu1 %v6077_v14  ;;  %v6150_v13 = vcombine.high %v1082_v10, %v1086_v11  ;;  %v946_v14 = vld [vmem:[%s7360_s1 + $0x310] sm:$0xff] }
 0x27f   : > { %4354 = vmatprep.subr.bf16.mxu0 %v5942_v15  ;;  %4397 = vmatprep.subr.bf16.mxu1 %v6070_v16  ;;  %v950_v15 = vld [vmem:[%s7360_s1 + $0x330] sm:$0xff] }
 0x280   : > { %v1074_v16 = vld [vmem:[%s7360_s1 + $0x710] sm:$0xff]  ;;  %v6014_v21 = vcombine.high %v946_v14, %v950_v15  ;;  %v6013_v29 = vcombine.low %v946_v14, %v950_v15 }
 0x281   : > { %v1070_v27 = vld [vmem:[%s7360_s1 + $0x6f0] sm:$0xff]  ;;  %v6141_v31 = vcombine.low %v1074_v16, %v1078_v17 }
 0x282   : > { %4355 = vmatpush1.bf16.msra.mxu0 %v5941_v22  ;;  %4398 = vmatpush1.bf16.msra.mxu1 %v6069_v23  ;;  %v6142_v22 = vcombine.high %v1074_v16, %v1078_v17  ;;  %v938_v23 = vld [vmem:[%s7360_s1 + $0x2d0] sm:$0xff]  ;;  %v7768_v16 = vpop.f32.mrf.mxu0 }
 0x283   : > { %4356 = vmatprep.subr.bf16.mxu0 %v5934_v25  ;;  %4399 = vmatprep.subr.bf16.mxu1 %v6062_v26  ;;  %v942_v25 = vld [vmem:[%s7360_s1 + $0x2f0] sm:$0xff] }
 0x284   : > { %v1066_v26 = vld [vmem:[%s7360_s1 + $0x6d0] sm:$0xff]  ;;  %v6006_v32 = vcombine.high %v938_v23, %v942_v25  ;;  %v6005_v42 = vcombine.low %v938_v23, %v942_v25 }
 0x285   : > { %v1062_v41 = vld [vmem:[%s7360_s1 + $0x6b0] sm:$0xff]  ;;  %v6133_v44 = vcombine.low %v1066_v26, %v1070_v27 }
 0x286   : > { %4357 = vmatpush1.bf16.msra.mxu0 %v5933_v38  ;;  %4400 = vmatpush1.bf16.msra.mxu1 %v6061_v34  ;;  %v6134_v38 = vcombine.high %v1066_v26, %v1070_v27  ;;  %v930_v34 = vld [vmem:[%s7360_s1 + $0x290] sm:$0xff] }
 0x287   : > { %4358 = vmatprep.subr.bf16.mxu0 %v5926_v36  ;;  %4401 = vmatprep.subr.bf16.mxu1 %v6054_v37  ;;  %v934_v36 = vld [vmem:[%s7360_s1 + $0x2b0] sm:$0xff] }
 0x288   : > { %v1058_v37 = vld [vmem:[%s7360_s1 + $0x690] sm:$0xff]  ;;  %v5998_v45 = vcombine.high %v930_v34, %v934_v36  ;;  %v5997_v51 = vcombine.low %v930_v34, %v934_v36 }
 0x289   : > { %v1054_v50 = vld [vmem:[%s7360_s1 + $0x670] sm:$0xff]  ;;  %v6125_v52 = vcombine.low %v1058_v37, %v1062_v41 }
 0x28a   : > { %4359 = vmatpush1.bf16.msra.mxu0 %v5925_v46  ;;  %4402 = vmatpush1.bf16.msra.mxu1 %v6053_v47  ;;  %v6126_v46 = vcombine.high %v1058_v37, %v1062_v41  ;;  %v922_v47 = vld [vmem:[%s7360_s1 + $0x250] sm:$0xff] }
 0x28b   : > { %4360 = vmatprep.subr.bf16.mxu0 %v5918_v48  ;;  %4403 = vmatprep.subr.bf16.mxu1 %v6046_v49  ;;  %v926_v48 = vld [vmem:[%s7360_s1 + $0x270] sm:$0xff] }
 0x28c   : > { %v1050_v49 = vld [vmem:[%s7360_s1 + $0x650] sm:$0xff]  ;;  %v5990_v53 = vcombine.high %v922_v47, %v926_v48  ;;  %v5989_v61 = vcombine.low %v922_v47, %v926_v48 }
 0x28d   : > { %v1046_v60 = vld [vmem:[%s7360_s1 + $0x630] sm:$0xff]  ;;  %v6117_v9 = vcombine.low %v1050_v49, %v1054_v50 }
 0x28e   : > { %4361 = vmatpush1.bf16.msra.mxu0 %v5917_v54  ;;  %4404 = vmatpush1.bf16.msra.mxu1 %v6045_v56  ;;  %v6118_v54 = vcombine.high %v1050_v49, %v1054_v50  ;;  %v914_v56 = vld [vmem:[%s7360_s1 + $0x210] sm:$0xff] }
 0x28f   : > { %4362 = vmatprep.subr.bf16.mxu0 %v6038_v57  ;;  %4405 = vmatprep.subr.bf16.mxu1 %v6166_v59  ;;  %v918_v57 = vld [vmem:[%s7360_s1 + $0x230] sm:$0xff] }
 0x290   : > { %v1042_v59 = vld [vmem:[%s7360_s1 + $0x610] sm:$0xff]  ;;  %v5982_v63 = vcombine.high %v914_v56, %v918_v57  ;;  %v5981_v7 = vcombine.low %v914_v56, %v918_v57 }
 0x291   : > { %v1294_v6 = vld [vmem:[%s7360_s1 + $0xdf0] sm:$0xff]  ;;  %v6109_v10 = vcombine.low %v1042_v59, %v1046_v60 }
 0x292   : > { %4363 = vmatpush2.bf16.msra.mxu0 %v6037_v0  ;;  %4406 = vmatpush2.bf16.msra.mxu1 %v6165_v2  ;;  %v6110_v0 = vcombine.high %v1042_v59, %v1046_v60  ;;  %v1162_v2 = vld [vmem:[%s7360_s1 + $0x9d0] sm:$0xff] }
 0x293   : > { %4364 = vmatprep.subr.bf16.mxu0 %v6030_v3  ;;  %4407 = vmatprep.subr.bf16.mxu1 %v6158_v5  ;;  %v1166_v3 = vld [vmem:[%s7360_s1 + $0x9f0] sm:$0xff] }
 0x294   : > { %v1290_v5 = vld [vmem:[%s7360_s1 + $0xdd0] sm:$0xff]  ;;  %v6230_v11 = vcombine.high %v1162_v2, %v1166_v3  ;;  %v6229_v15 = vcombine.low %v1162_v2, %v1166_v3 }
 0x295   : > { %v1286_v14 = vld [vmem:[%s7360_s1 + $0xdb0] sm:$0xff]  ;;  %v6357_v17 = vcombine.low %v1290_v5, %v1294_v6 }
 0x296   : > { %4365 = vmatpush2.bf16.msra.mxu0 %v6029_v39  ;;  %4408 = vmatpush2.bf16.msra.mxu1 %v6157_v40  ;;  %v6358_v39 = vcombine.high %v1290_v5, %v1294_v6  ;;  %v1154_v40 = vld [vmem:[%s7360_s1 + $0x990] sm:$0xff] }
 0x297   : > { %4366 = vmatprep.subr.bf16.mxu0 %v6022_v12  ;;  %4409 = vmatprep.subr.bf16.mxu1 %v6150_v13  ;;  %v1158_v12 = vld [vmem:[%s7360_s1 + $0x9b0] sm:$0xff] }
 0x298   : > { %v1282_v13 = vld [vmem:[%s7360_s1 + $0xd90] sm:$0xff] }
 0x299   : > { %v1150_v23 = vld [vmem:[%s7360_s1 + $0x970] sm:$0xff]  ;;  %v6349_v34 = vcombine.low %v1282_v13, %v1286_v14 }
 0x29a   : > { %4367 = vmatpush2.bf16.msra.mxu0 %v6021_v19  ;;  %4410 = vmatpush2.bf16.msra.mxu1 %v6149_v20  ;;  %v6222_v19 = vcombine.high %v1154_v40, %v1158_v12  ;;  %v7770_v20 = vpop.f32.mrf.mxu1  ;;  %v1274_v26 = vld [vmem:[%s7360_s1 + $0xd50] sm:$0xff] }
 0x29b   : > { %4368 = vmatprep.subr.bf16.mxu0 %v6014_v21  ;;  %4411 = vmatprep.subr.bf16.mxu1 %v6142_v22  ;;  %v6350_v21 = vcombine.high %v1282_v13, %v1286_v14  ;;  %v1146_v22 = vld [vmem:[%s7360_s1 + $0x950] sm:$0xff] }
 0x29c   : > { %v1278_v27 = vld [vmem:[%s7360_s1 + $0xd70] sm:$0xff]  ;;  %v6214_v36 = vcombine.high %v1146_v22, %v1150_v23  ;;  %v6213_v48 = vcombine.low %v1146_v22, %v1150_v23 }
 0x29d   : > { %v6342_v41 = vcombine.high %v1274_v26, %v1278_v27  ;;  %v6341_v50 = vcombine.low %v1274_v26, %v1278_v27  ;;  %v1258_v56 = vld [vmem:[%s7360_s1 + $0xcd0] sm:$0xff] }
 0x29e   : > { %4369 = vmatpush2.bf16.msra.mxu0 %v6013_v29  ;;  %4412 = vmatpush2.bf16.msra.mxu1 %v6141_v31  ;;  %v1126_v2 = vld [vmem:[%s7360_s1 + $0x8b0] sm:$0xff] }
 0x29f   : > { %4370 = vmatprep.subr.bf16.mxu0 %v6006_v32  ;;  %4413 = vmatprep.subr.bf16.mxu1 %v6134_v38  ;;  %v6221_v32 = vcombine.low %v1154_v40, %v1158_v12  ;;  %v1250_v3 = vld [vmem:[%s7360_s1 + $0xc90] sm:$0xff] }
 0x2a0   : > { %v1254_v5 = vld [vmem:[%s7360_s1 + $0xcb0] sm:$0xff] }
 0x2a1   : > { %v1118_v40 = vld [vmem:[%s7360_s1 + $0x870] sm:$0xff] }
 0x2a2   : > { %4371 = vmatpush2.bf16.msra.mxu0 %v6005_v42  ;;  %4414 = vmatpush2.bf16.msra.mxu1 %v6133_v44  ;;  %v1138_v42 = vld [vmem:[%s7360_s1 + $0x910] sm:$0xff] }
 0x2a3   : > { %4372 = vmatprep.subr.bf16.mxu0 %v5998_v45  ;;  %4415 = vmatprep.subr.bf16.mxu1 %v6126_v46  ;;  %v1266_v45 = vld [vmem:[%s7360_s1 + $0xd10] sm:$0xff] }
 0x2a4   : > { %v1270_v46 = vld [vmem:[%s7360_s1 + $0xd30] sm:$0xff] }
 0x2a5   : > { %v6333_v60 = vcombine.low %v1266_v45, %v1270_v46  ;;  %v1242_v12 = vld [vmem:[%s7360_s1 + $0xc50] sm:$0xff] }
 0x2a6   : > { %4373 = vmatpush2.bf16.msra.mxu0 %v5997_v51  ;;  %4416 = vmatpush2.bf16.msra.mxu1 %v6125_v52  ;;  %v1246_v13 = vld [vmem:[%s7360_s1 + $0xc70] sm:$0xff] }
 0x2a7   : > { %4374 = vmatprep.subr.bf16.mxu0 %v5990_v53  ;;  %4417 = vmatprep.subr.bf16.mxu1 %v6118_v54  ;;  %v1130_v53 = vld [vmem:[%s7360_s1 + $0x8d0] sm:$0xff]  ;;  %v6309_v27 = vcombine.low %v1242_v12, %v1246_v13 }
 0x2a8   : > { %v1134_v54 = vld [vmem:[%s7360_s1 + $0x8f0] sm:$0xff] }
 0x2a9   : > { %v6197_v6 = vcombine.low %v1130_v53, %v1134_v54  ;;  %v1110_v22 = vld [vmem:[%s7360_s1 + $0x830] sm:$0xff] }
 0x2aa   : > { %4375 = vmatpush2.bf16.msra.mxu0 %v5989_v61  ;;  %4418 = vmatpush2.bf16.msra.mxu1 %v6117_v9  ;;  %v6198_v61 = vcombine.high %v1130_v53, %v1134_v54  ;;  %v1234_v23 = vld [vmem:[%s7360_s1 + $0xc10] sm:$0xff] }
 0x2ab   : > { %4376 = vmatprep.subr.bf16.mxu0 %v5982_v63  ;;  %4419 = vmatprep.subr.bf16.mxu1 %v6110_v0  ;;  %v1122_v0 = vld [vmem:[%s7360_s1 + $0x890] sm:$0xff] }
 0x2ac   : > { %v6189_v14 = vcombine.low %v1122_v0, %v1126_v2  ;;  %v1214_v53 = vld [vmem:[%s7360_s1 + $0xb70] sm:$0xff] }
 0x2ad   : > { %v1338_v54 = vld [vmem:[%s7360_s1 + $0xf50] sm:$0xff] }
 0x2ae   : > { %4377 = vmatpush2.bf16.msra.mxu0 %v5981_v7  ;;  %4420 = vmatpush2.bf16.msra.mxu1 %v6109_v10  ;;  %v6190_v10 = vcombine.high %v1122_v0, %v1126_v2  ;;  %v1334_v0 = vld [vmem:[%s7360_s1 + $0xf30] sm:$0xff] }
 0x2af   : > { %4432 = vmatprep.subr.bf16.mxu0 %v6230_v11  ;;  %4475 = vmatprep.subr.bf16.mxu1 %v6358_v39  ;;  %v6318_v11 = vcombine.high %v1250_v3, %v1254_v5  ;;  %v1114_v39 = vld [vmem:[%s7360_s1 + $0x850] sm:$0xff] }
 0x2b0   : > { %v6181_v26 = vcombine.low %v1114_v39, %v1118_v40 }
 0x2b1   : > { %v4122_v25 = vpop.f32.mrf.mxu0  ;;  %4379 = vmatmul.mubr.bf16.vlgmr.msra.gmra.mxu0 %v7609_v24  ;;  %v4165_v31 = vpop.f32.mrf.mxu1  ;;  %4422 = vmatmul.mubr.bf16.vlgmr.msra.gmra.mxu1 %v7468_v1 }
 0x2b2   : > { %v4123_v29 = vadd.f32 %v4122_v25, %v7698_v58  ;;  %4433 = vmatpush1.bf16.msra.mxu0 %v6229_v15  ;;  %4476 = vmatpush1.bf16.msra.mxu1 %v6357_v17  ;;  %v1142_v58 = vld [vmem:[%s7360_s1 + $0x930] sm:$0xff]  ;;  %v6317_v15 = vcombine.low %v1250_v3, %v1254_v5  ;;  %v6182_v17 = vcombine.high %v1114_v39, %v1118_v40 }
 0x2b3   : > { %v7779_v38 = vpop.f32.mrf.mxu0  ;;  %4434 = vmatprep.subr.bf16.mxu0 %v6222_v19  ;;  %v7781_v37 = vpop.f32.mrf.mxu1  ;;  %4477 = vmatprep.subr.bf16.mxu1 %v6350_v21  ;;  %v6206_v51 = vcombine.high %v1138_v42, %v1142_v58  ;;  %v6205_v59 = vcombine.low %v1138_v42, %v1142_v58  ;;  %v6310_v19 = vcombine.high %v1242_v12, %v1246_v13  ;;  %v1106_v21 = vld [vmem:[%s7360_s1 + $0x810] sm:$0xff] }
 0x2b4   : > { %v4166_v24 = vadd.f32 %v4165_v31, %v4123_v29  ;;  %4464 = vmatprep.mubr.bf16.mxu0 %v7617_v33  ;;  %4507 = vmatprep.mubr.bf16.mxu1 %v7622_v35  ;;  %v6334_v33 = vcombine.high %v1266_v45, %v1270_v46  ;;  %v1262_v35 = vld [vmem:[%s7360_s1 + $0xcf0] sm:$0xff]  ;;  %v6174_v29 = vcombine.high %v1106_v21, %v1110_v22 }
 0x2b5   : > { %v4126_v44 = vpop.f32.mrf.mxu0  ;;  %v4169_v49 = vpop.f32.mrf.mxu1  ;;  %v6326_v63 = vcombine.high %v1258_v56, %v1262_v35  ;;  %v6325_v7 = vcombine.low %v1258_v56, %v1262_v35  ;;  %v1238_v25 = vld [vmem:[%s7360_s1 + $0xc30] sm:$0xff] }
 0x2b6   : > { %v4127_v47 = vadd.f32 %v4126_v44, %v7710_v8  ;;  %4435 = vmatpush1.bf16.msra.mxu0 %v6221_v32  ;;  %4478 = vmatpush1.bf16.msra.mxu1 %v6349_v34  ;;  %v4690_v57 = vmax.f32 %v4166_v24, 0.0  ;;  %v6302_v31 = vcombine.high %v1234_v23, %v1238_v25  ;;  %v1226_v32 = vld [vmem:[%s7360_s1 + $0xbd0] sm:$0xff]  ;;  %v6301_v42 = vcombine.low %v1234_v23, %v1238_v25 }
 0x2b7   : > { %4436 = vmatprep.subr.bf16.mxu0 %v6214_v36  ;;  %4479 = vmatprep.subr.bf16.mxu1 %v6342_v41  ;;  %v1230_v34 = vld [vmem:[%s7360_s1 + $0xbf0] sm:$0xff]  ;;  %v6173_v41 = vcombine.low %v1106_v21, %v1110_v22 }
 0x2b8   : > { %v4170_v52 = vadd.f32 %v4169_v49, %v4127_v47  ;;  %v1354_v36 = vld [vmem:[%s7360_s1 + $0xfd0] sm:$0xff]  ;;  %v6294_v58 = vcombine.high %v1226_v32, %v1230_v34  ;;  %v6293_v49 = vcombine.low %v1226_v32, %v1230_v34 }
 0x2b9   : > { %v1358_v24 = vld [vmem:[%s7360_s1 + $0xff0] sm:$0xff] }
 0x2ba   : > { %v4698_v8 = vmax.f32 %v4170_v52, 0.0  ;;  %4437 = vmatpush1.bf16.msra.mxu0 %v6213_v48  ;;  %4480 = vmatpush1.bf16.msra.mxu1 %v6341_v50  ;;  %v6422_v44 = vcombine.high %v1354_v36, %v1358_v24  ;;  %v1218_v45 = vld [vmem:[%s7360_s1 + $0xb90] sm:$0xff]  ;;  %v6421_v50 = vcombine.low %v1354_v36, %v1358_v24 }
 0x2bb   : > { %4438 = vmatprep.subr.bf16.mxu0 %v6206_v51  ;;  %4481 = vmatprep.subr.bf16.mxu1 %v6334_v33  ;;  %v1222_v46 = vld [vmem:[%s7360_s1 + $0xbb0] sm:$0xff] }
 0x2bc   : > { %v7794_v9 = vpack.c.bf16 %v4698_v8, %v4690_v57  ;;  %v1346_v47 = vld [vmem:[%s7360_s1 + $0xf90] sm:$0xff]  ;;  %v6286_v51 = vcombine.high %v1218_v45, %v1222_v46  ;;  %v6285_v35 = vcombine.low %v1218_v45, %v1222_v46 }
 0x2bd   : > { %v1350_v48 = vld [vmem:[%s7360_s1 + $0xfb0] sm:$0xff] }
 0x2be   : > { %4439 = vmatpush1.bf16.msra.mxu0 %v6205_v59  ;;  %4482 = vmatpush1.bf16.msra.mxu1 %v6333_v60  ;;  %v6414_v52 = vcombine.high %v1346_v47, %v1350_v48  ;;  %v1210_v33 = vld [vmem:[%s7360_s1 + $0xb50] sm:$0xff]  ;;  %v6413_v57 = vcombine.low %v1346_v47, %v1350_v48 }
 0x2bf   : > { %4440 = vmatprep.subr.bf16.mxu0 %v6198_v61  ;;  %4483 = vmatprep.subr.bf16.mxu1 %v6326_v63  ;;  %v1342_v56 = vld [vmem:[%s7360_s1 + $0xf70] sm:$0xff]  ;;  %v6278_v8 = vcombine.high %v1210_v33, %v1214_v53  ;;  %v6277_v2 = vcombine.low %v1210_v33, %v1214_v53  ;;  %v1039_v33 = vld [vmem:[%s7360_s1 + $0x5f8] sm:$0xff] }
 0x2c0   : > { %v6406_v59 = vcombine.high %v1338_v54, %v1342_v56  ;;  %v1202_v60 = vld [vmem:[%s7360_s1 + $0xb10] sm:$0xff]  ;;  %v6405_v3 = vcombine.low %v1338_v54, %v1342_v56  ;;  %v1372_v54 = vsub.s32 2, %v7673_v18 }
 0x2c1   : > { %v1206_v61 = vld [vmem:[%s7360_s1 + $0xb30] sm:$0xff] }
 0x2c2   : > { %4441 = vmatpush1.bf16.msra.mxu0 %v6197_v6  ;;  %4484 = vmatpush1.bf16.msra.mxu1 %v6325_v7  ;;  %v1330_v63 = vld [vmem:[%s7360_s1 + $0xf10] sm:$0xff]  ;;  %v6270_v5 = vcombine.high %v1202_v60, %v1206_v61  ;;  %v6269_v40 = vcombine.low %v1202_v60, %v1206_v61  ;;  %v1027_v60 = vld [vmem:[%s7360_s1 + $0x598] sm:$0xff] }
 0x2c3   : > { %4442 = vmatprep.subr.bf16.mxu0 %v6190_v10  ;;  %4485 = vmatprep.subr.bf16.mxu1 %v6318_v11  ;;  %v6398_v6 = vcombine.high %v1330_v63, %v1334_v0  ;;  %v1194_v7 = vld [vmem:[%s7360_s1 + $0xad0] sm:$0xff]  ;;  %v6397_v12 = vcombine.low %v1330_v63, %v1334_v0  ;;  %v1031_v61 = vld [vmem:[%s7360_s1 + $0x5b8] sm:$0xff]  ;;  %v1373_v63 = vrot.slane %v7681_v30, %v1372_v54 }
 0x2c4   : > { %v1198_v10 = vld [vmem:[%s7360_s1 + $0xaf0] sm:$0xff]  ;;  %v1019_v30 = vld [vmem:[%s7360_s1 + $0x558] sm:$0xff] }
 0x2c5   : > { %v1322_v11 = vld [vmem:[%s7360_s1 + $0xed0] sm:$0xff]  ;;  %v6262_v13 = vcombine.high %v1194_v7, %v1198_v10  ;;  %v6261_v22 = vcombine.low %v1194_v7, %v1198_v10  ;;  %v6096_v7 = vcombine.high %v1027_v60, %v1031_v61  ;;  %v891_v10 = vld [vmem:[%s7360_s1 + $0x158] sm:$0xff] }
 0x2c6   : > { %4443 = vmatpush1.bf16.msra.mxu0 %v6189_v14  ;;  %4486 = vmatpush1.bf16.msra.mxu1 %v6317_v15  ;;  %v1326_v39 = vld [vmem:[%s7360_s1 + $0xef0] sm:$0xff]  ;;  %v999_v54 = vld [vmem:[%s7360_s1 + $0x4b8] sm:$0xff] }
 0x2c7   : > { %4444 = vmatprep.subr.bf16.mxu0 %v6182_v17  ;;  %4487 = vmatprep.subr.bf16.mxu1 %v6310_v19  ;;  %v6390_v14 = vcombine.high %v1322_v11, %v1326_v39  ;;  %v1186_v15 = vld [vmem:[%s7360_s1 + $0xa90] sm:$0xff]  ;;  %v6389_v23 = vcombine.low %v1322_v11, %v1326_v39  ;;  %v895_v11 = vld [vmem:[%s7360_s1 + $0x178] sm:$0xff] }
 0x2c8   : > { %v1190_v17 = vld [vmem:[%s7360_s1 + $0xab0] sm:$0xff] }
 0x2c9   : > { %v1314_v19 = vld [vmem:[%s7360_s1 + $0xe90] sm:$0xff]  ;;  %v6254_v25 = vcombine.high %v1186_v15, %v1190_v17  ;;  %v6253_v34 = vcombine.low %v1186_v15, %v1190_v17 }
 0x2ca   : > { %4445 = vmatpush1.bf16.msra.mxu0 %v6181_v26  ;;  %4488 = vmatpush1.bf16.msra.mxu1 %v6309_v27  ;;  %v1318_v21 = vld [vmem:[%s7360_s1 + $0xeb0] sm:$0xff] }
 0x2cb   : > { %4446 = vmatprep.subr.bf16.mxu0 %v6174_v29  ;;  %4489 = vmatprep.subr.bf16.mxu1 %v6302_v31  ;;  %v6382_v26 = vcombine.high %v1314_v19, %v1318_v21  ;;  %v1178_v27 = vld [vmem:[%s7360_s1 + $0xa50] sm:$0xff]  ;;  %v6381_v36 = vcombine.low %v1314_v19, %v1318_v21  ;;  %v6095_v21 = vcombine.low %v1027_v60, %v1031_v61  ;;  %v863_v60 = vld [vmem:[%s7360_s1 + $0x78] sm:$0xff] }
 0x2cc   : > { %v1182_v29 = vld [vmem:[%s7360_s1 + $0xa70] sm:$0xff]  ;;  %v987_v61 = vld [vmem:[%s7360_s1 + $0x458] sm:$0xff] }
 0x2cd   : > { %v1306_v31 = vld [vmem:[%s7360_s1 + $0xe50] sm:$0xff]  ;;  %v6246_v24 = vcombine.high %v1178_v27, %v1182_v29  ;;  %v6245_v46 = vcombine.low %v1178_v27, %v1182_v29  ;;  %v883_v27 = vld [vmem:[%s7360_s1 + $0x118] sm:$0xff] }
 0x2ce   : > { %4447 = vmatpush1.bf16.msra.mxu0 %v6173_v41  ;;  %4490 = vmatpush1.bf16.msra.mxu1 %v6301_v42  ;;  %v1310_v32 = vld [vmem:[%s7360_s1 + $0xe70] sm:$0xff]  ;;  %v887_v29 = vld [vmem:[%s7360_s1 + $0x138] sm:$0xff] }
 0x2cf   : > { %4448 = vmatprep.subr.bf16.mxu0 %v6294_v58  ;;  %4491 = vmatprep.subr.bf16.mxu1 %v6422_v44  ;;  %v6374_v41 = vcombine.high %v1306_v31, %v1310_v32  ;;  %v1170_v42 = vld [vmem:[%s7360_s1 + $0xa10] sm:$0xff]  ;;  %v6373_v47 = vcombine.low %v1306_v31, %v1310_v32  ;;  %v1011_v32 = vld [vmem:[%s7360_s1 + $0x518] sm:$0xff] }
 0x2d0   : > { %v1174_v58 = vld [vmem:[%s7360_s1 + $0xa30] sm:$0xff] }
 0x2d1   : > { %v1298_v44 = vld [vmem:[%s7360_s1 + $0xe10] sm:$0xff]  ;;  %v6238_v48 = vcombine.high %v1170_v42, %v1174_v58  ;;  %v6237_v53 = vcombine.low %v1170_v42, %v1174_v58  ;;  %v5952_v58 = vcombine.high %v883_v27, %v887_v29 }
 0x2d2   : > { %4449 = vmatpush2.bf16.msra.mxu0 %v6293_v49  ;;  %4492 = vmatpush2.bf16.msra.mxu1 %v6421_v50  ;;  %v1302_v45 = vld [vmem:[%s7360_s1 + $0xe30] sm:$0xff]  ;;  %v907_v50 = vld [vmem:[%s7360_s1 + $0x1d8] sm:$0xff] }
 0x2d3   : > { %4450 = vmatprep.subr.bf16.mxu0 %v6286_v51  ;;  %4493 = vmatprep.subr.bf16.mxu1 %v6414_v52  ;;  %v6366_v49 = vcombine.high %v1298_v44, %v1302_v45  ;;  %v911_v51 = vld [vmem:[%s7360_s1 + $0x1f8] sm:$0xff]  ;;  %v6365_v56 = vcombine.low %v1298_v44, %v1302_v45  ;;  %v7861_v15 = vld [vmem:[#allocation2 + $0x10] ss:$40 sps:$4 sm:$0xff]  }
 0x2d4   : > { %v1035_v52 = vld [vmem:[%s7360_s1 + $0x5d8] sm:$0xff]  ;;  %v5975_v0 = vcombine.low %v907_v50, %v911_v51 }
 0x2d5   : > { %v875_v45 = vld [vmem:[%s7360_s1 + $0xd8] sm:$0xff] }
 0x2d6   : > { %4451 = vmatpush2.bf16.msra.mxu0 %v6285_v35  ;;  %4494 = vmatpush2.bf16.msra.mxu1 %v6413_v57  ;;  %v5976_v35 = vcombine.high %v907_v50, %v911_v51  ;;  %v6104_v57 = vcombine.high %v1035_v52, %v1039_v33 }
 0x2d7   : > { %4452 = vmatprep.subr.bf16.mxu0 %v6278_v8  ;;  %4495 = vmatprep.subr.bf16.mxu1 %v6406_v59  ;;  %v899_v8 = vld [vmem:[%s7360_s1 + $0x198] sm:$0xff] }
 0x2d8   : > { %v903_v59 = vld [vmem:[%s7360_s1 + $0x1b8] sm:$0xff] }
 0x2d9   : > { %v5967_v17 = vcombine.low %v899_v8, %v903_v59 }
 0x2da   : > { %4453 = vmatpush2.bf16.msra.mxu0 %v6277_v2  ;;  %4496 = vmatpush2.bf16.msra.mxu1 %v6405_v3  ;;  %v7850_v2 = vpop.f32.mrf.mxu0  ;;  %v6103_v3 = vcombine.low %v1035_v52, %v1039_v33  ;;  %v867_v52 = vld [vmem:[%s7360_s1 + $0x98] sm:$0xff] }
 0x2db   : > { %4454 = vmatprep.subr.bf16.mxu0 %v6270_v5  ;;  %4497 = vmatprep.subr.bf16.mxu1 %v6398_v6  ;;  %v5968_v5 = vcombine.high %v899_v8, %v903_v59  ;;  %v7852_v6 = vpop.f32.mrf.mxu1  ;;  %v871_v33 = vld [vmem:[%s7360_s1 + $0xb8] sm:$0xff] }
 0x2dc   : > { %v859_v59 = vld [vmem:[%s7360_s1 + $0x58] sm:$0xff] }
 0x2de   : > { %4455 = vmatpush2.bf16.msra.mxu0 %v6269_v40  ;;  %4498 = vmatpush2.bf16.msra.mxu1 %v6397_v12  ;;  %v7856_v40 = vld [vmem:[#allocation2 + $0x18] ss:$16 sps:$4 sm:$0xff]   ;;  %v1023_v12 = vld [vmem:[%s7360_s1 + $0x578] sm:$0xff] }
 0x2df   : > { %4456 = vmatprep.subr.bf16.mxu0 %v6262_v13  ;;  %4499 = vmatprep.subr.bf16.mxu1 %v6390_v14  ;;  %v6087_v42 = vcombine.low %v1019_v30, %v1023_v12 }
 0x2e2   : > { %4457 = vmatpush2.bf16.msra.mxu0 %v6261_v22  ;;  %4500 = vmatpush2.bf16.msra.mxu1 %v6389_v23  ;;  %v5960_v22 = vcombine.high %v891_v10, %v895_v11 }
 0x2e3   : > { %4458 = vmatprep.subr.bf16.mxu0 %v6254_v25  ;;  %4501 = vmatprep.subr.bf16.mxu1 %v6382_v26  ;;  %v6088_v26 = vcombine.high %v1019_v30, %v1023_v12  ;;  %v983_v30 = vld [vmem:[%s7360_s1 + $0x438] sm:$0xff]  ;;  %v5927_v12 = vcombine.low %v859_v59, %v863_v60 }
 0x2e6   : > { %4459 = vmatpush2.bf16.msra.mxu0 %v6253_v34  ;;  %4502 = vmatpush2.bf16.msra.mxu1 %v6381_v36  ;;  %v1015_v34 = vld [vmem:[%s7360_s1 + $0x538] sm:$0xff] }
 0x2e7   : > { %4460 = vmatprep.subr.bf16.mxu0 %v6246_v24  ;;  %4503 = vmatprep.subr.bf16.mxu1 %v6374_v41  ;;  %v5959_v24 = vcombine.low %v891_v10, %v895_v11  ;;  %v851_v10 = vld [vmem:[%s7360_s1 + $0x18] sm:$0xff] }
 0x2e8   : > { %v855_v11 = vld [vmem:[%s7360_s1 + $0x38] sm:$0xff] }
 0x2ea   : > { %4461 = vmatpush2.bf16.msra.mxu0 %v6245_v46  ;;  %4504 = vmatpush2.bf16.msra.mxu1 %v6373_v47  ;;  %v879_v46 = vld [vmem:[%s7360_s1 + $0xf8] sm:$0xff] }
 0x2eb   : > { %4462 = vmatprep.subr.bf16.mxu0 %v6238_v48  ;;  %4505 = vmatprep.subr.bf16.mxu1 %v6366_v49  ;;  %v1003_v47 = vld [vmem:[%s7360_s1 + $0x4d8] sm:$0xff]  ;;  %v5951_v48 = vcombine.low %v883_v27, %v887_v29  ;;  %v6079_v49 = vcombine.low %v1011_v32, %v1015_v34  ;;  %v5944_v50 = vcombine.high %v875_v45, %v879_v46 }
 0x2ec   : > { %v1103_v27 = vld [vmem:[%s7360_s1 + $0x7f8] sm:$0xff]  ;;  %v5919_v29 = vcombine.low %v851_v10, %v855_v11 }
 0x2ee   : > { %4463 = vmatpush2.bf16.msra.mxu0 %v6237_v53  ;;  %4506 = vmatpush2.bf16.msra.mxu1 %v6365_v56  ;;  %v995_v53 = vld [vmem:[%s7360_s1 + $0x498] sm:$0xff]  ;;  %v5943_v56 = vcombine.low %v875_v45, %v879_v46 }
 0x2ef   : > { %4518 = vmatprep.subr.bf16.mxu0 %v5976_v35  ;;  %4561 = vmatprep.subr.bf16.mxu1 %v6104_v57  ;;  %v5936_v57 = vcombine.high %v867_v52, %v871_v33  ;;  %v6064_v8 = vcombine.high %v995_v53, %v999_v54 }
 0x2f1   : > { %v4208_v39 = vpop.f32.mrf.mxu0  ;;  %4465 = vmatmul.mubr.bf16.vlgmr.msra.gmra.mxu0 %v7856_v40  ;;  %v4251_v14 = vpop.f32.mrf.mxu1  ;;  %4508 = vmatmul.mubr.bf16.vlgmr.msra.gmra.mxu1 %v7861_v15 }
 0x2f2   : > { %v4209_v13 = vadd.f32 %v4208_v39, %v1373_v63  ;;  %4519 = vmatpush1.bf16.msra.mxu0 %v5975_v0  ;;  %4562 = vmatpush1.bf16.msra.mxu1 %v6103_v3  ;;  %v5935_v0 = vcombine.low %v867_v52, %v871_v33  ;;  %v6063_v3 = vcombine.low %v995_v53, %v999_v54  ;;  %v979_v39 = vld [vmem:[%s7360_s1 + $0x418] sm:$0xff] }
 0x2f3   : > { %v7864_v19 = vpop.f32.mrf.mxu0  ;;  %4520 = vmatprep.subr.bf16.mxu0 %v5968_v5  ;;  %v7868_v25 = vpop.f32.mrf.mxu1  ;;  %4563 = vmatprep.subr.bf16.mxu1 %v6096_v7  ;;  %v5928_v5 = vcombine.high %v859_v59, %v863_v60  ;;  %v947_v53 = vld [vmem:[%s7360_s1 + $0x318] sm:$0xff] }
 0x2f4   : > { %v7866_v23 = vadd.f32 %v4251_v14, %v4209_v13  ;;  %4550 = vmatprep.mubr.bf16.mxu0 %v7704_v62  ;;  %4593 = vmatprep.mubr.bf16.mxu1 %v7422_v43  ;;  %v6080_v62 = vcombine.high %v1011_v32, %v1015_v34  ;;  %v1007_v43 = vld [vmem:[%s7360_s1 + $0x4f8] sm:$0xff]  ;;  %v5920_v14 = vcombine.high %v851_v10, %v855_v11 }
 0x2f5   : > { %v4212_v31 = vpop.f32.mrf.mxu0  ;;  %v4255_v41 = vpop.f32.mrf.mxu1  ;;  %v6072_v51 = vcombine.high %v1003_v47, %v1007_v43  ;;  %v6071_v35 = vcombine.low %v1003_v47, %v1007_v43  ;;  %v955_v47 = vld [vmem:[%s7360_s1 + $0x358] sm:$0xff] }
 0x2f6   : > { %v4213_v36 = vadd.f32 %v4212_v31, %v1373_v63  ;;  %4521 = vmatpush1.bf16.msra.mxu0 %v5967_v17  ;;  %4564 = vmatpush1.bf16.msra.mxu1 %v6095_v21  ;;  %v991_v63 = vld [vmem:[%s7360_s1 + $0x478] sm:$0xff]  ;;  %v6048_v17 = vcombine.high %v979_v39, %v983_v30  ;;  %v6047_v31 = vcombine.low %v979_v39, %v983_v30 }
 0x2f7   : > { %4522 = vmatprep.subr.bf16.mxu0 %v5960_v22  ;;  %4565 = vmatprep.subr.bf16.mxu1 %v6088_v26  ;;  %v6056_v7 = vcombine.high %v987_v61, %v991_v63  ;;  %v6055_v13 = vcombine.low %v987_v61, %v991_v63  ;;  %v971_v21 = vld [vmem:[%s7360_s1 + $0x3d8] sm:$0xff] }
 0x2f8   : > { %v7876_v44 = vadd.f32 %v4255_v41, %v4213_v36  ;;  %v975_v22 = vld [vmem:[%s7360_s1 + $0x3f8] sm:$0xff] }
 0x2f9   : > { %v1099_v26 = vld [vmem:[%s7360_s1 + $0x7d8] sm:$0xff]  ;;  %v6040_v32 = vcombine.high %v971_v21, %v975_v22 }
 0x2fa   : > { %4523 = vmatpush1.bf16.msra.mxu0 %v5959_v24  ;;  %4566 = vmatpush1.bf16.msra.mxu1 %v6087_v42  ;;  %v6168_v34 = vcombine.high %v1099_v26, %v1103_v27  ;;  %v963_v36 = vld [vmem:[%s7360_s1 + $0x398] sm:$0xff] }
 0x2fb   : > { %4524 = vmatprep.subr.bf16.mxu0 %v5952_v58  ;;  %4567 = vmatprep.subr.bf16.mxu1 %v6080_v62  ;;  %v967_v24 = vld [vmem:[%s7360_s1 + $0x3b8] sm:$0xff]  ;;  %v6039_v58 = vcombine.low %v971_v21, %v975_v22  ;;  %v6167_v62 = vcombine.low %v1099_v26, %v1103_v27 }
 0x2fc   : > { %v1091_v41 = vld [vmem:[%s7360_s1 + $0x798] sm:$0xff]  ;;  %v6032_v45 = vcombine.high %v963_v36, %v967_v24 }
 0x2fd   : > { %v1095_v42 = vld [vmem:[%s7360_s1 + $0x7b8] sm:$0xff] }
 0x2fe   : > { %4525 = vmatpush1.bf16.msra.mxu0 %v5951_v48  ;;  %4568 = vmatpush1.bf16.msra.mxu1 %v6079_v49  ;;  %v6160_v46 = vcombine.high %v1091_v41, %v1095_v42  ;;  %v959_v43 = vld [vmem:[%s7360_s1 + $0x378] sm:$0xff] }
 0x2ff   : > { %4526 = vmatprep.subr.bf16.mxu0 %v5944_v50  ;;  %4569 = vmatprep.subr.bf16.mxu1 %v6072_v51  ;;  %v1083_v48 = vld [vmem:[%s7360_s1 + $0x758] sm:$0xff]  ;;  %v6031_v50 = vcombine.low %v963_v36, %v967_v24  ;;  %v6159_v51 = vcombine.low %v1091_v41, %v1095_v42  ;;  %v6024_v52 = vcombine.high %v955_v47, %v959_v43 }
 0x300   : > { %v1087_v49 = vld [vmem:[%s7360_s1 + $0x778] sm:$0xff] }
 0x301   : > { %v6152_v33 = vcombine.high %v1083_v48, %v1087_v49  ;;  %v951_v54 = vld [vmem:[%s7360_s1 + $0x338] sm:$0xff] }
 0x302   : > { %4527 = vmatpush1.bf16.msra.mxu0 %v5943_v56  ;;  %4570 = vmatpush1.bf16.msra.mxu1 %v6071_v35  ;;  %v1075_v56 = vld [vmem:[%s7360_s1 + $0x718] sm:$0xff]  ;;  %v6016_v59 = vcombine.high %v947_v53, %v951_v54 }
 0x303   : > { %4528 = vmatprep.subr.bf16.mxu0 %v5936_v57  ;;  %4571 = vmatprep.subr.bf16.mxu1 %v6064_v8  ;;  %v1079_v35 = vld [vmem:[%s7360_s1 + $0x738] sm:$0xff]  ;;  %v6023_v57 = vcombine.low %v955_v47, %v959_v43  ;;  %v6151_v8 = vcombine.low %v1083_v48, %v1087_v49 }
 0x304   : > { %v6144_v60 = vcombine.high %v1075_v56, %v1079_v35  ;;  %v939_v61 = vld [vmem:[%s7360_s1 + $0x2d8] sm:$0xff] }
 0x305   : > { %v943_v63 = vld [vmem:[%s7360_s1 + $0x2f8] sm:$0xff] }
 0x306   : > { %4529 = vmatpush1.bf16.msra.mxu0 %v5935_v0  ;;  %4572 = vmatpush1.bf16.msra.mxu1 %v6063_v3  ;;  %v1067_v0 = vld [vmem:[%s7360_s1 + $0x6d8] sm:$0xff]  ;;  %v6008_v10 = vcombine.high %v939_v61, %v943_v63 }
 0x307   : > { %4530 = vmatprep.subr.bf16.mxu0 %v5928_v5  ;;  %4573 = vmatprep.subr.bf16.mxu1 %v6056_v7  ;;  %v1071_v3 = vld [vmem:[%s7360_s1 + $0x6f8] sm:$0xff]  ;;  %v6015_v5 = vcombine.low %v947_v53, %v951_v54  ;;  %v6143_v7 = vcombine.low %v1075_v56, %v1079_v35 }
 0x308   : > { %v6136_v11 = vcombine.high %v1067_v0, %v1071_v3  ;;  %v931_v39 = vld [vmem:[%s7360_s1 + $0x298] sm:$0xff] }
 0x309   : > { %v935_v30 = vld [vmem:[%s7360_s1 + $0x2b8] sm:$0xff] }
 0x30a   : > { %4531 = vmatpush1.bf16.msra.mxu0 %v5927_v12  ;;  %4574 = vmatpush1.bf16.msra.mxu1 %v6055_v13  ;;  %v1059_v12 = vld [vmem:[%s7360_s1 + $0x698] sm:$0xff]  ;;  %v6000_v21 = vcombine.high %v931_v39, %v935_v30 }
 0x30b   : > { %4532 = vmatprep.subr.bf16.mxu0 %v5920_v14  ;;  %4575 = vmatprep.subr.bf16.mxu1 %v6048_v17  ;;  %v1063_v13 = vld [vmem:[%s7360_s1 + $0x6b8] sm:$0xff]  ;;  %v6007_v14 = vcombine.low %v939_v61, %v943_v63  ;;  %v6135_v17 = vcombine.low %v1067_v0, %v1071_v3  ;;  %v7936_v0 = vpop.f32.mrf.mxu1 }
 0x30c   : > { %v6128_v22 = vcombine.high %v1059_v12, %v1063_v13  ;;  %v923_v26 = vld [vmem:[%s7360_s1 + $0x258] sm:$0xff] }
 0x30d   : > { %v927_v27 = vld [vmem:[%s7360_s1 + $0x278] sm:$0xff] }
 0x30e   : > { %4533 = vmatpush1.bf16.msra.mxu0 %v5919_v29  ;;  %4576 = vmatpush1.bf16.msra.mxu1 %v6047_v31  ;;  %v1051_v29 = vld [vmem:[%s7360_s1 + $0x658] sm:$0xff]  ;;  %v5992_v36 = vcombine.high %v923_v26, %v927_v27 }
 0x30f   : > { %4534 = vmatprep.subr.bf16.mxu0 %v6040_v32  ;;  %4577 = vmatprep.subr.bf16.mxu1 %v6168_v34  ;;  %v1055_v31 = vld [vmem:[%s7360_s1 + $0x678] sm:$0xff]  ;;  %v5999_v32 = vcombine.low %v931_v39, %v935_v30  ;;  %v6127_v34 = vcombine.low %v1059_v12, %v1063_v13 }
 0x310   : > { %v6120_v24 = vcombine.high %v1051_v29, %v1055_v31  ;;  %v915_v41 = vld [vmem:[%s7360_s1 + $0x218] sm:$0xff] }
 0x311   : > { %v919_v42 = vld [vmem:[%s7360_s1 + $0x238] sm:$0xff] }
 0x312   : > { %4535 = vmatpush2.bf16.msra.mxu0 %v6039_v58  ;;  %4578 = vmatpush2.bf16.msra.mxu1 %v6167_v62  ;;  %v1043_v58 = vld [vmem:[%s7360_s1 + $0x618] sm:$0xff]  ;;  %v5984_v47 = vcombine.high %v915_v41, %v919_v42 }
 0x313   : > { %4536 = vmatprep.subr.bf16.mxu0 %v6032_v45  ;;  %4579 = vmatprep.subr.bf16.mxu1 %v6160_v46  ;;  %v1047_v62 = vld [vmem:[%s7360_s1 + $0x638] sm:$0xff]  ;;  %v5991_v45 = vcombine.low %v923_v26, %v927_v27  ;;  %v6119_v46 = vcombine.low %v1051_v29, %v1055_v31 }
 0x314   : > { %v6112_v43 = vcombine.high %v1043_v58, %v1047_v62  ;;  %v1163_v48 = vld [vmem:[%s7360_s1 + $0x9d8] sm:$0xff] }
 0x315   : > { %v1167_v49 = vld [vmem:[%s7360_s1 + $0x9f8] sm:$0xff] }
 0x316   : > { %4537 = vmatpush2.bf16.msra.mxu0 %v6031_v50  ;;  %4580 = vmatpush2.bf16.msra.mxu1 %v6159_v51  ;;  %v1291_v50 = vld [vmem:[%s7360_s1 + $0xdd8] sm:$0xff]  ;;  %v6232_v53 = vcombine.high %v1163_v48, %v1167_v49 }
 0x317   : > { %4538 = vmatprep.subr.bf16.mxu0 %v6024_v52  ;;  %4581 = vmatprep.subr.bf16.mxu1 %v6152_v33  ;;  %v1295_v51 = vld [vmem:[%s7360_s1 + $0xdf8] sm:$0xff]  ;;  %v5983_v52 = vcombine.low %v915_v41, %v919_v42  ;;  %v6111_v33 = vcombine.low %v1043_v58, %v1047_v62 }
 0x318   : > { %v6360_v54 = vcombine.high %v1291_v50, %v1295_v51  ;;  %v1155_v56 = vld [vmem:[%s7360_s1 + $0x998] sm:$0xff]  ;;  %v6359_v61 = vcombine.low %v1291_v50, %v1295_v51 }
 0x319   : > { %v1159_v35 = vld [vmem:[%s7360_s1 + $0x9b8] sm:$0xff] }
 0x31a   : > { %4539 = vmatpush2.bf16.msra.mxu0 %v6023_v57  ;;  %4582 = vmatpush2.bf16.msra.mxu1 %v6151_v8  ;;  %v1283_v57 = vld [vmem:[%s7360_s1 + $0xd98] sm:$0xff]  ;;  %v6224_v63 = vcombine.high %v1155_v56, %v1159_v35 }
 0x31b   : > { %4540 = vmatprep.subr.bf16.mxu0 %v6016_v59  ;;  %4583 = vmatprep.subr.bf16.mxu1 %v6144_v60  ;;  %v1287_v8 = vld [vmem:[%s7360_s1 + $0xdb8] sm:$0xff]  ;;  %v6231_v59 = vcombine.low %v1163_v48, %v1167_v49  ;;  %v7934_v60 = vpop.f32.mrf.mxu0 }
 0x31c   : > { %v6352_v3 = vcombine.high %v1283_v57, %v1287_v8  ;;  %v1275_v39 = vld [vmem:[%s7360_s1 + $0xd58] sm:$0xff] }
 0x31d   : > { %v1279_v30 = vld [vmem:[%s7360_s1 + $0xd78] sm:$0xff] }
 0x31e   : > { %4541 = vmatpush2.bf16.msra.mxu0 %v6015_v5  ;;  %4584 = vmatpush2.bf16.msra.mxu1 %v6143_v7  ;;  %v1147_v5 = vld [vmem:[%s7360_s1 + $0x958] sm:$0xff]  ;;  %v6344_v29 = vcombine.high %v1275_v39, %v1279_v30  ;;  %v6343_v62 = vcombine.low %v1275_v39, %v1279_v30 }
 0x31f   : > { %4542 = vmatprep.subr.bf16.mxu0 %v6008_v10  ;;  %4585 = vmatprep.subr.bf16.mxu1 %v6136_v11  ;;  %v1151_v7 = vld [vmem:[%s7360_s1 + $0x978] sm:$0xff]  ;;  %v6890_v11 = vld [vmem:[#allocation2 + $0x30] ss:$-40 sps:$4 sm:$0xff]  }
 0x320   : > { %v1139_v31 = vld [vmem:[%s7360_s1 + $0x918] sm:$0xff]  ;;  %v6215_v42 = vcombine.low %v1147_v5, %v1151_v7 }
 0x321   : > { %v1135_v48 = vld [vmem:[%s7360_s1 + $0x8f8] sm:$0xff] }
 0x322   : > { %4543 = vmatpush2.bf16.msra.mxu0 %v6007_v14  ;;  %4586 = vmatpush2.bf16.msra.mxu1 %v6135_v17  ;;  %v6223_v14 = vcombine.low %v1155_v56, %v1159_v35  ;;  %v1259_v49 = vld [vmem:[%s7360_s1 + $0xcd8] sm:$0xff] }
 0x323   : > { %4544 = vmatprep.subr.bf16.mxu0 %v6000_v21  ;;  %4587 = vmatprep.subr.bf16.mxu1 %v6128_v22  ;;  %v6351_v21 = vcombine.low %v1283_v57, %v1287_v8  ;;  %v6216_v22 = vcombine.high %v1147_v5, %v1151_v7  ;;  %v1263_v50 = vld [vmem:[%s7360_s1 + $0xcf8] sm:$0xff] }
 0x324   : > { %v6328_v56 = vcombine.high %v1259_v49, %v1263_v50  ;;  %v1123_v35 = vld [vmem:[%s7360_s1 + $0x898] sm:$0xff] }
 0x325   : > { %v1127_v57 = vld [vmem:[%s7360_s1 + $0x8b8] sm:$0xff] }
 0x326   : > { %4545 = vmatpush2.bf16.msra.mxu0 %v5999_v32  ;;  %4588 = vmatpush2.bf16.msra.mxu1 %v6127_v34  ;;  %v6891_v32 = vld [vmem:[#allocation2 + $0x1c] ss:$16 sps:$4 sm:$0xff]   ;;  %v1267_v34 = vld [vmem:[%s7360_s1 + $0xd18] sm:$0xff]  ;;  %v6191_v30 = vcombine.low %v1123_v35, %v1127_v57 }
 0x327   : > { %4546 = vmatprep.subr.bf16.mxu0 %v5992_v36  ;;  %4589 = vmatprep.subr.bf16.mxu1 %v6120_v24  ;;  %v1271_v36 = vld [vmem:[%s7360_s1 + $0xd38] sm:$0xff]  ;;  %v6892_v24 = vld [vmem:[#allocation2 + $0x14] ss:$40 sps:$4 sm:$0xff]  }
 0x328   : > { %v1251_v8 = vld [vmem:[%s7360_s1 + $0xc98] sm:$0xff] }
 0x329   : > { %v1115_v7 = vld [vmem:[%s7360_s1 + $0x858] sm:$0xff] }
 0x32a   : > { %4547 = vmatpush2.bf16.msra.mxu0 %v5991_v45  ;;  %4590 = vmatpush2.bf16.msra.mxu1 %v6119_v46  ;;  %v1247_v39 = vld [vmem:[%s7360_s1 + $0xc78] sm:$0xff] }
 0x32b   : > { %4548 = vmatprep.subr.bf16.mxu0 %v5984_v47  ;;  %4591 = vmatprep.subr.bf16.mxu1 %v6112_v43  ;;  %v6336_v47 = vcombine.high %v1267_v34, %v1271_v36  ;;  %v1131_v43 = vld [vmem:[%s7360_s1 + $0x8d8] sm:$0xff] }
 0x32e   : > { %4549 = vmatpush2.bf16.msra.mxu0 %v5983_v52  ;;  %4592 = vmatpush2.bf16.msra.mxu1 %v6111_v33  ;;  %v6335_v33 = vcombine.low %v1267_v34, %v1271_v36  ;;  %v1227_v34 = vld [vmem:[%s7360_s1 + $0xbd8] sm:$0xff] }
 0x32f   : > { %4604 = vmatprep.subr.bf16.mxu0 %v6232_v53  ;;  %4647 = vmatprep.subr.bf16.mxu1 %v6360_v54  ;;  %v6200_v53 = vcombine.high %v1131_v43, %v1135_v48  ;;  %v1231_v36 = vld [vmem:[%s7360_s1 + $0xbf8] sm:$0xff] }
 0x331   : > { %v4294_v10 = vpop.f32.mrf.mxu0  ;;  %4551 = vmatmul.mubr.bf16.vlgmr.msra.gmra.mxu0 %v6890_v11  ;;  %v4337_v13 = vpop.f32.mrf.mxu1  ;;  %4594 = vmatmul.mubr.bf16.vlgmr.msra.gmra.mxu1 %v7468_v1  ;;  %v1243_v11 = vld [vmem:[%s7360_s1 + $0xc58] sm:$0xff] }
 0x332   : > { %v4295_v12 = vadd.f32 %v4294_v10, %v7866_v23  ;;  %4605 = vmatpush1.bf16.msra.mxu0 %v6231_v59  ;;  %4648 = vmatpush1.bf16.msra.mxu1 %v6359_v61  ;;  %v1143_v23 = vld [vmem:[%s7360_s1 + $0x938] sm:$0xff]  ;;  %v6199_v61 = vcombine.low %v1131_v43, %v1135_v48 }
 0x333   : > { %v7944_v17 = vpop.f32.mrf.mxu0  ;;  %4606 = vmatprep.subr.bf16.mxu0 %v6224_v63  ;;  %v7946_v27 = vpop.f32.mrf.mxu1  ;;  %4649 = vmatprep.subr.bf16.mxu1 %v6352_v3  ;;  %v6208_v45 = vcombine.high %v1139_v31, %v1143_v23  ;;  %v6207_v52 = vcombine.low %v1139_v31, %v1143_v23  ;;  %v1255_v59 = vld [vmem:[%s7360_s1 + $0xcb8] sm:$0xff]  ;;  %v6327_v63 = vcombine.low %v1259_v49, %v1263_v50 }
 0x334   : > { %v4338_v26 = vadd.f32 %v4337_v13, %v4295_v12  ;;  %4636 = vmatprep.mubr.bf16.mxu0 %v6891_v32  ;;  %4679 = vmatprep.mubr.bf16.mxu1 %v6892_v24  ;;  %v6192_v3 = vcombine.high %v1123_v35, %v1127_v57  ;;  %v6320_v5 = vcombine.high %v1251_v8, %v1255_v59  ;;  %v1119_v10 = vld [vmem:[%s7360_s1 + $0x878] sm:$0xff] }
 0x335   : > { %v4298_v1 = vpop.f32.mrf.mxu0  ;;  %v4341_v58 = vpop.f32.mrf.mxu1  ;;  %v6319_v12 = vcombine.low %v1251_v8, %v1255_v59  ;;  %v6184_v13 = vcombine.high %v1115_v7, %v1119_v10  ;;  %v6183_v31 = vcombine.low %v1115_v7, %v1119_v10  ;;  %v6311_v23 = vcombine.low %v1243_v11, %v1247_v39  ;;  %v1355_v24 = vld [vmem:[%s7360_s1 + $0xfd8] sm:$0xff] }
 0x336   : > { %v4299_v41 = vadd.f32 %v4298_v1, %v7876_v44  ;;  %4607 = vmatpush1.bf16.msra.mxu0 %v6223_v14  ;;  %4650 = vmatpush1.bf16.msra.mxu1 %v6351_v21  ;;  %v4692_v51 = vmax.f32 %v4338_v26, 0.0  ;;  %v6312_v14 = vcombine.high %v1243_v11, %v1247_v39  ;;  %v1107_v21 = vld [vmem:[%s7360_s1 + $0x818] sm:$0xff]  ;;  %v6295_v49 = vcombine.low %v1227_v34, %v1231_v36 }
 0x337   : > { %4608 = vmatprep.subr.bf16.mxu0 %v6216_v22  ;;  %4651 = vmatprep.subr.bf16.mxu1 %v6344_v29  ;;  %v1111_v22 = vld [vmem:[%s7360_s1 + $0x838] sm:$0xff] }
 0x338   : > { %v4342_v46 = vadd.f32 %v4341_v58, %v4299_v41  ;;  %v1235_v26 = vld [vmem:[%s7360_s1 + $0xc18] sm:$0xff]  ;;  %v6176_v32 = vcombine.high %v1107_v21, %v1111_v22 }
 0x339   : > { %v1239_v29 = vld [vmem:[%s7360_s1 + $0xc38] sm:$0xff] }
 0x33a   : > { %v4700_v44 = vmax.f32 %v4342_v46, 0.0  ;;  %4609 = vmatpush1.bf16.msra.mxu0 %v6215_v42  ;;  %4652 = vmatpush1.bf16.msra.mxu1 %v6343_v62  ;;  %v6304_v1 = vcombine.high %v1235_v26, %v1239_v29  ;;  %v1359_v41 = vld [vmem:[%s7360_s1 + $0xff8] sm:$0xff]  ;;  %v6175_v42 = vcombine.low %v1107_v21, %v1111_v22  ;;  %v6303_v58 = vcombine.low %v1235_v26, %v1239_v29 }
 0x33b   : > { %4610 = vmatprep.subr.bf16.mxu0 %v6208_v45  ;;  %4653 = vmatprep.subr.bf16.mxu1 %v6336_v47  ;;  %v6296_v62 = vcombine.high %v1227_v34, %v1231_v36  ;;  %v6424_v45 = vcombine.high %v1355_v24, %v1359_v41  ;;  %v1219_v46 = vld [vmem:[%s7360_s1 + $0xb98] sm:$0xff]  ;;  %v6423_v50 = vcombine.low %v1355_v24, %v1359_v41  ;;  %v1376_v22 = vsub.s32 3, %v7673_v18  ;;  %v7996_v34 = vld [vmem:[%s7366_s22] sm:$0xff] }
 0x33c   : > { %v7957_v54 = vpack.c.bf16 %v4700_v44, %v4692_v51  ;;  %v1223_v47 = vld [vmem:[%s7360_s1 + $0xbb8] sm:$0xff] }
 0x33d   : > { %v1347_v43 = vld [vmem:[%s7360_s1 + $0xf98] sm:$0xff]  ;;  %v6288_v51 = vcombine.high %v1219_v46, %v1223_v47  ;;  %v6287_v35 = vcombine.low %v1219_v46, %v1223_v47 }
 0x33e   : > { %4611 = vmatpush1.bf16.msra.mxu0 %v6207_v52  ;;  %4654 = vmatpush1.bf16.msra.mxu1 %v6335_v33  ;;  %v1351_v48 = vld [vmem:[%s7360_s1 + $0xfb8] sm:$0xff] }
 0x33f   : > { %4612 = vmatprep.subr.bf16.mxu0 %v6200_v53  ;;  %4655 = vmatprep.subr.bf16.mxu1 %v6328_v56  ;;  %v6416_v44 = vcombine.high %v1347_v43, %v1351_v48  ;;  %v1211_v52 = vld [vmem:[%s7360_s1 + $0xb58] sm:$0xff]  ;;  %v6415_v57 = vcombine.low %v1347_v43, %v1351_v48 }
 0x340   : > { %v1215_v33 = vld [vmem:[%s7360_s1 + $0xb78] sm:$0xff] }
 0x341   : > { %v1339_v53 = vld [vmem:[%s7360_s1 + $0xf58] sm:$0xff]  ;;  %v6280_v8 = vcombine.high %v1211_v52, %v1215_v33  ;;  %v6279_v7 = vcombine.low %v1211_v52, %v1215_v33 }
 0x342   : > { %4613 = vmatpush1.bf16.msra.mxu0 %v6199_v61  ;;  %4656 = vmatpush1.bf16.msra.mxu1 %v6327_v63  ;;  %v1343_v56 = vld [vmem:[%s7360_s1 + $0xf78] sm:$0xff] }
 0x343   : > { %4614 = vmatprep.subr.bf16.mxu0 %v6192_v3  ;;  %4657 = vmatprep.subr.bf16.mxu1 %v6320_v5  ;;  %v6408_v59 = vcombine.high %v1339_v53, %v1343_v56  ;;  %v1203_v61 = vld [vmem:[%s7360_s1 + $0xb18] sm:$0xff]  ;;  %v6407_v10 = vcombine.low %v1339_v53, %v1343_v56  ;;  %v4300_v53 = vpop.f32.mrf.mxu0 }
 0x344   : > { %v1207_v63 = vld [vmem:[%s7360_s1 + $0xb38] sm:$0xff] }
 0x345   : > { %v1331_v3 = vld [vmem:[%s7360_s1 + $0xf18] sm:$0xff]  ;;  %v6272_v11 = vcombine.high %v1203_v61, %v1207_v63  ;;  %v6271_v26 = vcombine.low %v1203_v61, %v1207_v63 }
 0x346   : > { %4615 = vmatpush1.bf16.msra.mxu0 %v6191_v30  ;;  %4658 = vmatpush1.bf16.msra.mxu1 %v6319_v12  ;;  %v1335_v5 = vld [vmem:[%s7360_s1 + $0xf38] sm:$0xff] }
 0x347   : > { %4616 = vmatprep.subr.bf16.mxu0 %v6184_v13  ;;  %4659 = vmatprep.subr.bf16.mxu1 %v6312_v14  ;;  %v6400_v39 = vcombine.high %v1331_v3, %v1335_v5  ;;  %v1195_v30 = vld [vmem:[%s7360_s1 + $0xad8] sm:$0xff]  ;;  %v1368_v13 = vsub.s32 1, %v7673_v18  ;;  %v6399_v29 = vcombine.low %v1331_v3, %v1335_v5 }
 0x348   : > { %v1199_v12 = vld [vmem:[%s7360_s1 + $0xaf8] sm:$0xff] }
 0x349   : > { %v1323_v14 = vld [vmem:[%s7360_s1 + $0xed8] sm:$0xff]  ;;  %v1369_v36 = vrot.slane %v7996_v34, %v1368_v13 }
 0x34a   : > { %4617 = vmatpush1.bf16.msra.mxu0 %v6183_v31  ;;  %4660 = vmatpush1.bf16.msra.mxu1 %v6311_v23  ;;  %v1327_v21 = vld [vmem:[%s7360_s1 + $0xef8] sm:$0xff]  ;;  %v6264_v31 = vcombine.high %v1195_v30, %v1199_v12 }
 0x34b   : > { %4618 = vmatprep.subr.bf16.mxu0 %v6176_v32  ;;  %4661 = vmatprep.subr.bf16.mxu1 %v6304_v1  ;;  %v6392_v23 = vcombine.high %v1323_v14, %v1327_v21  ;;  %v1187_v32 = vld [vmem:[%s7360_s1 + $0xa98] sm:$0xff] }
 0x34c   : > { %v1191_v1 = vld [vmem:[%s7360_s1 + $0xab8] sm:$0xff] }
 0x34d   : > { %v1315_v24 = vld [vmem:[%s7360_s1 + $0xe98] sm:$0xff]  ;;  %v6256_v46 = vcombine.high %v1187_v32, %v1191_v1 }
 0x34e   : > { %4619 = vmatpush1.bf16.msra.mxu0 %v6175_v42  ;;  %4662 = vmatpush1.bf16.msra.mxu1 %v6303_v58  ;;  %v1319_v41 = vld [vmem:[%s7360_s1 + $0xeb8] sm:$0xff]  ;;  %v1377_v42 = vrot.slane %v7996_v34, %v1376_v22  ;;  %v6263_v58 = vcombine.low %v1195_v30, %v1199_v12 }
 0x34f   : > { %4620 = vmatprep.subr.bf16.mxu0 %v6296_v62  ;;  %4663 = vmatprep.subr.bf16.mxu1 %v6424_v45  ;;  %v4043_v62 = vadd.f32 %v7768_v16, %v1369_v36  ;;  %v6391_v45 = vcombine.low %v1323_v14, %v1327_v21  ;;  %v6384_v43 = vcombine.high %v1315_v24, %v1319_v41  ;;  %v1179_v48 = vld [vmem:[%s7360_s1 + $0xa58] sm:$0xff]  ;;  %v6694_v14 = vld [vmem:[%s7368_s7 + $0x74] ss:$8 sps:$4 sm:$0xff]  }
 0x350   : > { %v4215_v47 = vadd.f32 %v7934_v60, %v1377_v42  ;;  %v4211_v52 = vadd.f32 %v7864_v19, %v1377_v42  ;;  %v6255_v16 = vcombine.low %v1187_v32, %v1191_v1  ;;  %v6383_v60 = vcombine.low %v1315_v24, %v1319_v41  ;;  %v1299_v61 = vld [vmem:[%s7360_s1 + $0xe18] sm:$0xff]  ;;  %v6706_v41 = vld [vmem:[%s7368_s7 + $0x54] ss:$8 sps:$4 sm:$0xff]  }
 0x351   : > { %v4086_v33 = vadd.f32 %v7770_v20, %v4043_v62  ;;  %v1303_v63 = vld [vmem:[%s7360_s1 + $0xe38] sm:$0xff]  ;;  %v6709_v42 = vld [vmem:[%s7368_s7 + $0x154] ss:$8 sps:$4 sm:$0xff]  }
 0x352   : > { %4621 = vmatpush2.bf16.msra.mxu0 %v6295_v49  ;;  %4664 = vmatpush2.bf16.msra.mxu1 %v6423_v50  ;;  %v1183_v49 = vld [vmem:[%s7360_s1 + $0xa78] sm:$0xff]  ;;  %v4039_v50 = vadd.f32 %v7696_v55, %v1369_v36  ;;  %v4254_v3 = vadd.f32 %v7868_v25, %v4211_v52  ;;  %v6367_v12 = vcombine.low %v1299_v61, %v1303_v63 }
 0x353   : > { %4622 = vmatprep.subr.bf16.mxu0 %v6288_v51  ;;  %4665 = vmatprep.subr.bf16.mxu1 %v6416_v44  ;;  %v1307_v51 = vld [vmem:[%s7360_s1 + $0xe58] sm:$0xff]  ;;  %v6248_v56 = vcombine.high %v1179_v48, %v1183_v49  ;;  %v4129_v19 = vadd.f32 %v7850_v2, %v4086_v33  ;;  %v6247_v5 = vcombine.low %v1179_v48, %v1183_v49  ;;  %v6716_v48 = vld [vmem:[%s7368_s7 + $0x30] ss:$8 sps:$4 sm:$0xff]   ;;  %v6733_v33 = vld [vmem:[%s7368_s7 + $0x114] ss:$8 sps:$4 sm:$0xff]  }
 0x354   : > { %v1311_v44 = vld [vmem:[%s7360_s1 + $0xe78] sm:$0xff]  ;;  %v6719_v49 = vld [vmem:[%s7368_s7 + $0x130] ss:$8 sps:$4 sm:$0xff]  }
 0x355   : > { %v6376_v55 = vcombine.high %v1307_v51, %v1311_v44  ;;  %v4172_v2 = vadd.f32 %v7852_v6, %v4129_v19  ;;  %v6698_v36 = vld [vmem:[%s7368_s7 + $0x60] ss:$8 sps:$4 sm:$0xff]   ;;  %v6715_v62 = vld [vmem:[%s7368_s7 + $0x144] ss:$8 sps:$4 sm:$0xff]   ;;  %v6740_v19 = vld [vmem:[%s7368_s7 + $0xf0] ss:$8 sps:$4 sm:$0xff]  }
 0x356   : > { %4623 = vmatpush2.bf16.msra.mxu0 %v6287_v35  ;;  %4666 = vmatpush2.bf16.msra.mxu1 %v6415_v57  ;;  %v4258_v35 = vadd.f32 %v7936_v0, %v4215_v47  ;;  %v1171_v57 = vld [vmem:[%s7360_s1 + $0xa18] sm:$0xff]  ;;  %v6375_v0 = vcombine.low %v1307_v51, %v1311_v44  ;;  %v6718_v47 = vld [vmem:[%s7368_s7 + $0x34] ss:$8 sps:$4 sm:$0xff]  }
 0x357   : > { %4624 = vmatprep.subr.bf16.mxu0 %v6280_v8  ;;  %4667 = vmatprep.subr.bf16.mxu1 %v6408_v59  ;;  %v1175_v8 = vld [vmem:[%s7360_s1 + $0xa38] sm:$0xff]  ;;  %v4082_v59 = vadd.f32 %v7700_v4, %v4039_v50  ;;  %v6368_v4 = vcombine.high %v1299_v61, %v1303_v63  ;;  %v4699_v22 = vmax.f32 %v4172_v2, 0.0  ;;  %v6743_v61 = vld [vmem:[%s7368_s7 + $0x1f0] ss:$8 sps:$4 sm:$0xff]  }
 0x358   : > { %v4301_v20 = vadd.f32 %v4300_v53, %v4258_v35  ;;  %v6239_v30 = vcombine.low %v1171_v57, %v1175_v8  ;;  %v6701_v24 = vld [vmem:[%s7368_s7 + $0x160] ss:$8 sps:$4 sm:$0xff]   ;;  %v6724_v50 = vld [vmem:[%s7368_s7 + $0x24] ss:$8 sps:$4 sm:$0xff]   ;;  %v6728_v53 = vld [vmem:[%s7368_s7 + $0x10] ss:$8 sps:$4 sm:$0xff]  }
 0x359   : > { %v6727_v51 = vld [vmem:[%s7368_s7 + $0x124] ss:$8 sps:$4 sm:$0xff]   ;;  %v6722_v44 = vld [vmem:[%s7368_s7 + $0x20] ss:$8 sps:$4 sm:$0xff]  }
 0x35a   : > { %4625 = vmatpush2.bf16.msra.mxu0 %v6279_v7  ;;  %4668 = vmatpush2.bf16.msra.mxu1 %v6407_v10  ;;  %v4125_v7 = vadd.f32 %v7779_v38, %v4082_v59  ;;  %v6240_v10 = vcombine.high %v1171_v57, %v1175_v8  ;;  %v6725_v52 = vld [vmem:[%s7368_s7 + $0x120] ss:$8 sps:$4 sm:$0xff]   ;;  %v6739_v35 = vld [vmem:[%s7368_s7 + $0x104] ss:$8 sps:$4 sm:$0xff]   ;;  %v6742_v8 = vld [vmem:[%s7368_s7 + $0xf4] ss:$8 sps:$4 sm:$0xff]  }
 0x35b   : > { %4626 = vmatprep.subr.bf16.mxu0 %v6272_v11  ;;  %4669 = vmatprep.subr.bf16.mxu1 %v6400_v39  ;;  %v4297_v11 = vadd.f32 %v7944_v17, %v4254_v3  ;;  %v4343_v39 = vpop.f32.mrf.mxu1  ;;  %v6697_v17 = vld [vmem:[%s7368_s7 + $0x174] ss:$8 sps:$4 sm:$0xff]   ;;  %v6737_v57 = vld [vmem:[%s7368_s7 + $0x100] ss:$8 sps:$4 sm:$0xff]   ;;  %v6748_v63 = vld [vmem:[%s7368_s7 + $0xe4] ss:$8 sps:$4 sm:$0xff]  }
 0x35c   : > { %v4344_v25 = vadd.f32 %v4343_v39, %v4301_v20  ;;  %v4168_v38 = vadd.f32 %v7781_v37, %v4125_v7  ;;  %v6695_v37 = vld [vmem:[%s7368_s7 + $0x170] ss:$8 sps:$4 sm:$0xff]   ;;  %v6745_v59 = vld [vmem:[%s7368_s7 + $0x1f4] ss:$8 sps:$4 sm:$0xff]   ;;  %v6751_v3 = vld [vmem:[%s7368_s7 + $0x1e4] ss:$8 sps:$4 sm:$0xff]  }
 0x35d   : > { %v4340_v21 = vadd.f32 %v7946_v27, %v4297_v11  ;;  %v6703_v27 = vld [vmem:[%s7368_s7 + $0x164] ss:$8 sps:$4 sm:$0xff]   ;;  %v6746_v20 = vld [vmem:[%s7368_s7 + $0xe0] ss:$8 sps:$4 sm:$0xff]   ;;  %v6754_v7 = vld [vmem:[%s7368_s7 + $0xd4] ss:$8 sps:$4 sm:$0xff]  }
 0x35e   : > { %4627 = vmatpush2.bf16.msra.mxu0 %v6271_v26  ;;  %4670 = vmatpush2.bf16.msra.mxu1 %v6399_v29  ;;  %v4701_v6 = vmax.f32 %v4344_v25, 0.0  ;;  %v6692_v26 = vld [vmem:[%s7368_s7 + $0x70] ss:$8 sps:$4 sm:$0xff]   ;;  %v4691_v29 = vmax.f32 %v4168_v38, 0.0  ;;  %v6763_v2 = vld [vmem:[%s7368_s7 + $0x1c4] ss:$8 sps:$4 sm:$0xff]  }
 0x35f   : > { %4628 = vmatprep.subr.bf16.mxu0 %v6264_v31  ;;  %4671 = vmatprep.subr.bf16.mxu1 %v6392_v23  ;;  %v4693_v31 = vmax.f32 %v4340_v21, 0.0  ;;  %v6700_v23 = vld [vmem:[%s7368_s7 + $0x64] ss:$8 sps:$4 sm:$0xff]   ;;  %v6755_v11 = vld [vmem:[%s7368_s7 + $0x1d0] ss:$8 sps:$4 sm:$0xff]  }
 0x360   : > { %v4707_v32 = vpack.c.bf16 %v4699_v22, %v4691_v29  ;;  %v6758_v39 = vld [vmem:[%s7368_s7 + $0xc0] ss:$8 sps:$4 sm:$0xff]   ;;  %v6769_v38 = vld [vmem:[%s7368_s7 + $0x1b4] ss:$8 sps:$4 sm:$0xff]   ;;  %v6772_v21 = vld [vmem:[%s7368_s7 + $0xa4] ss:$8 sps:$4 sm:$0xff]  }
 0x361   : > { %v4709_v1 = vpack.c.bf16 %v4701_v6, %v4693_v31  ;;  %v6761_v25 = vld [vmem:[%s7368_s7 + $0x1c0] ss:$8 sps:$4 sm:$0xff]   ;;  %v6778_v29 = vld [vmem:[%s7368_s7 + $0x94] ss:$8 sps:$4 sm:$0xff]  }
 0x362   : > { %4629 = vmatpush2.bf16.msra.mxu0 %v6263_v58  ;;  %4672 = vmatpush2.bf16.msra.mxu1 %v6391_v45  ;;  %v6712_v58 = vld [vmem:[%s7368_s7 + $0x44] ss:$8 sps:$4 sm:$0xff]   ;;  %v6710_v45 = vld [vmem:[%s7368_s7 + $0x40] ss:$8 sps:$4 sm:$0xff]   ;;  %v6781_v31 = vld [vmem:[%s7368_s7 + $0x194] ss:$8 sps:$4 sm:$0xff]  }
 0x363   : > { %4630 = vmatprep.subr.bf16.mxu0 %v6256_v46  ;;  %4673 = vmatprep.subr.bf16.mxu1 %v6384_v43  ;;  %v6713_v46 = vld [vmem:[%s7368_s7 + $0x140] ss:$8 sps:$4 sm:$0xff]   ;;  %v6721_v43 = vld [vmem:[%s7368_s7 + $0x134] ss:$8 sps:$4 sm:$0xff]  }
 0x364   : > { %v6770_v22 = vld [vmem:[%s7368_s7 + $0xa0] ss:$8 sps:$4 sm:$0xff]  }
 0x366   : > { %4631 = vmatpush2.bf16.msra.mxu0 %v6255_v16  ;;  %4674 = vmatpush2.bf16.msra.mxu1 %v6383_v60  ;;  %v6730_v16 = vld [vmem:[%s7368_s7 + $0x14] ss:$8 sps:$4 sm:$0xff]   ;;  %v6731_v60 = vld [vmem:[%s7368_s7 + $0x110] ss:$8 sps:$4 sm:$0xff]  }
 0x367   : > { %4632 = vmatprep.subr.bf16.mxu0 %v6248_v56  ;;  %4675 = vmatprep.subr.bf16.mxu1 %v6376_v55  ;;  %v6736_v56 = vld [vmem:[%s7368_s7 + $0x4] ss:$8 sps:$4 sm:$0xff]   ;;  %v6734_v55 = vld [vmem:[%s7368_s7] ss:$8 sps:$4 sm:$0xff]  }
 0x36a   : > { %4633 = vmatpush2.bf16.msra.mxu0 %v6247_v5  ;;  %4676 = vmatpush2.bf16.msra.mxu1 %v6375_v0  ;;  %v6749_v5 = vld [vmem:[%s7368_s7 + $0x1e0] ss:$8 sps:$4 sm:$0xff]   ;;  %v6757_v0 = vld [vmem:[%s7368_s7 + $0x1d4] ss:$8 sps:$4 sm:$0xff]  }
 0x36b   : > { %4634 = vmatprep.subr.bf16.mxu0 %v6240_v10  ;;  %4677 = vmatprep.subr.bf16.mxu1 %v6368_v4  ;;  %v6752_v10 = vld [vmem:[%s7368_s7 + $0xd0] ss:$8 sps:$4 sm:$0xff]   ;;  %v6760_v4 = vld [vmem:[%s7368_s7 + $0xc4] ss:$8 sps:$4 sm:$0xff]  }
 0x36e   : > { %4635 = vmatpush2.bf16.msra.mxu0 %v6239_v30  ;;  %4678 = vmatpush2.bf16.msra.mxu1 %v6367_v12  ;;  %v6766_v30 = vld [vmem:[%s7368_s7 + $0xb4] ss:$8 sps:$4 sm:$0xff]   ;;  %v6764_v12 = vld [vmem:[%s7368_s7 + $0xb0] ss:$8 sps:$4 sm:$0xff]  }
 0x36f   : > { %5486 = vmatprep.subr.bf16.mxu0 %v6694_v14  ;;  %5529 = vmatprep.subr.bf16.mxu1 %v6697_v17  ;;  %v6767_v14 = vld [vmem:[%s7368_s7 + $0x1b0] ss:$8 sps:$4 sm:$0xff]   ;;  %v6775_v17 = vld [vmem:[%s7368_s7 + $0x1a4] ss:$8 sps:$4 sm:$0xff]  }
 0x371   : > { %4637 = vmatmul.mubr.bf16.vlgmr.msra.gmra.mxu0 %v7856_v40  ;;  %4680 = vmatmul.mubr.bf16.vlgmr.msra.gmra.mxu1 %v7861_v15  ;;  %v6704_v40 = vld [vmem:[%s7368_s7 + $0x50] ss:$8 sps:$4 sm:$0xff]   ;;  %v8083_v6 = vpop.f32.mrf.mxu0 }
 0x372   : > { %5487 = vmatpush1.bf16.msra.mxu0 %v6692_v26  ;;  %5518 = vmatprep.mubr.bf16.mxu0 %v4707_v32  ;;  %v6707_v15 = vld [vmem:[%s7368_s7 + $0x150] ss:$8 sps:$4 sm:$0xff]   ;;  %v6773_v26 = vld [vmem:[%s7368_s7 + $0x1a0] ss:$8 sps:$4 sm:$0xff]  }
 0x373   : > { %5530 = vmatpush1.bf16.msra.mxu1 %v6695_v37  ;;  %5561 = vmatprep.mubr.bf16.mxu1 %v4709_v1  ;;  %v8087_v37 = vpop.f32.mrf.mxu1  ;;  %v6776_v32 = vld [vmem:[%s7368_s7 + $0x90] ss:$8 sps:$4 sm:$0xff]  }
 0x374   : > { %5488 = vmatprep.subr.bf16.mxu0 %v6700_v23  ;;  %5531 = vmatprep.subr.bf16.mxu1 %v6703_v27  ;;  %v1384_v23 = vsub.s32 5, %v7673_v18  ;;  %v4382_v27 = vpop.f32.mrf.mxu0  ;;  %v6779_v1 = vld [vmem:[%s7368_s7 + $0x190] ss:$8 sps:$4 sm:$0xff]  }
 0x376   : > { %5489 = vmatpush1.bf16.msra.mxu0 %v6698_v36  ;;  %v6784_v36 = vld [vmem:[%s7368_s7 + $0x84] ss:$8 sps:$4 sm:$0xff]  }
 0x377   : > { %5532 = vmatpush1.bf16.msra.mxu1 %v6701_v24  ;;  %5490 = vmatprep.subr.bf16.mxu0 %v6706_v41  ;;  %v4425_v24 = vpop.f32.mrf.mxu1  ;;  %v6787_v41 = vld [vmem:[%s7368_s7 + $0x184] ss:$8 sps:$4 sm:$0xff]  }
 0x378   : > { %5533 = vmatprep.subr.bf16.mxu1 %v6709_v42  ;;  %v1385_v42 = vrot.slane %v7996_v34, %v1384_v23  ;;  %v6856_v23 = vld [vmem:[%s7368_s7 + $0x314] ss:$8 sps:$4 sm:$0xff]  }
 0x37a   : > { %5491 = vmatpush1.bf16.msra.mxu0 %v6704_v40  ;;  %v6782_v40 = vld [vmem:[%s7368_s7 + $0x80] ss:$8 sps:$4 sm:$0xff]  }
 0x37b   : > { %5534 = vmatpush1.bf16.msra.mxu1 %v6707_v15  ;;  %5492 = vmatprep.subr.bf16.mxu0 %v6712_v58  ;;  %v8097_v15 = vpop.f32.mrf.mxu0  ;;  %v6785_v58 = vld [vmem:[%s7368_s7 + $0x180] ss:$8 sps:$4 sm:$0xff]  }
 0x37c   : > { %5535 = vmatprep.subr.bf16.mxu1 %v6715_v62  ;;  %v6790_v62 = vld [vmem:[%s7368_s7 + $0x274] ss:$8 sps:$4 sm:$0xff]  }
 0x37e   : > { %5493 = vmatpush1.bf16.msra.mxu0 %v6710_v45  ;;  %v8101_v45 = vpop.f32.mrf.mxu1 }
 0x37f   : > { %5536 = vmatpush1.bf16.msra.mxu1 %v6713_v46  ;;  %5494 = vmatprep.subr.bf16.mxu0 %v6718_v47  ;;  %v6838_v46 = vld [vmem:[%s7368_s7 + $0x374] ss:$8 sps:$4 sm:$0xff]   ;;  %v4383_v47 = vadd.f32 %v4382_v27, %v1385_v42  ;;  %v6811_v27 = vld [vmem:[%s7368_s7 + $0x204] ss:$8 sps:$4 sm:$0xff]  }
 0x380   : > { %5537 = vmatprep.subr.bf16.mxu1 %v6721_v43  ;;  %v6788_v43 = vld [vmem:[%s7368_s7 + $0x270] ss:$8 sps:$4 sm:$0xff]  }
 0x382   : > { %5495 = vmatpush1.bf16.msra.mxu0 %v6716_v48  ;;  %v4386_v48 = vpop.f32.mrf.mxu0 }
 0x383   : > { %5538 = vmatpush1.bf16.msra.mxu1 %v6719_v49  ;;  %5496 = vmatprep.subr.bf16.mxu0 %v6724_v50  ;;  %v6793_v49 = vld [vmem:[%s7368_s7 + $0x264] ss:$8 sps:$4 sm:$0xff]   ;;  %v6836_v50 = vld [vmem:[%s7368_s7 + $0x370] ss:$8 sps:$4 sm:$0xff]  }
 0x384   : > { %5539 = vmatprep.subr.bf16.mxu1 %v6727_v51  ;;  %v4429_v51 = vpop.f32.mrf.mxu1 }
 0x386   : > { %5497 = vmatpush1.bf16.msra.mxu0 %v6722_v44  ;;  %v6841_v44 = vld [vmem:[%s7368_s7 + $0x364] ss:$8 sps:$4 sm:$0xff]  }
 0x387   : > { %5540 = vmatpush1.bf16.msra.mxu1 %v6725_v52  ;;  %5498 = vmatprep.subr.bf16.mxu0 %v6730_v16  ;;  %v4426_v16 = vadd.f32 %v4425_v24, %v4383_v47  ;;  %v6809_v24 = vld [vmem:[%s7368_s7 + $0x200] ss:$8 sps:$4 sm:$0xff]   ;;  %v6865_v47 = vld [vmem:[%s7368_s7 + $0x3e4] ss:$8 sps:$4 sm:$0xff]  }
 0x388   : > { %5541 = vmatprep.subr.bf16.mxu1 %v6733_v33  ;;  %v4387_v33 = vadd.f32 %v4386_v48, %v1385_v42  ;;  %v6857_v42 = vld [vmem:[%s7368_s7 + $0x300] ss:$8 sps:$4 sm:$0xff]   ;;  %v6820_v48 = vld [vmem:[%s7368_s7 + $0x2d4] ss:$8 sps:$4 sm:$0xff]  }
 0x38a   : > { %5499 = vmatpush1.bf16.msra.mxu0 %v6728_v53 }
 0x38b   : > { %5542 = vmatpush1.bf16.msra.mxu1 %v6731_v60  ;;  %5500 = vmatprep.subr.bf16.mxu0 %v6736_v56  ;;  %v6791_v60 = vld [vmem:[%s7368_s7 + $0x260] ss:$8 sps:$4 sm:$0xff]  }
 0x38c   : > { %5543 = vmatprep.subr.bf16.mxu1 %v6739_v35  ;;  %v6796_v35 = vld [vmem:[%s7368_s7 + $0x254] ss:$8 sps:$4 sm:$0xff]  }
 0x38e   : > { %5501 = vmatpush1.bf16.msra.mxu0 %v6734_v55  ;;  %v6839_v55 = vld [vmem:[%s7368_s7 + $0x360] ss:$8 sps:$4 sm:$0xff]  }
 0x38f   : > { %5544 = vmatpush1.bf16.msra.mxu1 %v6737_v57  ;;  %5502 = vmatprep.subr.bf16.mxu0 %v6742_v8 }
 0x390   : > { %5545 = vmatprep.subr.bf16.mxu1 %v6745_v59 }
 0x392   : > { %5503 = vmatpush2.bf16.msra.mxu0 %v6740_v19  ;;  %v4430_v19 = vadd.f32 %v4429_v51, %v4387_v33  ;;  %v6818_v51 = vld [vmem:[%s7368_s7 + $0x2d0] ss:$8 sps:$4 sm:$0xff]  }
 0x393   : > { %5546 = vmatpush2.bf16.msra.mxu1 %v6743_v61  ;;  %5504 = vmatprep.subr.bf16.mxu0 %v6748_v63  ;;  %v6794_v61 = vld [vmem:[%s7368_s7 + $0x250] ss:$8 sps:$4 sm:$0xff]  }
 0x394   : > { %5547 = vmatprep.subr.bf16.mxu1 %v6751_v3  ;;  %v6799_v3 = vld [vmem:[%s7368_s7 + $0x244] ss:$8 sps:$4 sm:$0xff]   ;;  %v6866_v33 = vld [vmem:[%s7368_s7 + $0x3d0] ss:$8 sps:$4 sm:$0xff]  }
 0x396   : > { %5505 = vmatpush2.bf16.msra.mxu0 %v6746_v20  ;;  %v6842_v20 = vld [vmem:[%s7368_s7 + $0x350] ss:$8 sps:$4 sm:$0xff]  }
 0x397   : > { %5548 = vmatpush2.bf16.msra.mxu1 %v6749_v5  ;;  %5506 = vmatprep.subr.bf16.mxu0 %v6754_v7 }
 0x398   : > { %5549 = vmatprep.subr.bf16.mxu1 %v6757_v0  ;;  %v6847_v0 = vld [vmem:[%s7368_s7 + $0x344] ss:$8 sps:$4 sm:$0xff]  }
 0x39a   : > { %5507 = vmatpush2.bf16.msra.mxu0 %v6752_v10 }
 0x39b   : > { %5550 = vmatpush2.bf16.msra.mxu1 %v6755_v11  ;;  %5508 = vmatprep.subr.bf16.mxu0 %v6760_v4  ;;  %v6797_v4 = vld [vmem:[%s7368_s7 + $0x240] ss:$8 sps:$4 sm:$0xff]  }
 0x39c   : > { %5551 = vmatprep.subr.bf16.mxu1 %v6763_v2  ;;  %v6802_v2 = vld [vmem:[%s7368_s7 + $0x234] ss:$8 sps:$4 sm:$0xff]  }
 0x39e   : > { %5509 = vmatpush2.bf16.msra.mxu0 %v6758_v39  ;;  %v6845_v39 = vld [vmem:[%s7368_s7 + $0x340] ss:$8 sps:$4 sm:$0xff]  }
 0x39f   : > { %5552 = vmatpush2.bf16.msra.mxu1 %v6761_v25  ;;  %5510 = vmatprep.subr.bf16.mxu0 %v6766_v30 }
 0x3a0   : > { %5553 = vmatprep.subr.bf16.mxu1 %v6769_v38  ;;  %v6850_v38 = vld [vmem:[%s7368_s7 + $0x334] ss:$8 sps:$4 sm:$0xff]  }
 0x3a2   : > { %5511 = vmatpush2.bf16.msra.mxu0 %v6764_v12 }
 0x3a3   : > { %5554 = vmatpush2.bf16.msra.mxu1 %v6767_v14  ;;  %5512 = vmatprep.subr.bf16.mxu0 %v6772_v21  ;;  %v6800_v14 = vld [vmem:[%s7368_s7 + $0x230] ss:$8 sps:$4 sm:$0xff]   ;;  %v6805_v21 = vld [vmem:[%s7368_s7 + $0x224] ss:$8 sps:$4 sm:$0xff]  }
 0x3a4   : > { %5555 = vmatprep.subr.bf16.mxu1 %v6775_v17  ;;  %v6848_v17 = vld [vmem:[%s7368_s7 + $0x330] ss:$8 sps:$4 sm:$0xff]  }
 0x3a6   : > { %5513 = vmatpush2.bf16.msra.mxu0 %v6770_v22  ;;  %v6853_v22 = vld [vmem:[%s7368_s7 + $0x324] ss:$8 sps:$4 sm:$0xff]  }
 0x3a7   : > { %5556 = vmatpush2.bf16.msra.mxu1 %v6773_v26  ;;  %5514 = vmatprep.subr.bf16.mxu0 %v6778_v29  ;;  %v6803_v26 = vld [vmem:[%s7368_s7 + $0x220] ss:$8 sps:$4 sm:$0xff]   ;;  %v6808_v29 = vld [vmem:[%s7368_s7 + $0x214] ss:$8 sps:$4 sm:$0xff]  }
 0x3a8   : > { %5557 = vmatprep.subr.bf16.mxu1 %v6781_v31  ;;  %v6851_v31 = vld [vmem:[%s7368_s7 + $0x320] ss:$8 sps:$4 sm:$0xff]  }
 0x3aa   : > { %5515 = vmatpush2.bf16.msra.mxu0 %v6776_v32  ;;  %v6806_v32 = vld [vmem:[%s7368_s7 + $0x210] ss:$8 sps:$4 sm:$0xff]  }
 0x3ab   : > { %5558 = vmatpush2.bf16.msra.mxu1 %v6779_v1  ;;  %5516 = vmatprep.subr.bf16.mxu0 %v6784_v36  ;;  %v6854_v1 = vld [vmem:[%s7368_s7 + $0x310] ss:$8 sps:$4 sm:$0xff]   ;;  %v6859_v36 = vld [vmem:[%s7368_s7 + $0x304] ss:$8 sps:$4 sm:$0xff]  }
 0x3ac   : > { %5559 = vmatprep.subr.bf16.mxu1 %v6787_v41  ;;  %v6814_v41 = vld [vmem:[%s7368_s7 + $0x2f4] ss:$8 sps:$4 sm:$0xff]  }
 0x3ae   : > { %5517 = vmatpush2.bf16.msra.mxu0 %v6782_v40  ;;  %v6862_v40 = vld [vmem:[%s7368_s7 + $0x3f4] ss:$8 sps:$4 sm:$0xff]  }
 0x3af   : > { %5560 = vmatpush2.bf16.msra.mxu1 %v6785_v58  ;;  %5572 = vmatprep.subr.bf16.mxu0 %v6790_v62  ;;  %v6812_v58 = vld [vmem:[%s7368_s7 + $0x2f0] ss:$8 sps:$4 sm:$0xff]   ;;  %v6817_v62 = vld [vmem:[%s7368_s7 + $0x2e4] ss:$8 sps:$4 sm:$0xff]  }
 0x3b0   : > { %5615 = vmatprep.subr.bf16.mxu1 %v6838_v46  ;;  %v6860_v46 = vld [vmem:[%s7368_s7 + $0x3f0] ss:$8 sps:$4 sm:$0xff]  }
 0x3b1   : > { %v8108_v52 = vpop.f32.mrf.mxu0  ;;  %5519 = vmatmul.mubr.bf16.vlgmr.msra.gmra.mxu0 %v7794_v9  ;;  %v8111_v53 = vpop.f32.mrf.mxu1  ;;  %v6844_v9 = vld [vmem:[%s7368_s7 + $0x354] ss:$8 sps:$4 sm:$0xff]  }
 0x3b2   : > { %5562 = vmatmul.mubr.bf16.vlgmr.msra.gmra.mxu1 %v7957_v54  ;;  %5573 = vmatpush1.bf16.msra.mxu0 %v6788_v43  ;;  %v6815_v43 = vld [vmem:[%s7368_s7 + $0x2e0] ss:$8 sps:$4 sm:$0xff]  }
 0x3b3   : > { %v4468_v56 = vpop.f32.mrf.mxu0  ;;  %5574 = vmatprep.subr.bf16.mxu0 %v6793_v49  ;;  %5616 = vmatpush1.bf16.msra.mxu1 %v6836_v50  ;;  %v4511_v8 = vpop.f32.mrf.mxu1  ;;  %v6863_v49 = vld [vmem:[%s7368_s7 + $0x3e0] ss:$8 sps:$4 sm:$0xff]   ;;  %v6868_v50 = vld [vmem:[%s7368_s7 + $0x3d4] ss:$8 sps:$4 sm:$0xff]  }
 0x3b4   : > { %v4469_v57 = vadd.f32 %v4468_v56, %v4426_v16  ;;  %5617 = vmatprep.subr.bf16.mxu1 %v6841_v44  ;;  %v1380_v44 = vsub.s32 4, %v7673_v18  ;;  %v6823_v16 = vld [vmem:[%s7368_s7 + $0x2c4] ss:$8 sps:$4 sm:$0xff]   ;;  %v6821_v56 = vld [vmem:[%s7368_s7 + $0x2c0] ss:$8 sps:$4 sm:$0xff]  }
 0x3b5   : > { %v8118_v59 = vpop.f32.mrf.mxu0  ;;  %v8120_v54 = vpop.f32.mrf.mxu1 }
 0x3b6   : > { %5575 = vmatpush1.bf16.msra.mxu0 %v6791_v60  ;;  %v4512_v5 = vadd.f32 %v4511_v8, %v4469_v57  ;;  %v6871_v60 = vld [vmem:[%s7368_s7 + $0x3c4] ss:$8 sps:$4 sm:$0xff]   ;;  %v6869_v57 = vld [vmem:[%s7368_s7 + $0x3c0] ss:$8 sps:$4 sm:$0xff]   ;;  %v6874_v8 = vld [vmem:[%s7368_s7 + $0x3b4] ss:$8 sps:$4 sm:$0xff]  }
 0x3b7   : > { %v4472_v63 = vpop.f32.mrf.mxu0  ;;  %5576 = vmatprep.subr.bf16.mxu0 %v6796_v35  ;;  %5618 = vmatpush1.bf16.msra.mxu1 %v6839_v55  ;;  %v4515_v10 = vpop.f32.mrf.mxu1  ;;  %v1381_v35 = vrot.slane %v7996_v34, %v1380_v44  ;;  %v6826_v55 = vld [vmem:[%s7368_s7 + $0x2b4] ss:$8 sps:$4 sm:$0xff]  }
 0x3b8   : > { %v4473_v7 = vadd.f32 %v4472_v63, %v4430_v19  ;;  %5619 = vmatprep.subr.bf16.mxu1 %v6844_v9  ;;  %v4695_v25 = vmax.f32 %v4512_v5, 0.0  ;;  %v6824_v19 = vld [vmem:[%s7368_s7 + $0x2b0] ss:$8 sps:$4 sm:$0xff]   ;;  %v6829_v63 = vld [vmem:[%s7368_s7 + $0x2a4] ss:$8 sps:$4 sm:$0xff]  }
 0x3b9   : > { %v4385_v9 = vadd.f32 %v8097_v15, %v1381_v35 }
 0x3ba   : > { %v4516_v11 = vadd.f32 %v4515_v10, %v4473_v7  ;;  %5577 = vmatpush1.bf16.msra.mxu0 %v6794_v61  ;;  %v4381_v61 = vadd.f32 %v8083_v6, %v1381_v35  ;;  %v6827_v7 = vld [vmem:[%s7368_s7 + $0x2a0] ss:$8 sps:$4 sm:$0xff]   ;;  %v6832_v6 = vld [vmem:[%s7368_s7 + $0x294] ss:$8 sps:$4 sm:$0xff]  }
 0x3bb   : > { %5578 = vmatprep.subr.bf16.mxu0 %v6799_v3  ;;  %5620 = vmatpush1.bf16.msra.mxu1 %v6842_v20  ;;  %v6872_v3 = vld [vmem:[%s7368_s7 + $0x3b0] ss:$8 sps:$4 sm:$0xff]   ;;  %v6877_v20 = vld [vmem:[%s7368_s7 + $0x3a4] ss:$8 sps:$4 sm:$0xff]   ;;  %v4428_v5 = vadd.f32 %v8101_v45, %v4385_v9  ;;  %v6875_v10 = vld [vmem:[%s7368_s7 + $0x3a0] ss:$8 sps:$4 sm:$0xff]  }
 0x3bc   : > { %v4703_v30 = vmax.f32 %v4516_v11, 0.0  ;;  %5621 = vmatprep.subr.bf16.mxu1 %v6847_v0  ;;  %v4424_v15 = vadd.f32 %v8087_v37, %v4381_v61  ;;  %v6880_v11 = vld [vmem:[%s7368_s7 + $0x394] ss:$8 sps:$4 sm:$0xff]   ;;  %v6830_v45 = vld [vmem:[%s7368_s7 + $0x290] ss:$8 sps:$4 sm:$0xff]  }
 0x3bd   : > { %v4471_v0 = vadd.f32 %v8118_v59, %v4428_v5  ;;  %v6878_v37 = vld [vmem:[%s7368_s7 + $0x390] ss:$8 sps:$4 sm:$0xff]   ;;  %v6883_v59 = vld [vmem:[%s7368_s7 + $0x384] ss:$8 sps:$4 sm:$0xff]  }
 0x3be   : > { %v4711_v12 = vpack.c.bf16 %v4703_v30, %v4695_v25  ;;  %5579 = vmatpush1.bf16.msra.mxu0 %v6797_v4  ;;  %v4467_v4 = vadd.f32 %v8108_v52, %v4424_v15  ;;  %v6833_v30 = vld [vmem:[%s7368_s7 + $0x280] ss:$8 sps:$4 sm:$0xff]  }
 0x3bf   : > { %5580 = vmatprep.subr.bf16.mxu0 %v6802_v2  ;;  %5622 = vmatpush1.bf16.msra.mxu1 %v6845_v39  ;;  %v4514_v2 = vadd.f32 %v8120_v54, %v4471_v0  ;;  %v6835_v39 = vld [vmem:[%s7368_s7 + $0x284] ss:$8 sps:$4 sm:$0xff]  }
 0x3c0   : > { %5604 = vmatprep.mubr.bf16.mxu0 %v4711_v12  ;;  %5623 = vmatprep.subr.bf16.mxu1 %v6850_v38  ;;  %v4510_v25 = vadd.f32 %v8111_v53, %v4467_v4  ;;  %v6881_v12 = vld [vmem:[%s7368_s7 + $0x380] ss:$8 sps:$4 sm:$0xff]  }
 0x3c1   : > { %v4702_v38 = vmax.f32 %v4514_v2, 0.0 }
 0x3c2   : > { %5581 = vmatpush1.bf16.msra.mxu0 %v6800_v14  ;;  %v4694_v52 = vmax.f32 %v4510_v25, 0.0 }
 0x3c3   : > { %5582 = vmatprep.subr.bf16.mxu0 %v6805_v21  ;;  %5624 = vmatpush1.bf16.msra.mxu1 %v6848_v17  ;;  %v1392_v17 = vsub.s32 7, %v7673_v18 }
 0x3c4   : > { %5625 = vmatprep.subr.bf16.mxu1 %v6853_v22  ;;  %v4710_v14 = vpack.c.bf16 %v4702_v38, %v4694_v52  ;;  %v1388_v22 = vsub.s32 6, %v7673_v18 }
 0x3c6   : > { %5583 = vmatpush1.bf16.msra.mxu0 %v6803_v26 }
 0x3c7   : > { %5584 = vmatprep.subr.bf16.mxu0 %v6808_v29  ;;  %5626 = vmatpush1.bf16.msra.mxu1 %v6851_v31  ;;  %v1393_v29 = vrot.slane %v7996_v34, %v1392_v17  ;;  %v1389_v31 = vrot.slane %v7996_v34, %v1388_v22 }
 0x3c8   : > { %5627 = vmatprep.subr.bf16.mxu1 %v6856_v23 }
 0x3ca   : > { %5585 = vmatpush1.bf16.msra.mxu0 %v6806_v32 }
 0x3cb   : > { %5586 = vmatprep.subr.bf16.mxu0 %v6811_v27  ;;  %5628 = vmatpush1.bf16.msra.mxu1 %v6854_v1 }
 0x3cc   : > { %5629 = vmatprep.subr.bf16.mxu1 %v6859_v36 }
 0x3ce   : > { %5587 = vmatpush1.bf16.msra.mxu0 %v6809_v24 }
 0x3cf   : > { %5588 = vmatprep.subr.bf16.mxu0 %v6814_v41  ;;  %5630 = vmatpush1.bf16.msra.mxu1 %v6857_v42 }
 0x3d0   : > { %5631 = vmatprep.subr.bf16.mxu1 %v6862_v40 }
 0x3d2   : > { %5589 = vmatpush2.bf16.msra.mxu0 %v6812_v58 }
 0x3d3   : > { %5590 = vmatprep.subr.bf16.mxu0 %v6817_v62  ;;  %5632 = vmatpush2.bf16.msra.mxu1 %v6860_v46 }
 0x3d4   : > { %5633 = vmatprep.subr.bf16.mxu1 %v6865_v47 }
 0x3d6   : > { %5591 = vmatpush2.bf16.msra.mxu0 %v6815_v43 }
 0x3d7   : > { %5592 = vmatprep.subr.bf16.mxu0 %v6820_v48  ;;  %5634 = vmatpush2.bf16.msra.mxu1 %v6863_v49 }
 0x3d8   : > { %5635 = vmatprep.subr.bf16.mxu1 %v6868_v50 }
 0x3da   : > { %5593 = vmatpush2.bf16.msra.mxu0 %v6818_v51 }
 0x3db   : > { %5594 = vmatprep.subr.bf16.mxu0 %v6823_v16  ;;  %5636 = vmatpush2.bf16.msra.mxu1 %v6866_v33 }
 0x3dc   : > { %5637 = vmatprep.subr.bf16.mxu1 %v6871_v60 }
 0x3de   : > { %5595 = vmatpush2.bf16.msra.mxu0 %v6821_v56 }
 0x3df   : > { %5596 = vmatprep.subr.bf16.mxu0 %v6826_v55  ;;  %5638 = vmatpush2.bf16.msra.mxu1 %v6869_v57 }
 0x3e0   : > { %5639 = vmatprep.subr.bf16.mxu1 %v6874_v8 }
 0x3e2   : > { %5597 = vmatpush2.bf16.msra.mxu0 %v6824_v19 }
 0x3e3   : > { %5598 = vmatprep.subr.bf16.mxu0 %v6829_v63  ;;  %5640 = vmatpush2.bf16.msra.mxu1 %v6872_v3 }
 0x3e4   : > { %5641 = vmatprep.subr.bf16.mxu1 %v6877_v20 }
 0x3e6   : > { %5599 = vmatpush2.bf16.msra.mxu0 %v6827_v7 }
 0x3e7   : > { %5600 = vmatprep.subr.bf16.mxu0 %v6832_v6  ;;  %5642 = vmatpush2.bf16.msra.mxu1 %v6875_v10 }
 0x3e8   : > { %5643 = vmatprep.subr.bf16.mxu1 %v6880_v11 }
 0x3ea   : > { %5601 = vmatpush2.bf16.msra.mxu0 %v6830_v45 }
 0x3eb   : > { %5602 = vmatprep.subr.bf16.mxu0 %v6835_v39  ;;  %5644 = vmatpush2.bf16.msra.mxu1 %v6878_v37 }
 0x3ec   : > { %5645 = vmatprep.subr.bf16.mxu1 %v6883_v59 }
 0x3ee   : > { %5603 = vmatpush2.bf16.msra.mxu0 %v6833_v30  ;;  %v4714_v30 = vld [vmem:[#allocation3] sm:$0xff] }
 0x3ef   : > { %5646 = vmatpush2.bf16.msra.mxu1 %v6881_v12 }
 0x3f1   : > { %5605 = vmatmul.mubr.bf16.vlgmr.msra.gmra.mxu0 %v4710_v14  ;;  %v4552_v54 = vpop.f32.mrf.mxu0  ;;  %v4595_v21 = vpop.f32.mrf.mxu1 }
 0x3f2   : > { %v4553_v1 = vadd.f32 %v4552_v54, %v1389_v31 }
 0x3f3   : > { %v4554_v26 = vpop.f32.mrf.mxu0  ;;  %v4597_v53 = vpop.f32.mrf.mxu1 }
 0x3f4   : > { %v4555_v27 = vadd.f32 %v4554_v26, %v1393_v29  ;;  %v4596_v46 = vadd.f32 %v4595_v21, %v4553_v1  ;;  %v4715_v21 = vld [vmem:[#allocation3 + $0x18] sm:$0xff] }
 0x3f5   : > { %v4556_v23 = vpop.f32.mrf.mxu0  ;;  %v4599_v32 = vpop.f32.mrf.mxu1 }
 0x3f6   : > { %v4557_v24 = vadd.f32 %v4556_v23, %v1389_v31  ;;  %v4598_v40 = vadd.f32 %v4597_v53, %v4555_v27  ;;  %v4716_v31 = vld [vmem:[#allocation3 + $0x10] sm:$0xff] }
 0x3f7   : > { %v4558_v36 = vpop.f32.mrf.mxu0  ;;  %v4601_v41 = vpop.f32.mrf.mxu1 }
 0x3f8   : > { %v4559_v58 = vadd.f32 %v4558_v36, %v1393_v29  ;;  %v4600_v43 = vadd.f32 %v4599_v32, %v4557_v24  ;;  %v4717_v36 = vld [vmem:[#allocation3 + $0x8] sm:$0xff] }
 0x3fa   : > { %v4602_v44 = vadd.f32 %v4601_v41, %v4559_v58 }
 0x431   : > { %v4638_v42 = vpop.f32.mrf.mxu0  ;;  %v4681_v62 = vpop.f32.mrf.mxu1 }
 0x432   : > { %v4639_v50 = vadd.f32 %v4638_v42, %v4596_v46 }
 0x433   : > { %v4640_v47 = vpop.f32.mrf.mxu0  ;;  %v4683_v49 = vpop.f32.mrf.mxu1 }
 0x434   : > { %v4641_v48 = vadd.f32 %v4640_v47, %v4598_v40  ;;  %v4682_v55 = vadd.f32 %v4681_v62, %v4639_v50 }
 0x435   : > { %v4642_v51 = vpop.f32.mrf.mxu0  ;;  %v4685_v16 = vpop.f32.mrf.mxu1 }
 0x436   : > { %v4643_v34 = vadd.f32 %v4642_v51, %v4600_v43  ;;  %v4684_v60 = vadd.f32 %v4683_v49, %v4641_v48  ;;  %v4696_v63 = vmax.f32 %v4682_v55, 0.0 }
 0x437   : > { %v4644_v33 = vpop.f32.mrf.mxu0  ;;  %v4687_v57 = vpop.f32.mrf.mxu1 }
 0x438   : > { %v4686_v56 = vadd.f32 %v4685_v16, %v4643_v34  ;;  %v4645_v35 = vadd.f32 %v4644_v33, %v4602_v44  ;;  %v4697_v19 = vmax.f32 %v4684_v60, 0.0 }
 0x43a   : > { %v4688_v8 = vadd.f32 %v4687_v57, %v4645_v35  ;;  %v4704_v9 = vmax.f32 %v4686_v56, 0.0 }
 0x43c   : > { %v4705_v61 = vmax.f32 %v4688_v8, 0.0  ;;  %v4712_v20 = vpack.c.bf16 %v4704_v9, %v4696_v63 }
 0x43e   : > { %v4713_v3 = vpack.c.bf16 %v4705_v61, %v4697_v19 }
 0x440   : > { %5647 = vmatprep.mubr.bf16.mxu1 %v4713_v3 }
 0x441   : > { %5648 = vmatmul.mubr.bf16.vlgmr.msra.gmra.mxu1 %v4712_v20 }
 0x471   : > { %v5520_v5 = vpop.f32.mrf.mxu0 }
 0x472   : > { %v5563_v0 = vpop.f32.mrf.mxu1 }
 0x473   : > { %v5522_v7 = vpop.f32.mrf.mxu0  ;;  %v5564_v2 = vadd.f32 %v5563_v0, %v5520_v5 }
 0x474   : > { %v5565_v10 = vpop.f32.mrf.mxu1 }
 0x475   : > { %v5524_v15 = vpop.f32.mrf.mxu0  ;;  %v5566_v59 = vadd.f32 %v5565_v10, %v5522_v7 }
 0x476   : > { %v5567_v4 = vpop.f32.mrf.mxu1 }
 0x477   : > { %v5526_v6 = vpop.f32.mrf.mxu0  ;;  %v5568_v12 = vadd.f32 %v5567_v4, %v5524_v15 }
 0x478   : > { %v5569_v39 = vpop.f32.mrf.mxu1 }
 0x479   : > { %v5570_v22 = vadd.f32 %v5569_v39, %v5526_v6 }
 0x4b1   : > { %v5606_v11 = vpop.f32.mrf.mxu0 }
 0x4b2   : > { %v5607_v25 = vadd.f32 %v5606_v11, %v5564_v2 }
 0x4b3   : > { %v5608_v45 = vpop.f32.mrf.mxu0 }
 0x4b4   : > { %v5609_v52 = vadd.f32 %v5608_v45, %v5566_v59 }
 0x4b5   : > { %v5610_v37 = vpop.f32.mrf.mxu0 }
 0x4b6   : > { %v5611_v26 = vadd.f32 %v5610_v37, %v5568_v12 }
 0x4b7   : > { %v5612_v54 = vpop.f32.mrf.mxu0 }
 0x4b8   : > { %v5613_v32 = vadd.f32 %v5612_v54, %v5570_v22 }
 0x501   : > { %v5649_v38 = vpop.f32.mrf.mxu1 }
 0x502   : > { %v5650_v14 = vadd.f32 %v5649_v38, %v5607_v25 }
 0x503   : > { %v5651_v17 = vpop.f32.mrf.mxu1 }
 0x504   : > { %v5658_v53 = vadd.f32 %v5650_v14, %v4714_v30  ;;  %v5652_v29 = vadd.f32 %v5651_v17, %v5609_v52 }
 0x505   : > { %v5653_v23 = vpop.f32.mrf.mxu1 }
 0x506   : > { %5662 = vst [vmem:[#allocation3] sm:$0xff] %v5658_v53  ;;  %v5659_v27 = vadd.f32 %v5652_v29, %v4715_v21  ;;  %v5654_v1 = vadd.f32 %v5653_v23, %v5611_v26 }
 0x507   : > { %v5655_v24 = vpop.f32.mrf.mxu1 }
 0x508   : > { %5663 = vst [vmem:[#allocation3 + $0x18] sm:$0xff] %v5659_v27  ;;  %v5660_v41 = vadd.f32 %v5654_v1, %v4716_v31  ;;  %v5656_v42 = vadd.f32 %v5655_v24, %v5613_v32  ;;  %5669 = sbr.rel (%p6553_p6) target bundleno = 1303 (0x517), region = 80 }
 0x50a   : > { %5664 = vst [vmem:[#allocation3 + $0x10] sm:$0xff] %v5660_v41  ;;  %v5661_v40 = vadd.f32 %v5656_v42, %v4717_v36 }
 0x50c   : > { %5665 = vst [vmem:[#allocation3 + $0x8] sm:$0xff] %v5661_v40 }
 0x50d   : > { %v5670_v58 = vld [vmem:[#allocation3] sm:$0xff]  ;;  %v5674_v62 = vld [vmem:[#allocation12] sm:$0x3] }
 0x50e   : > { %v5679_v47 = vrot.slane %v5674_v62, %v1364_v28  ;;  %v5683_v43 = vrot.slane %v5674_v62, %v1368_v13 }
 0x50f   : > { %v5671_v46 = vld [vmem:[#allocation3 + $0x18] sm:$0xff] }
 0x510   : > { %v5686_v50 = vadd.f32 %v5679_v47, %v5670_v58  ;;  %v5687_v51 = vadd.f32 %v5683_v43, %v5671_v46 }
 0x511   : > { %v5672_v48 = vld [vmem:[#allocation3 + $0x10] sm:$0xff] }
 0x512   : > { %v5688_v44 = vadd.f32 %v5679_v47, %v5672_v48  ;;  %5690 = vst [vmem:[#allocation13] sm:$0xff] %v5686_v50  ;;  %5691 = vst [vmem:[#allocation13 + $0x8] sm:$0xff] %v5687_v51 }
 0x513   : > { %v5673_v49 = vld [vmem:[#allocation3 + $0x8] sm:$0xff] }
 0x514   : > { %v5689_v34 = vadd.f32 %v5683_v43, %v5673_v49  ;;  %5692 = vst [vmem:[#allocation13 + $0x10] sm:$0xff] %v5688_v44 }
 0x516   : > { %5693 = vst [vmem:[#allocation13 + $0x18] sm:$0xff] %v5689_v34 }
 0x517 PF: > { %p6619_p5 = scmp.eq.s32.totalorder %s7233_s30, 3  ;;  %s7161_s27 = smov [#allocation13]  }
 0x518   : > { %s5704_s8 = sshll.u32 %s7161_s27, 4  ;;  %s5705_s8 = int_to_ptr.vmem [resolvable:$true] %s5704_s8 }
 0x519   : > { %s7056_s23 = scalar_lea.vmem %s5705_s8, 512  ;;  %p7063_p4 = scmp.lt.s32.totalorder %s5705_s8, %s5705_s8 }
 0x51a   : > { %p7057_p7 = scmp.ne.s32.totalorder %s5705_s8, %s7056_s23  ;;  %p7064_p3 = scmp.lt.s32.totalorder %s7056_s23, %s7056_s23 }
 0x51c   : > { %p7058_p9 = pnand %p7057_p7, %p6619_p5  ;;  %p7065_p1 = por %p7064_p3, %p7063_p4 }
 0x51e   : > { %p7059_p11 = pneg %p7058_p9 }
 0x520   : > { %p7066_p0 = pnand %p7065_p1, %p7059_p11 }
 0x522   : > { %7069 = shalt.err (!%p7066_p0)
}
 0x523   : > { %s7162_s21 = smov 256   ;;  %s7163_s11 = smov 16  }
 0x524   : > { %s8259_s15 = sld [smem:[#allocation23_spill]] }
 0x52a   : > { %6589 = dma.vmem_to_hbm [thread:$0]  (%p6619_p5), %s5705_s8, 512, %s8259_s15, [#allocation6], %s7162_s21, %s7162_s21, %s7163_s11  }
 0x52b   : > { %7121 = dma.done.wait (%p6619_p5), [#allocation6], 512  }
 0x52c   : > { %7123 = vsyncadd (%p6619_p5), [#allocation6], 4294966784 }
 0x52d PF: > { %s20_s29 = sadd.s32 1, %s7146_s29   ;;  %s8260_s16 = sld [smem:[#allocation20_spill]] }
 0x52e   : > { %p17_p2 = scmp.ge.s32.totalorder %s20_s29, 6   ;;  %s8261_s12 = sld [smem:[#allocation19_spill]] }
 0x52f   : > { %s8262_s24 = smov %s7130_s25  ;;  %s8263_s25 = smov %s7134_s26 }
 0x530   : > { %s8265_s27 = smov %s7142_s28  ;;  %19 = sbr.rel (!%p17_p2) target bundleno = 9 (0x9), region = 130 }
 0x533   : > { %s8264_s26 = smov %s8260_s16 }
 0x534   : > { %s8266_s28 = smov %s8261_s12 }
 0x535   :  { %5720 = vsyncpa [#allocation5], 1 }
 0x536   :  { %5722 = vsyncpa [#allocation5 + $0x1], 1 }
 0x537   :  { %5723 = vsyncpa [#allocation8], 1 }
 0x538   :  { %5724 = vsyncpa [#allocation6], 1 }
 0x539   :  { %5726 = vsyncpa [#allocation6 + $0x1], 1 }

</bundles_post_ra>
